<compile_context>
chip_gen: v7x
topology: tpu7x:2x2x1
jax: 0.10.0
libtpu: 0.0.40
codegen_flags: <defaults>
</compile_context>

<pallas_src>
import jax
import jax.numpy as jnp
from jax import lax
from jax.experimental import pallas as pl
from jax.experimental.pallas import tpu as pltpu


def autopad(k, p=None, d=1):
    """Same autopad as the PyTorch reference."""
    if d > 1:
        k = d * (k - 1) + 1
    if p is None:
        p = k // 2
    return p


def conv_gn_forward(x, weight, gamma, beta, k, s=1, p=None, d=1,
                    num_groups=16, eps=1e-5):
    """x: (N, C1, H, W) f32; weight: (C2, C1, K, K); gamma/beta: (C2,). Returns NCHW f32."""
    N, C1, H, W = x.shape
    C2 = weight.shape[0]
    p = autopad(k, p, d)
    Ho = (H + 2 * p - d * (k - 1) - 1) // s + 1
    Wo = (W + 2 * p - d * (k - 1) - 1) // s + 1
    HW = Ho * Wo
    Hp, Wp = H + 2 * p, W + 2 * p
    G = num_groups
    cg = C2 // G
    KK = k * k
    # TODO(synk): grouped conv (g > 1) is not implemented (module default g=1).

    # ---- glue: layout plumbing only (pad / transpose / cast), no k^2 blow-up ----
    x_nhwc = jnp.transpose(
        jnp.pad(x.astype(jnp.bfloat16), ((0, 0), (0, 0), (p, p), (p, p))),
        (0, 2, 3, 1))                                           # (N, Hp, Wp, C1) bf16
    w_taps = jnp.transpose(weight, (2, 3, 0, 1)).reshape(KK, C2, C1)
    w_taps = w_taps.astype(jnp.bfloat16)                        # (KK, C2, C1) bf16
    gamma3 = gamma.astype(jnp.float32).reshape(G, cg, 1)
    beta3 = beta.astype(jnp.float32).reshape(G, cg, 1)

    def kernel(x_ref, w_ref, g_ref, b_ref, o_ref):
        # --- conv: accumulate over the k*k taps (no im2col) ---
        # acc[c2, hw] += sum_c1 w[tap, c2, c1] * x_win[hw, c1]   (bf16 x bf16 -> f32)
        acc = None
        for kh in range(k):
            for kw in range(k):
                if s == 1:
                    win = x_ref[0, kh * d: kh * d + Ho, kw * d: kw * d + Wo, :]
                else:
                    # Strided output sampling (not exercised by the demo, s=1).
                    win = x_ref[0, pl.ds(kh * d, Ho, s), pl.ds(kw * d, Wo, s), :]
                win2 = win.reshape(HW, C1)                      # (HW, C1) bf16
                w_tap = w_ref[kh * k + kw]                      # (C2, C1) bf16
                part = lax.dot_general(                         # (C2, HW) f32 on the MXU
                    w_tap, win2,
                    dimension_numbers=(((1,), (1,)), ((), ())),
                    preferred_element_type=jnp.float32)
                acc = part if acc is None else acc + part

        # --- GroupNorm(16, C2): group-structured view, direct sums, 2-pass var ---
        acc3 = acc.reshape(G, cg, HW)
        inv_cnt = 1.0 / float(cg * HW)
        mean = jnp.sum(jnp.sum(acc3, axis=2, keepdims=True),
                       axis=1, keepdims=True) * inv_cnt          # (G, 1, 1)
        cent = acc3 - mean
        var = jnp.sum(jnp.sum(cent * cent, axis=2, keepdims=True),
                      axis=1, keepdims=True) * inv_cnt           # (G, 1, 1)
        scale = lax.rsqrt(var + eps) * g_ref[...]                # folded affine (G, cg, 1)
        yn = cent * scale + b_ref[...]                           # one FMA per element
        # SiLU.  (pl.reciprocal(1 + exp(-yn), approx=True) is an optional EUP
        # micro-opt; exact sigmoid kept so the numerical check stays tight.)
        o_ref[0] = (yn * jax.nn.sigmoid(yn)).reshape(C2, HW)

    out = pl.pallas_call(
        kernel,
        out_shape=jax.ShapeDtypeStruct((N, C2, HW), jnp.float32),
        grid_spec=pltpu.PrefetchScalarGridSpec(
            num_scalar_prefetch=0,
            grid=(N,),
            in_specs=[
                pl.BlockSpec((1, Hp, Wp, C1), lambda n: (n, 0, 0, 0)),  # padded input
                pl.BlockSpec((KK, C2, C1), lambda n: (0, 0, 0)),        # per-tap weights
                pl.BlockSpec((G, cg, 1), lambda n: (0, 0, 0)),          # gamma
                pl.BlockSpec((G, cg, 1), lambda n: (0, 0, 0)),          # beta
            ],
            out_specs=pl.BlockSpec((1, C2, HW), lambda n: (n, 0, 0)),
        ),
        compiler_params=pltpu.CompilerParams(
            dimension_semantics=("parallel",),
            # Tiles here are tiny; for production shapes sweep this per
            # generation (64-100 MiB on v5e/v6e, keep usable tiles <=~28 MiB on v7x).
            vmem_limit_bytes=32 * 1024 * 1024,
        ),
    )(x_nhwc, w_taps, gamma3, beta3)

    # TODO(synk): for production H*W / C2, add HW tiling with a two-pass
    # GroupNorm and a group-axis grid (needs cg >= 8) to bound VMEM/vregs and
    # feed v7x's two TensorCores; unnecessary at these block sizes.
    return out.reshape(N, C2, Ho, Wo)


def reference(x, weight, gamma, beta, k, s, p, d, num_groups=16, eps=1e-5):
    """Pure-JAX reference matching PyTorch Conv2d(bias=False) + GroupNorm + SiLU."""
    y = lax.conv_general_dilated(
        x, weight, window_strides=(s, s), padding=[(p, p), (p, p)],
        rhs_dilation=(d, d), dimension_numbers=("NCHW", "OIHW", "NCHW"),
        precision=lax.Precision.HIGHEST)
    N, C2, Ho, Wo = y.shape
    cg = C2 // num_groups
    yg = y.reshape(N, num_groups, cg, Ho, Wo)
    mean = yg.mean(axis=(2, 3, 4), keepdims=True)
    var = yg.var(axis=(2, 3, 4), keepdims=True)
    yn = (yg - mean) / jnp.sqrt(var + eps)
    yn = yn.reshape(N, C2, Ho, Wo) * gamma[None, :, None, None] + beta[None, :, None, None]
    return yn * jax.nn.sigmoid(yn)


if __name__ == "__main__":
    # Small shapes consistent with the module: GroupNorm(16, c2) needs c2 % 16 == 0.
    N, c1, c2 = 2, 4, 32
    H = W = 16
    k, s, d = 3, 1, 1
    p = autopad(k, None, d)

    key = jax.random.PRNGKey(0)
    kx, kw, kg, kb = jax.random.split(key, 4)
    x = jax.random.normal(kx, (N, c1, H, W), jnp.float32)

    # Deterministic synthetic init (Conv2d-like uniform, non-trivial GN affine).
    fan_in = c1 * k * k
    bound = 1.0 / (fan_in ** 0.5)
    weight = jax.random.uniform(kw, (c2, c1, k, k), jnp.float32, -bound, bound)
    gamma = jax.random.uniform(kg, (c2,), jnp.float32, 0.8, 1.2)
    beta = jax.random.uniform(kb, (c2,), jnp.float32, -0.2, 0.2)

    out = conv_gn_forward(x, weight, gamma, beta, k, s, p, d)
    out = jax.block_until_ready(out)
    assert out.shape == (N, c2, H, W), out.shape

    # Tight check vs a reference fed the same bf16-cast operands (isolates the
    # kernel's fusion/layout correctness from the intended bf16 quantization).
    x_b = x.astype(jnp.bfloat16).astype(jnp.float32)
    w_b = weight.astype(jnp.bfloat16).astype(jnp.float32)
    ref_b = reference(x_b, w_b, gamma, beta, k, s, p, d)
    err_b = float(jnp.max(jnp.abs(out - ref_b)))
    assert jnp.allclose(out, ref_b, atol=2e-3, rtol=2e-3), err_b

    # Loose check vs the full f32 reference (bf16 MXU operands per perf review).
    ref = reference(x, weight, gamma, beta, k, s, p, d)
    err = float(jnp.max(jnp.abs(out - ref)))
    assert jnp.allclose(out, ref, atol=3e-2, rtol=3e-2), err

    print("KERNEL_OK")
</pallas_src>

<mosaic_0001>
module attributes {stable_mosaic.version = 11 : i64} {
  func.func @kernel(%arg0: i32, %arg1: memref<1x18x18x4xbf16, #tpu.memory_space<vmem>>, %arg2: memref<9x32x4xbf16, #tpu.memory_space<vmem>>, %arg3: memref<16x2x1xf32, #tpu.memory_space<vmem>>, %arg4: memref<16x2x1xf32, #tpu.memory_space<vmem>>, %arg5: memref<1x32x256xf32, #tpu.memory_space<vmem>>) attributes {dimension_semantics = [#tpu.dimension_semantics<parallel>], iteration_bounds = array<i64: 2>, scalar_prefetch = 0 : i64, scratch_operands = 0 : i64, tpu.core_type = #tpu.core_type<tc>, window_params = [{transform_indices = @transform_0, window_bounds = array<i64: 1, 18, 18, 4>}, {pipeline_mode = #tpu.pipeline_mode<synchronous>, transform_indices = @transform_1, window_bounds = array<i64: 9, 32, 4>}, {pipeline_mode = #tpu.pipeline_mode<synchronous>, transform_indices = @transform_2, window_bounds = array<i64: 16, 2, 1>}, {pipeline_mode = #tpu.pipeline_mode<synchronous>, transform_indices = @transform_3, window_bounds = array<i64: 16, 2, 1>}, {transform_indices = @transform_4, window_bounds = array<i64: 1, 32, 256>}]} {
    %c0 = arith.constant 0 : index
    %c0_0 = arith.constant 0 : index
    %c0_1 = arith.constant 0 : index
    %c0_2 = arith.constant 0 : index
    %0 = vector.load %arg1[%c0, %c0_0, %c0_1, %c0_2] : memref<1x18x18x4xbf16, #tpu.memory_space<vmem>>, vector<1x16x16x4xbf16>
    %1 = vector.shape_cast %0 : vector<1x16x16x4xbf16> to vector<16x16x4xbf16>
    %2 = vector.shape_cast %1 : vector<16x16x4xbf16> to vector<256x4xbf16>
    %c0_3 = arith.constant 0 : index
    %c0_4 = arith.constant 0 : index
    %c0_5 = arith.constant 0 : index
    %3 = vector.load %arg2[%c0_3, %c0_4, %c0_5] : memref<9x32x4xbf16, #tpu.memory_space<vmem>>, vector<1x32x4xbf16>
    %4 = vector.shape_cast %3 : vector<1x32x4xbf16> to vector<32x4xbf16>
    %cst = arith.constant dense<0.000000e+00> : vector<32x256xf32>
    %5 = tpu.matmul %4, %2, %cst {dimension_numbers = #tpu.dot_dimension_numbers<[1], [1], [0], [0], [0, 0, 1, 0], [], []>} : vector<32x4xbf16>, vector<256x4xbf16>, vector<32x256xf32> -> vector<32x256xf32>
    %c0_6 = arith.constant 0 : index
    %c0_7 = arith.constant 0 : index
    %c1 = arith.constant 1 : index
    %c0_8 = arith.constant 0 : index
    %6 = vector.load %arg1[%c0_6, %c0_7, %c1, %c0_8] : memref<1x18x18x4xbf16, #tpu.memory_space<vmem>>, vector<1x16x16x4xbf16>
    %7 = vector.shape_cast %6 : vector<1x16x16x4xbf16> to vector<16x16x4xbf16>
    %8 = vector.shape_cast %7 : vector<16x16x4xbf16> to vector<256x4xbf16>
    %c1_9 = arith.constant 1 : index
    %c0_10 = arith.constant 0 : index
    %c0_11 = arith.constant 0 : index
    %9 = vector.load %arg2[%c1_9, %c0_10, %c0_11] : memref<9x32x4xbf16, #tpu.memory_space<vmem>>, vector<1x32x4xbf16>
    %10 = vector.shape_cast %9 : vector<1x32x4xbf16> to vector<32x4xbf16>
    %cst_12 = arith.constant dense<0.000000e+00> : vector<32x256xf32>
    %11 = tpu.matmul %10, %8, %cst_12 {dimension_numbers = #tpu.dot_dimension_numbers<[1], [1], [0], [0], [0, 0, 1, 0], [], []>} : vector<32x4xbf16>, vector<256x4xbf16>, vector<32x256xf32> -> vector<32x256xf32>
    %12 = arith.addf %5, %11 : vector<32x256xf32>
    %c0_13 = arith.constant 0 : index
    %c0_14 = arith.constant 0 : index
    %c2 = arith.constant 2 : index
    %c0_15 = arith.constant 0 : index
    %13 = vector.load %arg1[%c0_13, %c0_14, %c2, %c0_15] : memref<1x18x18x4xbf16, #tpu.memory_space<vmem>>, vector<1x16x16x4xbf16>
    %14 = vector.shape_cast %13 : vector<1x16x16x4xbf16> to vector<16x16x4xbf16>
    %15 = vector.shape_cast %14 : vector<16x16x4xbf16> to vector<256x4xbf16>
    %c2_16 = arith.constant 2 : index
    %c0_17 = arith.constant 0 : index
    %c0_18 = arith.constant 0 : index
    %16 = vector.load %arg2[%c2_16, %c0_17, %c0_18] : memref<9x32x4xbf16, #tpu.memory_space<vmem>>, vector<1x32x4xbf16>
    %17 = vector.shape_cast %16 : vector<1x32x4xbf16> to vector<32x4xbf16>
    %cst_19 = arith.constant dense<0.000000e+00> : vector<32x256xf32>
    %18 = tpu.matmul %17, %15, %cst_19 {dimension_numbers = #tpu.dot_dimension_numbers<[1], [1], [0], [0], [0, 0, 1, 0], [], []>} : vector<32x4xbf16>, vector<256x4xbf16>, vector<32x256xf32> -> vector<32x256xf32>
    %19 = arith.addf %12, %18 : vector<32x256xf32>
    %c0_20 = arith.constant 0 : index
    %c1_21 = arith.constant 1 : index
    %c0_22 = arith.constant 0 : index
    %c0_23 = arith.constant 0 : index
    %20 = vector.load %arg1[%c0_20, %c1_21, %c0_22, %c0_23] : memref<1x18x18x4xbf16, #tpu.memory_space<vmem>>, vector<1x16x16x4xbf16>
    %21 = vector.shape_cast %20 : vector<1x16x16x4xbf16> to vector<16x16x4xbf16>
    %22 = vector.shape_cast %21 : vector<16x16x4xbf16> to vector<256x4xbf16>
    %c3 = arith.constant 3 : index
    %c0_24 = arith.constant 0 : index
    %c0_25 = arith.constant 0 : index
    %23 = vector.load %arg2[%c3, %c0_24, %c0_25] : memref<9x32x4xbf16, #tpu.memory_space<vmem>>, vector<1x32x4xbf16>
    %24 = vector.shape_cast %23 : vector<1x32x4xbf16> to vector<32x4xbf16>
    %cst_26 = arith.constant dense<0.000000e+00> : vector<32x256xf32>
    %25 = tpu.matmul %24, %22, %cst_26 {dimension_numbers = #tpu.dot_dimension_numbers<[1], [1], [0], [0], [0, 0, 1, 0], [], []>} : vector<32x4xbf16>, vector<256x4xbf16>, vector<32x256xf32> -> vector<32x256xf32>
    %26 = arith.addf %19, %25 : vector<32x256xf32>
    %c0_27 = arith.constant 0 : index
    %c1_28 = arith.constant 1 : index
    %c1_29 = arith.constant 1 : index
    %c0_30 = arith.constant 0 : index
    %27 = vector.load %arg1[%c0_27, %c1_28, %c1_29, %c0_30] : memref<1x18x18x4xbf16, #tpu.memory_space<vmem>>, vector<1x16x16x4xbf16>
    %28 = vector.shape_cast %27 : vector<1x16x16x4xbf16> to vector<16x16x4xbf16>
    %29 = vector.shape_cast %28 : vector<16x16x4xbf16> to vector<256x4xbf16>
    %c4 = arith.constant 4 : index
    %c0_31 = arith.constant 0 : index
    %c0_32 = arith.constant 0 : index
    %30 = vector.load %arg2[%c4, %c0_31, %c0_32] : memref<9x32x4xbf16, #tpu.memory_space<vmem>>, vector<1x32x4xbf16>
    %31 = vector.shape_cast %30 : vector<1x32x4xbf16> to vector<32x4xbf16>
    %cst_33 = arith.constant dense<0.000000e+00> : vector<32x256xf32>
    %32 = tpu.matmul %31, %29, %cst_33 {dimension_numbers = #tpu.dot_dimension_numbers<[1], [1], [0], [0], [0, 0, 1, 0], [], []>} : vector<32x4xbf16>, vector<256x4xbf16>, vector<32x256xf32> -> vector<32x256xf32>
    %33 = arith.addf %26, %32 : vector<32x256xf32>
    %c0_34 = arith.constant 0 : index
    %c1_35 = arith.constant 1 : index
    %c2_36 = arith.constant 2 : index
    %c0_37 = arith.constant 0 : index
    %34 = vector.load %arg1[%c0_34, %c1_35, %c2_36, %c0_37] : memref<1x18x18x4xbf16, #tpu.memory_space<vmem>>, vector<1x16x16x4xbf16>
    %35 = vector.shape_cast %34 : vector<1x16x16x4xbf16> to vector<16x16x4xbf16>
    %36 = vector.shape_cast %35 : vector<16x16x4xbf16> to vector<256x4xbf16>
    %c5 = arith.constant 5 : index
    %c0_38 = arith.constant 0 : index
    %c0_39 = arith.constant 0 : index
    %37 = vector.load %arg2[%c5, %c0_38, %c0_39] : memref<9x32x4xbf16, #tpu.memory_space<vmem>>, vector<1x32x4xbf16>
    %38 = vector.shape_cast %37 : vector<1x32x4xbf16> to vector<32x4xbf16>
    %cst_40 = arith.constant dense<0.000000e+00> : vector<32x256xf32>
    %39 = tpu.matmul %38, %36, %cst_40 {dimension_numbers = #tpu.dot_dimension_numbers<[1], [1], [0], [0], [0, 0, 1, 0], [], []>} : vector<32x4xbf16>, vector<256x4xbf16>, vector<32x256xf32> -> vector<32x256xf32>
    %40 = arith.addf %33, %39 : vector<32x256xf32>
    %c0_41 = arith.constant 0 : index
    %c2_42 = arith.constant 2 : index
    %c0_43 = arith.constant 0 : index
    %c0_44 = arith.constant 0 : index
    %41 = vector.load %arg1[%c0_41, %c2_42, %c0_43, %c0_44] : memref<1x18x18x4xbf16, #tpu.memory_space<vmem>>, vector<1x16x16x4xbf16>
    %42 = vector.shape_cast %41 : vector<1x16x16x4xbf16> to vector<16x16x4xbf16>
    %43 = vector.shape_cast %42 : vector<16x16x4xbf16> to vector<256x4xbf16>
    %c6 = arith.constant 6 : index
    %c0_45 = arith.constant 0 : index
    %c0_46 = arith.constant 0 : index
    %44 = vector.load %arg2[%c6, %c0_45, %c0_46] : memref<9x32x4xbf16, #tpu.memory_space<vmem>>, vector<1x32x4xbf16>
    %45 = vector.shape_cast %44 : vector<1x32x4xbf16> to vector<32x4xbf16>
    %cst_47 = arith.constant dense<0.000000e+00> : vector<32x256xf32>
    %46 = tpu.matmul %45, %43, %cst_47 {dimension_numbers = #tpu.dot_dimension_numbers<[1], [1], [0], [0], [0, 0, 1, 0], [], []>} : vector<32x4xbf16>, vector<256x4xbf16>, vector<32x256xf32> -> vector<32x256xf32>
    %47 = arith.addf %40, %46 : vector<32x256xf32>
    %c0_48 = arith.constant 0 : index
    %c2_49 = arith.constant 2 : index
    %c1_50 = arith.constant 1 : index
    %c0_51 = arith.constant 0 : index
    %48 = vector.load %arg1[%c0_48, %c2_49, %c1_50, %c0_51] : memref<1x18x18x4xbf16, #tpu.memory_space<vmem>>, vector<1x16x16x4xbf16>
    %49 = vector.shape_cast %48 : vector<1x16x16x4xbf16> to vector<16x16x4xbf16>
    %50 = vector.shape_cast %49 : vector<16x16x4xbf16> to vector<256x4xbf16>
    %c7 = arith.constant 7 : index
    %c0_52 = arith.constant 0 : index
    %c0_53 = arith.constant 0 : index
    %51 = vector.load %arg2[%c7, %c0_52, %c0_53] : memref<9x32x4xbf16, #tpu.memory_space<vmem>>, vector<1x32x4xbf16>
    %52 = vector.shape_cast %51 : vector<1x32x4xbf16> to vector<32x4xbf16>
    %cst_54 = arith.constant dense<0.000000e+00> : vector<32x256xf32>
    %53 = tpu.matmul %52, %50, %cst_54 {dimension_numbers = #tpu.dot_dimension_numbers<[1], [1], [0], [0], [0, 0, 1, 0], [], []>} : vector<32x4xbf16>, vector<256x4xbf16>, vector<32x256xf32> -> vector<32x256xf32>
    %54 = arith.addf %47, %53 : vector<32x256xf32>
    %c0_55 = arith.constant 0 : index
    %c2_56 = arith.constant 2 : index
    %c2_57 = arith.constant 2 : index
    %c0_58 = arith.constant 0 : index
    %55 = vector.load %arg1[%c0_55, %c2_56, %c2_57, %c0_58] : memref<1x18x18x4xbf16, #tpu.memory_space<vmem>>, vector<1x16x16x4xbf16>
    %56 = vector.shape_cast %55 : vector<1x16x16x4xbf16> to vector<16x16x4xbf16>
    %57 = vector.shape_cast %56 : vector<16x16x4xbf16> to vector<256x4xbf16>
    %c8 = arith.constant 8 : index
    %c0_59 = arith.constant 0 : index
    %c0_60 = arith.constant 0 : index
    %58 = vector.load %arg2[%c8, %c0_59, %c0_60] : memref<9x32x4xbf16, #tpu.memory_space<vmem>>, vector<1x32x4xbf16>
    %59 = vector.shape_cast %58 : vector<1x32x4xbf16> to vector<32x4xbf16>
    %cst_61 = arith.constant dense<0.000000e+00> : vector<32x256xf32>
    %60 = tpu.matmul %59, %57, %cst_61 {dimension_numbers = #tpu.dot_dimension_numbers<[1], [1], [0], [0], [0, 0, 1, 0], [], []>} : vector<32x4xbf16>, vector<256x4xbf16>, vector<32x256xf32> -> vector<32x256xf32>
    %61 = arith.addf %54, %60 : vector<32x256xf32>
    %62 = vector.shape_cast %61 : vector<32x256xf32> to vector<16x2x256xf32>
    %cst_62 = arith.constant dense<0.000000e+00> : vector<16x2xf32>
    %63 = vector.multi_reduction <add>, %62, %cst_62 [2] : vector<16x2x256xf32> to vector<16x2xf32>
    %64 = vector.shape_cast %63 : vector<16x2xf32> to vector<16x2x1xf32>
    %cst_63 = arith.constant dense<0.000000e+00> : vector<16x1xf32>
    %65 = vector.multi_reduction <add>, %64, %cst_63 [1] : vector<16x2x1xf32> to vector<16x1xf32>
    %66 = vector.shape_cast %65 : vector<16x1xf32> to vector<16x1x1xf32>
    %cst_64 = arith.constant 0.001953125 : f32
    %67 = vector.broadcast %cst_64 : f32 to vector<16x1x1xf32>
    %68 = arith.mulf %66, %67 : vector<16x1x1xf32>
    %69 = vector.broadcast %68 : vector<16x1x1xf32> to vector<16x2x256xf32>
    %70 = arith.subf %62, %69 : vector<16x2x256xf32>
    %71 = arith.mulf %70, %70 : vector<16x2x256xf32>
    %cst_65 = arith.constant dense<0.000000e+00> : vector<16x2xf32>
    %72 = vector.multi_reduction <add>, %71, %cst_65 [2] : vector<16x2x256xf32> to vector<16x2xf32>
    %73 = vector.shape_cast %72 : vector<16x2xf32> to vector<16x2x1xf32>
    %cst_66 = arith.constant dense<0.000000e+00> : vector<16x1xf32>
    %74 = vector.multi_reduction <add>, %73, %cst_66 [1] : vector<16x2x1xf32> to vector<16x1xf32>
    %75 = vector.shape_cast %74 : vector<16x1xf32> to vector<16x1x1xf32>
    %cst_67 = arith.constant 0.001953125 : f32
    %76 = vector.broadcast %cst_67 : f32 to vector<16x1x1xf32>
    %77 = arith.mulf %75, %76 : vector<16x1x1xf32>
    %cst_68 = arith.constant 9.99999974E-6 : f32
    %78 = vector.broadcast %cst_68 : f32 to vector<16x1x1xf32>
    %79 = arith.addf %77, %78 : vector<16x1x1xf32>
    %80 = math.rsqrt %79 : vector<16x1x1xf32>
    %c0_69 = arith.constant 0 : index
    %c0_70 = arith.constant 0 : index
    %c0_71 = arith.constant 0 : index
    %81 = vector.load %arg3[%c0_69, %c0_70, %c0_71] : memref<16x2x1xf32, #tpu.memory_space<vmem>>, vector<16x2x1xf32>
    %82 = vector.broadcast %80 : vector<16x1x1xf32> to vector<16x2x1xf32>
    %83 = arith.mulf %82, %81 : vector<16x2x1xf32>
    %84 = vector.broadcast %83 : vector<16x2x1xf32> to vector<16x2x256xf32>
    %85 = arith.mulf %70, %84 : vector<16x2x256xf32>
    %c0_72 = arith.constant 0 : index
    %c0_73 = arith.constant 0 : index
    %c0_74 = arith.constant 0 : index
    %86 = vector.load %arg4[%c0_72, %c0_73, %c0_74] : memref<16x2x1xf32, #tpu.memory_space<vmem>>, vector<16x2x1xf32>
    %87 = vector.broadcast %86 : vector<16x2x1xf32> to vector<16x2x256xf32>
    %88 = arith.addf %85, %87 : vector<16x2x256xf32>
    %89 = arith.negf %88 : vector<16x2x256xf32>
    %90 = math.exp %89 : vector<16x2x256xf32>
    %cst_75 = arith.constant 1.000000e+00 : f32
    %91 = vector.broadcast %cst_75 : f32 to vector<16x2x256xf32>
    %92 = arith.addf %91, %90 : vector<16x2x256xf32>
    %93 = arith.divf %91, %92 : vector<16x2x256xf32>
    %94 = arith.mulf %88, %93 : vector<16x2x256xf32>
    %95 = vector.shape_cast %94 : vector<16x2x256xf32> to vector<32x256xf32>
    %c0_76 = arith.constant 0 : index
    %c0_77 = arith.constant 0 : index
    %c0_78 = arith.constant 0 : index
    %96 = vector.load %arg5[%c0_76, %c0_77, %c0_78] : memref<1x32x256xf32, #tpu.memory_space<vmem>>, vector<1x32x256xf32>
    %97 = vector.shape_cast %96 : vector<1x32x256xf32> to vector<32x256xf32>
    %98 = vector.shape_cast %95 : vector<32x256xf32> to vector<1x32x256xf32>
    tpu.vector_store %arg5[%c0_76, %c0_77, %c0_78], %98 {strides = array<i32>} : memref<1x32x256xf32, #tpu.memory_space<vmem>>, vector<1x32x256xf32>,
    return
  }
  func.func @transform_0(%arg0: i32) -> (i32, i32, i32, i32) {
    %c0_i32 = arith.constant 0 : i32
    %c0_i32_0 = arith.constant 0 : i32
    %c0_i32_1 = arith.constant 0 : i32
    %c0_i32_2 = arith.constant 0 : i32
    return %arg0, %c0_i32, %c0_i32_0, %c0_i32_1 : i32, i32, i32, i32
  }
  func.func @transform_1(%arg0: i32) -> (i32, i32, i32) {
    %c0_i32 = arith.constant 0 : i32
    %c0_i32_0 = arith.constant 0 : i32
    %c0_i32_1 = arith.constant 0 : i32
    %c0_i32_2 = arith.constant 0 : i32
    return %c0_i32, %c0_i32_0, %c0_i32_1 : i32, i32, i32
  }
  func.func @transform_2(%arg0: i32) -> (i32, i32, i32) {
    %c0_i32 = arith.constant 0 : i32
    %c0_i32_0 = arith.constant 0 : i32
    %c0_i32_1 = arith.constant 0 : i32
    %c0_i32_2 = arith.constant 0 : i32
    return %c0_i32, %c0_i32_0, %c0_i32_1 : i32, i32, i32
  }
  func.func @transform_3(%arg0: i32) -> (i32, i32, i32) {
    %c0_i32 = arith.constant 0 : i32
    %c0_i32_0 = arith.constant 0 : i32
    %c0_i32_1 = arith.constant 0 : i32
    %c0_i32_2 = arith.constant 0 : i32
    return %c0_i32, %c0_i32_0, %c0_i32_1 : i32, i32, i32
  }
  func.func @transform_4(%arg0: i32) -> (i32, i32, i32) {
    %c0_i32 = arith.constant 0 : i32
    %c0_i32_0 = arith.constant 0 : i32
    %c0_i32_1 = arith.constant 0 : i32
    return %arg0, %c0_i32, %c0_i32_0 : i32, i32, i32
  }
}

</mosaic_0001>

<bundles_post_ra>
// kernel: tpu_custom_call.1
= control target key start
LH: loop header
LB: loop body
LE: loop exit
PB: predicated region body
PF: predicated region fallthrough
CT: control target
= control target key end

     0   :  { %9 = vsyncpa [#allocation3], 0  ;;  %s8647_s0 = inlined_call_operand.vmem [shape: bf16[2,18,18,4], index: 0, kind: input, shape index: {}]   ;;  %s8648_s1 = inlined_call_operand.vmem [shape: bf16[9,32,4], index: 1, kind: input, shape index: {}]   ;;  %s8649_s2 = inlined_call_operand.vmem [shape: f32[16,2,1], index: 2, kind: input, shape index: {}]   ;;  %s8650_s3 = inlined_call_operand.vmem [shape: f32[16,2,1], index: 3, kind: input, shape index: {}]   ;;  %s8651_s4 = inlined_call_operand.hbm [shape: f32[2,32,256], index: 4, kind: output, shape index: {}]  }
   0x1   :  { %11 = vsyncpa [#allocation3 + $0x1], 0  ;;  %s6609_s15 = smov 0   ;;  %s6611_s16 = smov 0  }
   0x2   :  { %s6613_s17 = smov 0   ;;  %s6615_s18 = smov 0  }
   0x3 LB: > { %s6630_s19 = sadd.s32 4294967295, %s6576_s18   ;;  %s5428_s20 = sadd.s32 4294967294, %s6576_s18   ;;  %s6576_s18 = sphi %s6615_s18, %s8683_s18   ;;  %s6572_s17 = sphi %s6613_s17, %s8682_s17   ;;  %s6568_s16 = sphi %s6611_s16, %s8681_s16   ;;  %s6564_s15 = sphi %s6609_s15, %s8680_s15  }
   0x4   : > { %s6634_s21 = sadd.s32 1, %s6576_s18   ;;  %s113_s22 = sadd.s32 1, %s6572_s17 }
   0x5   : > { %s110_s23 = ssub.s32 %s6576_s18, %s6634_s21  ;;  %p123_p0 = scmp.ne.s32.totalorder %s6572_s17, %s6568_s16 }
   0x6   : > { %p111_p1 = scmp.eq.s32.totalorder %s110_s23, 0  ;;  %p124_p2 = scmp.eq.s32.totalorder %s6630_s19, 1 }
   0x7   : > { %p129_p3 = scmp.ne.s32.totalorder %s6568_s16, %s6564_s15  ;;  %p130_p4 = scmp.eq.s32.totalorder %s5428_s20, 1 }
   0x8   : > { %s6645_s24 = scalar_select %p111_p1, %s6572_s17, %s113_s22  }
   0x9   : > { %p6647_p5 = por %p124_p2, %p123_p0  ;;  %p6651_p6 = por %p130_p4, %p129_p3 }
   0xa   : > { %p5431_p7 = scmp.ge.s32.totalorder %s6576_s18, 1  ;;  %p165_p8 = scmp.lt.s32.totalorder %s6576_s18, 3 }
   0xc   : > { %p166_p9 = pnand %p5431_p7, %p165_p8 }
   0xe   : > { %169 = sbr.rel (%p166_p9) target bundleno = 1287 (0x507), region = 36 }
  0x15   : > { %p191_p10 = scmp.lt.s32.totalorder %s6630_s19, 1  ;;  %vm249_vm0 = vsmask.f32 3328  ;;  %vm250_vm1 = vsmask.f32 7440  ;;  %v8662_v24 = vmov 0 }
  0x16   : > { %vm6680_vm2 = vmor %vm249_vm0, %vm250_vm1  ;;  %vm699_vm3 = vcmask 31744   ;;  %vm1052_vm4 = vcmask 1042432   ;;  %vm1053_vm5 = vcmask 1046532   ;;  %vm4015_vm7 = vcmask 1041408   ;;  %s188_s10 = sand.u32 1, %s6568_s16   ;;  %s5907_s13 = sshll.u32 %s6630_s19, 10 }
  0x17   : > { %s192_s27 = scalar_select %p191_p10, %s6630_s19, 1  ;;  %v8663_v24 = vsel %vm6680_vm2, 4294967295, %v8662_v24  ;;  %vm7039_vm6 = vmor %vm1052_vm4, %vm1053_vm5 }
  0x18   : > { %8664 = vst [vmem:[#allocation5_spill] sm:$0xff] %v8663_v24  ;;  %s5432_s11 = sshll.u32 %s188_s10, 6  ;;  %s8598_s22 = scalar_lea.hbm %s8651_s4, %s5907_s13 }
  0x19   : > { %s6248_s28 = smul.u32 216, %s192_s27  ;;  %s8533_s12 = scalar_lea.vmem [#allocation2], %s5432_s11 }
  0x1a   : > { %s8606_s19 = scalar_lea.sflag [#allocation3], %s188_s10  ;;  %s6581_s27 = smov [#allocation2]  }
  0x1b   : > { %s6662_s5 = scalar_lea.vmem %s8647_s0, %s6248_s28  ;;  %s6518_s28 = sshll.u32 %s6581_s27, 4  ;;  %s6519_s28 = int_to_ptr.vmem [resolvable:$false] %s6518_s28 }
  0x1c   : > { %v213_v0 = vld [vmem:[%s6662_s5 + $0x60] sm:$0xf]  ;;  %v214_v1 = vld [vmem:[%s6662_s5 + $0x64] sm:$0xf]  ;;  %v241_v2 = vld [vmem:[%s6662_s5 + $0x68] sm:$0x1] }
  0x1d   : > { %v445_v3 = vshrl.u32 %v213_v0, 16  ;;  %v448_v4 = vshll.u32 %v213_v0, 16  ;;  %v454_v5 = vshll.u32 %v214_v1, 16  ;;  %v458_v6 = vshrl.u32 %v214_v1, 16  ;;  %v5598_v7 = vld [vmem:[%s6662_s5 + $0x6c] sm:$0xf] }
  0x1e   : > { %v464_v8 = vshll.u32 %v241_v2, 16  ;;  %v6669_v9 = vld [vmem:[%s6662_s5 + $0x70] sm:$0xf]  ;;  %v6672_v10 = vld [vmem:[%s6662_s5 + $0x74] sm:$0x1]  ;;  %v1829_v16 = vshrl.u32 %v5598_v7, 16 }
  0x1f   : > { %v447_v11 = vrot.slane %v445_v3, 4  ;;  %v450_v12 = vrot.slane %v448_v4, 5  ;;  %v456_v13 = vrot.slane %v454_v5, 5  ;;  %v460_v14 = vrot.slane %v458_v6, 4  ;;  %v197_v23 = vld [vmem:[%s6662_s5] sm:$0xf] }
  0x20   : > { %v466_v15 = vrot.slane %v464_v8, 5  ;;  %v1832_v17 = vshll.u32 %v5598_v7, 16  ;;  %v1838_v18 = vshll.u32 %v6669_v9, 16  ;;  %v1842_v21 = vshrl.u32 %v6669_v9, 16  ;;  %v198_v28 = vld [vmem:[%s6662_s5 + $0x4] sm:$0xf] }
  0x21   : > { %v451_v19 = vor.u32 %v450_v12, %v447_v11  ;;  %v461_v20 = vor.u32 %v460_v14, %v456_v13  ;;  %v1848_v22 = vshll.u32 %v6672_v10, 16  ;;  %v1831_v25 = vrot.slane %v1829_v16, 4  ;;  %v233_v35 = vld [vmem:[%s6662_s5 + $0x8] sm:$0x1]  ;;  %v5574_v42 = vld [vmem:[%s6662_s5 + $0xc] sm:$0xf] }
  0x22   : > { %v1834_v26 = vrot.slane %v1832_v17, 5  ;;  %v1840_v27 = vrot.slane %v1838_v18, 5  ;;  %v1844_v31 = vrot.slane %v1842_v21, 4  ;;  %v2320_v32 = vrot.slane %v6669_v9, 5  ;;  %v5575_v51 = vld [vmem:[%s6662_s5 + $0x10] sm:$0xf] }
  0x23   : > { %v452_v29 = vrot.slane %v451_v19, 4  ;;  %v462_v30 = vrot.slane %v461_v20, 4  ;;  %v1850_v34 = vrot.slane %v1848_v22, 5  ;;  %v253_v36 = vshrl.u32 %v197_v23, 16  ;;  %v6698_v55 = vld [vmem:[%s6662_s5 + $0x14] sm:$0x1] }
  0x24   : > { %v1835_v33 = vor.u32 %v1834_v26, %v1831_v25  ;;  %v256_v37 = vshll.u32 %v197_v23, 16  ;;  %v1845_v40 = vor.u32 %v1844_v31, %v1840_v27  ;;  %v262_v41 = vshll.u32 %v198_v28, 16  ;;  %v215_v61 = vld [vmem:[%s6662_s5 + $0x6c] sm:$0xf]  ;;  %v216_v6 = vld [vmem:[%s6662_s5 + $0x70] sm:$0xf] }
  0x25   : > { %v457_v38 = vsel %vm6680_vm2, %v452_v29, %v456_v13  ;;  %v467_v39 = vsel %vm6680_vm2, %v462_v30, %v466_v15  ;;  %v255_v45 = vrot.slane %v253_v36, 4  ;;  %v266_v49 = vshrl.u32 %v198_v28, 16  ;;  %v242_v12 = vld [vmem:[%s6662_s5 + $0x74] sm:$0x1]  ;;  %v5601_v22 = vld [vmem:[%s6662_s5 + $0x78] sm:$0xf] }
  0x26   : > { %v5448_v43 = vcombine.low %v457_v38, %v467_v39  ;;  %v1836_v44 = vrot.slane %v1835_v33, 4  ;;  %v258_v46 = vrot.slane %v256_v37, 5  ;;  %v1846_v47 = vrot.slane %v1845_v40, 4  ;;  %v5602_v33 = vld [vmem:[%s6662_s5 + $0x7c] sm:$0xf]  ;;  %v6295_v38 = vld [vmem:[%s8648_s1 + $0x10] sm:$0xff]  }
  0x27   : > { %v264_v48 = vrot.slane %v262_v41, 5  ;;  %v272_v50 = vshll.u32 %v233_v35, 16  ;;  %v2323_v53 = vrot.slane %v6672_v10, 5  ;;  %v1637_v56 = vshrl.u32 %v5574_v42, 16  ;;  %5924 = vmatprep.mubr.msk.bf16.mxu1 %vm699_vm3, %v6295_v38  ;;  %v218_v38 = vld [vmem:[%s6662_s5 + $0x7c] sm:$0xf] }
  0x28   : > { %6168 = vmatprep.subr.msk.bf16.mxu1 %vm699_vm3, %v5448_v43  ;;  %v1841_v52 = vsel %vm6680_vm2, %v1836_v44, %v1840_v27  ;;  %v259_v54 = vor.u32 %v258_v46, %v255_v45  ;;  %v1851_v57 = vsel %vm6680_vm2, %v1846_v47, %v1850_v34  ;;  %v268_v58 = vrot.slane %v266_v49, 4  ;;  %v199_v44 = vld [vmem:[%s6662_s5 + $0xc] sm:$0xf]  ;;  %v6297_v49 = vld [vmem:[%s8648_s1 + $0x40] sm:$0xff]   ;;  %s6520_s29 = scalar_lea.vmem %s6519_s28, 2048 }
  0x29   : > { %v274_v59 = vrot.slane %v272_v50, 5  ;;  %v1640_v60 = vshll.u32 %v5574_v42, 16  ;;  %v5636_v62 = vcombine.low %v1841_v52, %v1851_v57  ;;  %v1639_v0 = vrot.slane %v1637_v56, 4  ;;  %v5603_v42 = vld [vmem:[%s6662_s5 + $0x80] sm:$0x1]  ;;  %6004 = vmatprep.mubr.msk.bf16.mxu0 %vm699_vm3, %v6297_v49 }
  0x2a   : > { %v260_v63 = vrot.slane %v259_v54, 4  ;;  %v1646_v1 = vshll.u32 %v5575_v51, 16  ;;  %v269_v2 = vor.u32 %v268_v58, %v264_v48  ;;  %v1650_v4 = vshrl.u32 %v5575_v51, 16  ;;  %v5604_v49 = vld [vmem:[%s6662_s5 + $0x84] sm:$0xf] }
  0x2b   : > { %v1642_v3 = vrot.slane %v1640_v60, 5  ;;  %v1656_v5 = vshll.u32 %v6698_v55, 16  ;;  %6200 = vmatprep.subr.msk.bf16.mxu0 %vm699_vm3, %v5636_v62  ;;  %v2267_v11 = vrot.slane %v6698_v55, 5  ;;  %v469_v13 = vshrl.u32 %v215_v61, 16  ;;  %v5661_v24 = vld [vmem:[%s6662_s5 + $0xc0] sm:$0xe] }
  0x2c   : > { %v265_v7 = vsel %vm6680_vm2, %v260_v63, %v264_v48  ;;  %v1648_v8 = vrot.slane %v1646_v1, 5  ;;  %v270_v14 = vrot.slane %v269_v2, 4  ;;  %v1652_v16 = vrot.slane %v1650_v4, 4  ;;  %v234_v1 = vld [vmem:[%s6662_s5 + $0x14] sm:$0x1] }
  0x2d   : > { %v1643_v15 = vor.u32 %v1642_v3, %v1639_v0  ;;  %v1658_v17 = vrot.slane %v1656_v5, 5  ;;  %v471_v18 = vrot.slane %v469_v13, 4  ;;  %v472_v19 = vshll.u32 %v215_v61, 16  ;;  %v5577_v2 = vld [vmem:[%s6662_s5 + $0x18] sm:$0xf] }
  0x2e   : > { %v478_v20 = vshll.u32 %v216_v6, 16  ;;  %v482_v21 = vshrl.u32 %v216_v6, 16  ;;  %v275_v23 = vsel %vm6680_vm2, %v270_v14, %v274_v59  ;;  %v1653_v26 = vor.u32 %v1652_v16, %v1648_v8  ;;  %v200_v59 = vld [vmem:[%s6662_s5 + $0x10] sm:$0xf]  ;;  %v5578_v14 = vld [vmem:[%s6662_s5 + $0x1c] sm:$0xf] }
  0x2f   : > { %v1644_v25 = vrot.slane %v1643_v15, 4  ;;  %v488_v27 = vshll.u32 %v242_v12, 16  ;;  %v5440_v28 = vcombine.low %v265_v7, %v275_v23  ;;  %v474_v29 = vrot.slane %v472_v19, 5 }
  0x30   : > { %v480_v30 = vrot.slane %v478_v20, 5  ;;  %v484_v31 = vrot.slane %v482_v21, 4  ;;  %v1654_v35 = vrot.slane %v1653_v26, 4  ;;  %v1853_v37 = vshrl.u32 %v5601_v22, 16 }
  0x31   : > { %v1649_v34 = vsel %vm6680_vm2, %v1644_v25, %v1648_v8  ;;  %v490_v36 = vrot.slane %v488_v27, 5  ;;  %v707_v39 = vsel %vm699_vm3, %v5440_v28, 0  ;;  %v475_v40 = vor.u32 %v474_v29, %v471_v18  ;;  %v217_v25 = vld [vmem:[%s6662_s5 + $0x78] sm:$0xf] }
  0x32   : > { %v485_v41 = vor.u32 %v484_v31, %v480_v30  ;;  %v1856_v43 = vshll.u32 %v5601_v22, 16  ;;  %5909 = vmatpush3.bf16.xpose.msra.mxu1 %v707_v39  ;;  %v1659_v45 = vsel %vm6680_vm2, %v1654_v35, %v1658_v17  ;;  %v1855_v46 = vrot.slane %v1853_v37, 4  ;;  %v5579_v17 = vld [vmem:[%s6662_s5 + $0x20] sm:$0x1] }
  0x33   : > { %v1862_v47 = vshll.u32 %v5602_v33, 16  ;;  %v1866_v48 = vshrl.u32 %v5602_v33, 16  ;;  %v5628_v50 = vcombine.low %v1649_v34, %v1659_v45  ;;  %v476_v51 = vrot.slane %v475_v40, 4 }
  0x34   : > { %v486_v52 = vrot.slane %v485_v41, 4  ;;  %v1858_v54 = vrot.slane %v1856_v43, 5  ;;  %v1872_v58 = vshll.u32 %v5603_v42, 16  ;;  %v277_v60 = vshrl.u32 %v199_v44, 16  ;;  %v243_v43 = vld [vmem:[%s6662_s5 + $0x80] sm:$0x1] }
  0x35   : > { %v1864_v56 = vrot.slane %v1862_v47, 5  ;;  %v1868_v57 = vrot.slane %v1866_v48, 4  ;;  %v2090_v61 = vsel %vm699_vm3, %v5628_v50, 0  ;;  %v481_v62 = vsel %vm6680_vm2, %v476_v51, %v480_v30 }
  0x36   : > { %v491_v63 = vsel %vm6680_vm2, %v486_v52, %v490_v36  ;;  %v1859_v0 = vor.u32 %v1858_v54, %v1855_v46  ;;  %5989 = vmatpush3.bf16.xpose.msra.mxu0 %v2090_v61  ;;  %v1874_v5 = vrot.slane %v1872_v58, 5  ;;  %v279_v6 = vrot.slane %v277_v60, 4  ;;  %v5605_v60 = vld [vmem:[%s6662_s5 + $0x88] sm:$0xf] }
  0x37   : > { %v5449_v3 = vcombine.low %v481_v62, %v491_v63  ;;  %v1869_v4 = vor.u32 %v1868_v57, %v1864_v56  ;;  %v280_v8 = vshll.u32 %v199_v44, 16  ;;  %v286_v12 = vshll.u32 %v200_v59, 16 }
  0x38   : > { %v1860_v7 = vrot.slane %v1859_v0, 4  ;;  %v290_v13 = vshrl.u32 %v200_v59, 16  ;;  %v296_v16 = vshll.u32 %v234_v1, 16  ;;  %v1661_v18 = vshrl.u32 %v5577_v2, 16 }
  0x39   : > { %6169 = vmatprep.subr.msk.bf16.mxu1 %vm699_vm3, %v5449_v3  ;;  %v1870_v15 = vrot.slane %v1869_v4, 4  ;;  %v1664_v19 = vshll.u32 %v5577_v2, 16  ;;  %v282_v21 = vrot.slane %v280_v8, 5  ;;  %v288_v22 = vrot.slane %v286_v12, 5  ;;  %v5606_v4 = vld [vmem:[%s6662_s5 + $0x8c] sm:$0x1] }
  0x3a   : > { %v1865_v20 = vsel %vm6680_vm2, %v1860_v7, %v1864_v56  ;;  %v292_v23 = vrot.slane %v290_v13, 4  ;;  %v298_v27 = vrot.slane %v296_v16, 5  ;;  %v1663_v28 = vrot.slane %v1661_v18, 4  ;;  %v201_v13 = vld [vmem:[%s6662_s5 + $0x18] sm:$0xf] }
  0x3b   : > { %v1875_v26 = vsel %vm6680_vm2, %v1870_v15, %v1874_v5  ;;  %v1666_v29 = vrot.slane %v1664_v19, 5  ;;  %v283_v31 = vor.u32 %v282_v21, %v279_v6  ;;  %v1670_v34 = vshll.u32 %v5578_v14, 16  ;;  %v202_v18 = vld [vmem:[%s6662_s5 + $0x1c] sm:$0xf] }
  0x3c   : > { %v5637_v30 = vcombine.low %v1865_v20, %v1875_v26  ;;  %v293_v33 = vor.u32 %v292_v23, %v288_v22  ;;  %v1674_v36 = vshrl.u32 %v5578_v14, 16  ;;  %v1680_v37 = vshll.u32 %v5579_v17, 16 }
  0x3d   : > { %v1667_v35 = vor.u32 %v1666_v29, %v1663_v28  ;;  %v493_v39 = vshrl.u32 %v217_v25, 16  ;;  %v284_v40 = vrot.slane %v283_v31, 4  ;;  %v1672_v42 = vrot.slane %v1670_v34, 5  ;;  %v5580_v34 = vld [vmem:[%s6662_s5 + $0x24] sm:$0xf] }
  0x3e   : > { %6201 = vmatprep.subr.msk.bf16.mxu0 %vm699_vm3, %v5637_v30  ;;  %v294_v41 = vrot.slane %v293_v33, 4  ;;  %v496_v44 = vshll.u32 %v217_v25, 16  ;;  %v1676_v46 = vrot.slane %v1674_v36, 4  ;;  %v1682_v47 = vrot.slane %v1680_v37, 5 }
  0x3f   : > { %v1668_v45 = vrot.slane %v1667_v35, 4  ;;  %v495_v48 = vrot.slane %v493_v39, 4  ;;  %v289_v50 = vsel %vm6680_vm2, %v284_v40, %v288_v22  ;;  %v502_v54 = vshll.u32 %v218_v38, 16  ;;  %v5581_v39 = vld [vmem:[%s6662_s5 + $0x28] sm:$0xf] }
  0x40   : > { %v299_v51 = vsel %vm6680_vm2, %v294_v41, %v298_v27  ;;  %v498_v52 = vrot.slane %v496_v44, 5  ;;  %v1677_v58 = vor.u32 %v1676_v46, %v1672_v42  ;;  %v506_v59 = vshrl.u32 %v218_v38, 16  ;;  %v235_v27 = vld [vmem:[%s6662_s5 + $0x20] sm:$0x1] }
  0x41   : > { %v5441_v56 = vcombine.low %v289_v50, %v299_v51  ;;  %v1673_v57 = vsel %vm6680_vm2, %v1668_v45, %v1672_v42  ;;  %v504_v62 = vrot.slane %v502_v54, 5  ;;  %v512_v63 = vshll.u32 %v243_v43, 16  ;;  %v219_v54 = vld [vmem:[%s6662_s5 + $0x84] sm:$0xf] }
  0x42   : > { %v499_v61 = vor.u32 %v498_v52, %v495_v48  ;;  %v1877_v0 = vshrl.u32 %v5604_v49, 16  ;;  %v1678_v2 = vrot.slane %v1677_v58, 4  ;;  %v508_v3 = vrot.slane %v506_v59, 4 }
  0x43   : > { %v710_v1 = vsel %vm699_vm3, %v5441_v56, 0  ;;  %v1880_v5 = vshll.u32 %v5604_v49, 16  ;;  %v514_v7 = vrot.slane %v512_v63, 5  ;;  %v1886_v12 = vshll.u32 %v5605_v60, 16 }
  0x44   : > { %5911 = vmatpush3.bf16.xpose.msra.mxu1 %v710_v1  ;;  %v500_v6 = vrot.slane %v499_v61, 4  ;;  %v1879_v8 = vrot.slane %v1877_v0, 4  ;;  %v1683_v14 = vsel %vm6680_vm2, %v1678_v2, %v1682_v47  ;;  %v509_v15 = vor.u32 %v508_v3, %v504_v62  ;;  %v5582_v47 = vld [vmem:[%s6662_s5 + $0x2c] sm:$0x1]  ;;  %v220_v0 = vld [vmem:[%s6662_s5 + $0x88] sm:$0xf] }
  0x45   : > { %v1882_v16 = vrot.slane %v1880_v5, 5  ;;  %v1890_v17 = vshrl.u32 %v5605_v60, 16  ;;  %v5629_v19 = vcombine.low %v1673_v57, %v1683_v14  ;;  %v1888_v21 = vrot.slane %v1886_v12, 5 }
  0x46   : > { %v505_v20 = vsel %vm6680_vm2, %v500_v6, %v504_v62  ;;  %v1896_v22 = vshll.u32 %v5606_v4, 16  ;;  %v510_v23 = vrot.slane %v509_v15, 4  ;;  %v301_v28 = vshrl.u32 %v201_v13, 16 }
  0x47   : > { %v1883_v25 = vor.u32 %v1882_v16, %v1879_v8  ;;  %v1892_v26 = vrot.slane %v1890_v17, 4  ;;  %v2093_v29 = vsel %vm699_vm3, %v5629_v19, 0  ;;  %v304_v31 = vshll.u32 %v201_v13, 16  ;;  %v244_v8 = vld [vmem:[%s6662_s5 + $0x8c] sm:$0x1] }
  0x48   : > { %v1898_v30 = vrot.slane %v1896_v22, 5  ;;  %v310_v33 = vshll.u32 %v202_v18, 16  ;;  %5991 = vmatpush3.bf16.xpose.msra.mxu0 %v2093_v29  ;;  %v515_v35 = vsel %vm6680_vm2, %v510_v23, %v514_v7  ;;  %v303_v38 = vrot.slane %v301_v28, 4  ;;  %v5607_v17 = vld [vmem:[%s6662_s5 + $0x90] sm:$0xf] }
  0x49   : > { %v1884_v36 = vrot.slane %v1883_v25, 4  ;;  %v1893_v37 = vor.u32 %v1892_v26, %v1888_v21  ;;  %v5450_v40 = vcombine.low %v505_v20, %v515_v35  ;;  %v306_v41 = vrot.slane %v304_v31, 5  ;;  %v5609_v31 = vld [vmem:[%s6662_s5 + $0x98] sm:$0x1] }
  0x4a   : > { %v312_v42 = vrot.slane %v310_v33, 5  ;;  %v314_v43 = vshrl.u32 %v202_v18, 16  ;;  %v320_v46 = vshll.u32 %v235_v27, 16  ;;  %v1685_v48 = vshrl.u32 %v5580_v34, 16 }
  0x4b   : > { %v1889_v44 = vsel %vm6680_vm2, %v1884_v36, %v1888_v21  ;;  %v1894_v45 = vrot.slane %v1893_v37, 4  ;;  %6170 = vmatprep.subr.msk.bf16.mxu1 %vm699_vm3, %v5450_v40  ;;  %v307_v49 = vor.u32 %v306_v41, %v303_v38  ;;  %v1688_v51 = vshll.u32 %v5580_v34, 16  ;;  %v203_v38 = vld [vmem:[%s6662_s5 + $0x24] sm:$0xf] }
  0x4c   : > { %v316_v50 = vrot.slane %v314_v43, 4  ;;  %v1694_v52 = vshll.u32 %v5581_v39, 16  ;;  %v322_v57 = vrot.slane %v320_v46, 5  ;;  %v1687_v58 = vrot.slane %v1685_v48, 4 }
  0x4d   : > { %v1899_v56 = vsel %vm6680_vm2, %v1894_v45, %v1898_v30  ;;  %v1698_v59 = vshrl.u32 %v5581_v39, 16  ;;  %v308_v61 = vrot.slane %v307_v49, 4  ;;  %v1690_v63 = vrot.slane %v1688_v51, 5  ;;  %v5608_v30 = vld [vmem:[%s6662_s5 + $0x94] sm:$0xf] }
  0x4e   : > { %v5638_v60 = vcombine.low %v1889_v44, %v1899_v56  ;;  %v317_v62 = vor.u32 %v316_v50, %v312_v42  ;;  %v1696_v1 = vrot.slane %v1694_v52, 5  ;;  %v1704_v3 = vshll.u32 %v5582_v47, 16  ;;  %v204_v47 = vld [vmem:[%s6662_s5 + $0x28] sm:$0xf]  ;;  %v236_v51 = vld [vmem:[%s6662_s5 + $0x2c] sm:$0x1] }
  0x4f   : > { %v1700_v2 = vrot.slane %v1698_v59, 4  ;;  %v517_v4 = vshrl.u32 %v219_v54, 16  ;;  %v313_v5 = vsel %vm6680_vm2, %v308_v61, %v312_v42  ;;  %v1691_v7 = vor.u32 %v1690_v63, %v1687_v58  ;;  %v5583_v59 = vld [vmem:[%s6662_s5 + $0x30] sm:$0xf] }
  0x50   : > { %6202 = vmatprep.subr.msk.bf16.mxu0 %vm699_vm3, %v5638_v60  ;;  %v318_v6 = vrot.slane %v317_v62, 4  ;;  %v520_v12 = vshll.u32 %v219_v54, 16  ;;  %v1706_v14 = vrot.slane %v1704_v3, 5  ;;  %v526_v16 = vshll.u32 %v220_v0, 16 }
  0x51   : > { %v1701_v13 = vor.u32 %v1700_v2, %v1696_v1  ;;  %v519_v15 = vrot.slane %v517_v4, 4  ;;  %v1692_v19 = vrot.slane %v1691_v7, 4  ;;  %v530_v21 = vshrl.u32 %v220_v0, 16  ;;  %v5584_v4 = vld [vmem:[%s6662_s5 + $0x34] sm:$0xf] }
  0x52   : > { %v323_v18 = vsel %vm6680_vm2, %v318_v6, %v322_v57  ;;  %v522_v20 = vrot.slane %v520_v12, 5  ;;  %v528_v25 = vrot.slane %v526_v16, 5  ;;  %v536_v26 = vshll.u32 %v244_v8, 16 }
  0x53   : > { %v5442_v22 = vcombine.low %v313_v5, %v323_v18  ;;  %v1702_v23 = vrot.slane %v1701_v13, 4  ;;  %v1697_v27 = vsel %vm6680_vm2, %v1692_v19, %v1696_v1  ;;  %v532_v29 = vrot.slane %v530_v21, 4  ;;  %v221_v21 = vld [vmem:[%s6662_s5 + $0x90] sm:$0xf] }
  0x54   : > { %v523_v28 = vor.u32 %v522_v20, %v519_v15  ;;  %v1901_v33 = vshrl.u32 %v5607_v17, 16  ;;  %v538_v36 = vrot.slane %v536_v26, 5  ;;  %v1904_v37 = vshll.u32 %v5607_v17, 16  ;;  %v5585_v15 = vld [vmem:[%s6662_s5 + $0x38] sm:$0x1] }
  0x55   : > { %v713_v34 = vsel %vm699_vm3, %v5442_v22, 0  ;;  %v1707_v35 = vsel %vm6680_vm2, %v1702_v23, %v1706_v14  ;;  %v533_v41 = vor.u32 %v532_v29, %v528_v25  ;;  %v1910_v44 = vshll.u32 %v5608_v30, 16 }
  0x56   : > { %5913 = vmatpush3.bf16.xpose.msra.mxu1 %v713_v34  ;;  %v5630_v39 = vcombine.low %v1697_v27, %v1707_v35  ;;  %v524_v40 = vrot.slane %v523_v28, 4  ;;  %v1903_v42 = vrot.slane %v1901_v33, 4  ;;  %v1906_v43 = vrot.slane %v1904_v37, 5  ;;  %v222_v27 = vld [vmem:[%s6662_s5 + $0x94] sm:$0xf] }
  0x57   : > { %v1914_v45 = vshrl.u32 %v5608_v30, 16  ;;  %v1920_v46 = vshll.u32 %v5609_v31, 16  ;;  %v534_v50 = vrot.slane %v533_v41, 4  ;;  %v325_v52 = vshrl.u32 %v203_v38, 16 }
  0x58   : > { %v2096_v48 = vsel %vm699_vm3, %v5630_v39, 0  ;;  %v529_v49 = vsel %vm6680_vm2, %v524_v40, %v528_v25  ;;  %v1907_v54 = vor.u32 %v1906_v43, %v1903_v42  ;;  %v1912_v56 = vrot.slane %v1910_v44, 5  ;;  %v5610_v42 = vld [vmem:[%s6662_s5 + $0x9c] sm:$0xf] }
  0x59   : > { %5993 = vmatpush3.bf16.xpose.msra.mxu0 %v2096_v48  ;;  %v1916_v57 = vrot.slane %v1914_v45, 4  ;;  %v1922_v58 = vrot.slane %v1920_v46, 5  ;;  %v539_v60 = vsel %vm6680_vm2, %v534_v50, %v538_v36  ;;  %v327_v61 = vrot.slane %v325_v52, 4  ;;  %v245_v36 = vld [vmem:[%s6662_s5 + $0x98] sm:$0x1] }
  0x5a   : > { %v328_v62 = vshll.u32 %v203_v38, 16  ;;  %v334_v63 = vshll.u32 %v204_v47, 16  ;;  %v5451_v0 = vcombine.low %v529_v49, %v539_v60  ;;  %v1908_v1 = vrot.slane %v1907_v54, 4 }
  0x5b   : > { %v1917_v2 = vor.u32 %v1916_v57, %v1912_v56  ;;  %v338_v3 = vshrl.u32 %v204_v47, 16  ;;  %v344_v7 = vshll.u32 %v236_v51, 16  ;;  %v1709_v8 = vshrl.u32 %v5583_v59, 16  ;;  %v6818_v51 = vld [vmem:[%s6662_s5 + $0xa0] sm:$0xf] }
  0x5c   : > { %v330_v5 = vrot.slane %v328_v62, 5  ;;  %v336_v6 = vrot.slane %v334_v63, 5  ;;  %6171 = vmatprep.subr.msk.bf16.mxu1 %vm699_vm3, %v5451_v0  ;;  %v1913_v12 = vsel %vm6680_vm2, %v1908_v1, %v1912_v56  ;;  %v1712_v16 = vshll.u32 %v5583_v59, 16  ;;  %v5612_v57 = vld [vmem:[%s6662_s5 + $0xa4] sm:$0x1] }
  0x5d   : > { %v1918_v13 = vrot.slane %v1917_v2, 4  ;;  %v340_v14 = vrot.slane %v338_v3, 4  ;;  %v346_v18 = vrot.slane %v344_v7, 5  ;;  %v1711_v19 = vrot.slane %v1709_v8, 4  ;;  %v205_v63 = vld [vmem:[%s6662_s5 + $0x30] sm:$0xf] }
  0x5e   : > { %v331_v17 = vor.u32 %v330_v5, %v327_v61  ;;  %v1718_v20 = vshll.u32 %v5584_v4, 16  ;;  %v1714_v25 = vrot.slane %v1712_v16, 5  ;;  %v1722_v26 = vshrl.u32 %v5584_v4, 16 }
  0x5f   : > { %v1923_v22 = vsel %vm6680_vm2, %v1918_v13, %v1922_v58  ;;  %v341_v23 = vor.u32 %v340_v14, %v336_v6  ;;  %v1728_v31 = vshll.u32 %v5585_v15, 16  ;;  %v541_v37 = vshrl.u32 %v221_v21, 16  ;;  %v206_v14 = vld [vmem:[%s6662_s5 + $0x34] sm:$0xf] }
  0x60   : > { %v5639_v28 = vcombine.low %v1913_v12, %v1923_v22  ;;  %v332_v29 = vrot.slane %v331_v17, 4  ;;  %v1720_v30 = vrot.slane %v1718_v20, 5  ;;  %v1715_v34 = vor.u32 %v1714_v25, %v1711_v19  ;;  %v237_v20 = vld [vmem:[%s6662_s5 + $0x38] sm:$0x1] }
  0x61   : > { %v342_v33 = vrot.slane %v341_v23, 4  ;;  %v1724_v35 = vrot.slane %v1722_v26, 4  ;;  %v1730_v39 = vrot.slane %v1728_v31, 5  ;;  %v544_v40 = vshll.u32 %v221_v21, 16  ;;  %v5586_v26 = vld [vmem:[%s6662_s5 + $0x3c] sm:$0xf] }
  0x62   : > { %6203 = vmatprep.subr.msk.bf16.mxu0 %vm699_vm3, %v5639_v28  ;;  %v337_v38 = vsel %vm6680_vm2, %v332_v29, %v336_v6  ;;  %v550_v41 = vshll.u32 %v222_v27, 16  ;;  %v1716_v44 = vrot.slane %v1715_v34, 4  ;;  %v543_v46 = vrot.slane %v541_v37, 4 }
  0x63   : > { %v347_v43 = vsel %vm6680_vm2, %v342_v33, %v346_v18  ;;  %v1725_v45 = vor.u32 %v1724_v35, %v1720_v30  ;;  %v546_v48 = vrot.slane %v544_v40, 5  ;;  %v554_v50 = vshrl.u32 %v222_v27, 16  ;;  %v6843_v40 = vld [vmem:[%s6662_s5 + $0x44] sm:$0x1] }
  0x64   : > { %v5443_v47 = vcombine.low %v337_v38, %v347_v43  ;;  %v552_v49 = vrot.slane %v550_v41, 5  ;;  %v1721_v52 = vsel %vm6680_vm2, %v1716_v44, %v1720_v30  ;;  %v560_v56 = vshll.u32 %v245_v36, 16  ;;  %v6838_v36 = vld [vmem:[%s6662_s5 + $0x40] sm:$0xf] }
  0x65   : > { %v1726_v54 = vrot.slane %v1725_v45, 4  ;;  %v1925_v58 = vshrl.u32 %v5610_v42, 16  ;;  %v547_v60 = vor.u32 %v546_v48, %v543_v46  ;;  %v556_v61 = vrot.slane %v554_v50, 4  ;;  %v223_v50 = vld [vmem:[%s6662_s5 + $0x9c] sm:$0xf] }
  0x66   : > { %v716_v59 = vsel %vm699_vm3, %v5443_v47, 0  ;;  %v1928_v62 = vshll.u32 %v5610_v42, 16  ;;  %v562_v1 = vrot.slane %v560_v56, 5  ;;  %v1934_v3 = vshll.u32 %v6818_v51, 16 }
  0x67   : > { %5915 = vmatpush3.bf16.xpose.msra.mxu1 %v716_v59  ;;  %v1731_v0 = vsel %vm6680_vm2, %v1726_v54, %v1730_v39  ;;  %v1927_v2 = vrot.slane %v1925_v58, 4  ;;  %v548_v5 = vrot.slane %v547_v60, 4  ;;  %v557_v6 = vor.u32 %v556_v61, %v552_v49  ;;  %v224_v58 = vld [vmem:[%s6662_s5 + $0xa0] sm:$0xf] }
  0x68   : > { %v5631_v4 = vcombine.low %v1721_v52, %v1731_v0  ;;  %v1930_v7 = vrot.slane %v1928_v62, 5  ;;  %v1936_v8 = vrot.slane %v1934_v3, 5  ;;  %v1938_v12 = vshrl.u32 %v6818_v51, 16 }
  0x69   : > { %v1944_v13 = vshll.u32 %v5612_v57, 16  ;;  %v349_v15 = vshrl.u32 %v205_v63, 16  ;;  %v553_v17 = vsel %vm6680_vm2, %v548_v5, %v552_v49  ;;  %v558_v18 = vrot.slane %v557_v6, 4 }
  0x6a   : > { %v2099_v16 = vsel %vm699_vm3, %v5631_v4, 0  ;;  %v1931_v19 = vor.u32 %v1930_v7, %v1927_v2  ;;  %v1940_v21 = vrot.slane %v1938_v12, 4  ;;  %v352_v25 = vshll.u32 %v205_v63, 16  ;;  %v246_v63 = vld [vmem:[%s6662_s5 + $0xa4] sm:$0x1] }
  0x6b   : > { %5995 = vmatpush3.bf16.xpose.msra.mxu0 %v2099_v16  ;;  %v1946_v22 = vrot.slane %v1944_v13, 5  ;;  %v351_v23 = vrot.slane %v349_v15, 4  ;;  %v563_v27 = vsel %vm6680_vm2, %v558_v18, %v562_v1  ;;  %v358_v29 = vshll.u32 %v206_v14, 16  ;;  %v6861_v12 = vld [vmem:[%s6662_s5 + $0xac] sm:$0xf] }
  0x6c   : > { %v1932_v28 = vrot.slane %v1931_v19, 4  ;;  %v362_v30 = vshrl.u32 %v206_v14, 16  ;;  %v5452_v31 = vcombine.low %v553_v17, %v563_v27  ;;  %v1941_v33 = vor.u32 %v1940_v21, %v1936_v8  ;;  %v6864_v17 = vld [vmem:[%s6662_s5 + $0xb0] sm:$0x1] }
  0x6d   : > { %v354_v34 = vrot.slane %v352_v25, 5  ;;  %v368_v35 = vshll.u32 %v237_v20, 16  ;;  %v360_v38 = vrot.slane %v358_v29, 5  ;;  %v1733_v41 = vshrl.u32 %v5586_v26, 16 }
  0x6e   : > { %v1937_v37 = vsel %vm6680_vm2, %v1932_v28, %v1936_v8  ;;  %v364_v39 = vrot.slane %v362_v30, 4  ;;  %6172 = vmatprep.subr.msk.bf16.mxu1 %vm699_vm3, %v5452_v31  ;;  %v1942_v42 = vrot.slane %v1941_v33, 4  ;;  %v1736_v45 = vshll.u32 %v5586_v26, 16  ;;  %v5613_v8 = vld [vmem:[%s6662_s5 + $0xa8] sm:$0xf] }
  0x6f   : > { %v355_v43 = vor.u32 %v354_v34, %v351_v23  ;;  %v370_v44 = vrot.slane %v368_v35, 5  ;;  %v1735_v47 = vrot.slane %v1733_v41, 4  ;;  %v1742_v48 = vshll.u32 %v6838_v36, 16 }
  0x70   : > { %v365_v46 = vor.u32 %v364_v39, %v360_v38  ;;  %v1746_v49 = vshrl.u32 %v6838_v36, 16  ;;  %v1947_v52 = vsel %vm6680_vm2, %v1942_v42, %v1946_v22  ;;  %v1738_v56 = vrot.slane %v1736_v45, 5  ;;  %v6867_v22 = vld [vmem:[%s6662_s5 + $0x3c] sm:$0xf]  ;;  %v5589_v45 = vld [vmem:[%s6662_s5 + $0x48] sm:$0xf] }
  0x71   : > { %v356_v54 = vrot.slane %v355_v43, 4  ;;  %v1752_v57 = vshll.u32 %v6843_v40, 16  ;;  %v5640_v59 = vcombine.low %v1937_v37, %v1947_v52  ;;  %v1744_v61 = vrot.slane %v1742_v48, 5 }
  0x72   : > { %v366_v60 = vrot.slane %v365_v46, 4  ;;  %v1748_v62 = vrot.slane %v1746_v49, 4  ;;  %v1739_v1 = vor.u32 %v1738_v56, %v1735_v47  ;;  %v565_v3 = vshrl.u32 %v223_v50, 16 }
  0x73   : > { %v361_v0 = vsel %vm6680_vm2, %v356_v54, %v360_v38  ;;  %v1754_v2 = vrot.slane %v1752_v57, 5  ;;  %6204 = vmatprep.subr.msk.bf16.mxu0 %vm699_vm3, %v5640_v59  ;;  %v568_v6 = vshll.u32 %v223_v50, 16  ;;  %v574_v7 = vshll.u32 %v224_v58, 16  ;;  %v6876_v38 = vld [vmem:[%s6662_s5 + $0x40] sm:$0xf] }
  0x74   : > { %v371_v4 = vsel %vm6680_vm2, %v366_v60, %v370_v44  ;;  %v1749_v5 = vor.u32 %v1748_v62, %v1744_v61  ;;  %v1740_v14 = vrot.slane %v1739_v1, 4  ;;  %v567_v15 = vrot.slane %v565_v3, 4  ;;  %v238_v44 = vld [vmem:[%s6662_s5 + $0x44] sm:$0x1]  ;;  %v6887_v57 = vld [vmem:[%s6662_s5 + $0x4c] sm:$0xf] }
  0x75   : > { %v5444_v13 = vcombine.low %v361_v0, %v371_v4  ;;  %v578_v16 = vshrl.u32 %v224_v58, 16  ;;  %v570_v19 = vrot.slane %v568_v6, 5  ;;  %v576_v20 = vrot.slane %v574_v7, 5 }
  0x76   : > { %v1750_v18 = vrot.slane %v1749_v5, 4  ;;  %v584_v21 = vshll.u32 %v246_v63, 16  ;;  %v1745_v25 = vsel %vm6680_vm2, %v1740_v14, %v1744_v61  ;;  %v1949_v27 = vshrl.u32 %v5613_v8, 16 }
  0x77   : > { %v719_v23 = vsel %vm699_vm3, %v5444_v13, 0  ;;  %v580_v26 = vrot.slane %v578_v16, 4  ;;  %v571_v29 = vor.u32 %v570_v19, %v567_v15  ;;  %v1952_v31 = vshll.u32 %v5613_v8, 16 }
  0x78   : > { %5917 = vmatpush3.bf16.xpose.msra.mxu1 %v719_v23  ;;  %v1755_v28 = vsel %vm6680_vm2, %v1750_v18, %v1754_v2  ;;  %v586_v30 = vrot.slane %v584_v21, 5  ;;  %v1951_v35 = vrot.slane %v1949_v27, 4  ;;  %v1958_v37 = vshll.u32 %v6861_v12, 16  ;;  %v6895_v2 = vld [vmem:[%s6662_s5 + $0x50] sm:$0x1] }
  0x79   : > { %v5632_v33 = vcombine.low %v1745_v25, %v1755_v28  ;;  %v581_v34 = vor.u32 %v580_v26, %v576_v20  ;;  %v572_v39 = vrot.slane %v571_v29, 4  ;;  %v1954_v41 = vrot.slane %v1952_v31, 5  ;;  %v6908_v27 = vld [vmem:[%s6662_s5 + $0xac] sm:$0xf] }
  0x7a   : > { %v1962_v42 = vshrl.u32 %v6861_v12, 16  ;;  %v1968_v43 = vshll.u32 %v6864_v17, 16  ;;  %v1960_v48 = vrot.slane %v1958_v37, 5  ;;  %v373_v49 = vshrl.u32 %v6867_v22, 16 }
  0x7b   : > { %v2102_v46 = vsel %vm699_vm3, %v5632_v33, 0  ;;  %v582_v47 = vrot.slane %v581_v34, 4  ;;  %v577_v50 = vsel %vm6680_vm2, %v572_v39, %v576_v20  ;;  %v1955_v52 = vor.u32 %v1954_v41, %v1951_v35  ;;  %v6902_v20 = vld [vmem:[%s6662_s5 + $0xa8] sm:$0xf]  ;;  %v247_v33 = vld [vmem:[%s6662_s5 + $0xb0] sm:$0x1] }
  0x7c   : > { %5997 = vmatpush3.bf16.xpose.msra.mxu0 %v2102_v46  ;;  %v1964_v54 = vrot.slane %v1962_v42, 4  ;;  %v1970_v56 = vrot.slane %v1968_v43, 5  ;;  %v375_v59 = vrot.slane %v373_v49, 4  ;;  %v376_v60 = vshll.u32 %v6867_v22, 16  ;;  %v5616_v34 = vld [vmem:[%s6662_s5 + $0xb4] sm:$0xf] }
  0x7d   : > { %v587_v58 = vsel %vm6680_vm2, %v582_v47, %v586_v30  ;;  %v382_v61 = vshll.u32 %v6876_v38, 16  ;;  %v1956_v63 = vrot.slane %v1955_v52, 4  ;;  %v386_v1 = vshrl.u32 %v6876_v38, 16  ;;  %v6920_v46 = vld [vmem:[%s6662_s5 + $0xb8] sm:$0xf] }
  0x7e   : > { %v5453_v62 = vcombine.low %v577_v50, %v587_v58  ;;  %v1965_v0 = vor.u32 %v1964_v54, %v1960_v48  ;;  %v378_v3 = vrot.slane %v376_v60, 5  ;;  %v392_v5 = vshll.u32 %v238_v44, 16 }
  0x7f   : > { %v384_v4 = vrot.slane %v382_v61, 5  ;;  %v1757_v6 = vshrl.u32 %v5589_v45, 16  ;;  %v1961_v7 = vsel %vm6680_vm2, %v1956_v63, %v1960_v48  ;;  %v388_v13 = vrot.slane %v386_v1, 4 }
  0x80   : > { %6173 = vmatprep.subr.msk.bf16.mxu1 %vm699_vm3, %v5453_v62  ;;  %v1966_v8 = vrot.slane %v1965_v0, 4  ;;  %v1760_v14 = vshll.u32 %v5589_v45, 16  ;;  %v379_v15 = vor.u32 %v378_v3, %v375_v59  ;;  %v394_v16 = vrot.slane %v392_v5, 5  ;;  %v6926_v59 = vld [vmem:[%s6662_s5 + $0xbc] sm:$0x1] }
  0x81   : > { %v1759_v18 = vrot.slane %v1757_v6, 4  ;;  %v1766_v19 = vshll.u32 %v6887_v57, 16  ;;  %v389_v23 = vor.u32 %v388_v13, %v384_v4  ;;  %v1770_v26 = vshrl.u32 %v6887_v57, 16  ;;  %v6932_v5 = vld [vmem:[%s6662_s5 + $0x48] sm:$0xf] }
  0x82   : > { %v1971_v21 = vsel %vm6680_vm2, %v1966_v8, %v1970_v56  ;;  %v1762_v25 = vrot.slane %v1760_v14, 5  ;;  %v380_v29 = vrot.slane %v379_v15, 4  ;;  %v1776_v31 = vshll.u32 %v6895_v2, 16  ;;  %v6938_v14 = vld [vmem:[%s6662_s5 + $0x4c] sm:$0xf] }
  0x83   : > { %v5641_v28 = vcombine.low %v1961_v7, %v1971_v21  ;;  %v1768_v30 = vrot.slane %v1766_v19, 5  ;;  %v390_v35 = vrot.slane %v389_v23, 4  ;;  %v1772_v39 = vrot.slane %v1770_v26, 4  ;;  %v239_v21 = vld [vmem:[%s6662_s5 + $0x50] sm:$0x1] }
  0x84   : > { %v1763_v37 = vor.u32 %v1762_v25, %v1759_v18  ;;  %v589_v41 = vshrl.u32 %v6902_v20, 16  ;;  %v385_v42 = vsel %vm6680_vm2, %v380_v29, %v384_v4  ;;  %v1778_v43 = vrot.slane %v1776_v31, 5 }
  0x85   : > { %6205 = vmatprep.subr.msk.bf16.mxu0 %vm699_vm3, %v5641_v28  ;;  %v592_v44 = vshll.u32 %v6902_v20, 16  ;;  %v598_v45 = vshll.u32 %v6908_v27, 16  ;;  %v395_v47 = vsel %vm6680_vm2, %v390_v35, %v394_v16  ;;  %v1773_v49 = vor.u32 %v1772_v39, %v1768_v30 }
  0x86   : > { %v1764_v48 = vrot.slane %v1763_v37, 4  ;;  %v591_v50 = vrot.slane %v589_v41, 4  ;;  %v5445_v52 = vcombine.low %v385_v42, %v395_v47  ;;  %v602_v58 = vshrl.u32 %v6908_v27, 16  ;;  %v6950_v42 = vld [vmem:[%s6662_s5 + $0x58] sm:$0xf] }
  0x87   : > { %v594_v54 = vrot.slane %v592_v44, 5  ;;  %v600_v56 = vrot.slane %v598_v45, 5  ;;  %v1774_v61 = vrot.slane %v1773_v49, 4  ;;  %v608_v62 = vshll.u32 %v247_v33, 16 }
  0x88   : > { %v1769_v60 = vsel %vm6680_vm2, %v1764_v48, %v1768_v30  ;;  %v1973_v63 = vshrl.u32 %v5616_v34, 16  ;;  %v722_v0 = vsel %vm699_vm3, %v5445_v52, 0  ;;  %v604_v3 = vrot.slane %v602_v58, 4  ;;  %v6957_v48 = vld [vmem:[%s6662_s5 + $0x5c] sm:$0x1] }
  0x89   : > { %v595_v1 = vor.u32 %v594_v54, %v591_v50  ;;  %v1976_v4 = vshll.u32 %v5616_v34, 16  ;;  %5919 = vmatpush3.bf16.xpose.msra.mxu1 %v722_v0  ;;  %v1779_v6 = vsel %vm6680_vm2, %v1774_v61, %v1778_v43  ;;  %v610_v7 = vrot.slane %v608_v62, 5  ;;  %v5592_v34 = vld [vmem:[%s6662_s5 + $0x54] sm:$0xf] }
  0x8a   : > { %v1975_v8 = vrot.slane %v1973_v63, 4  ;;  %v1982_v13 = vshll.u32 %v6920_v46, 16  ;;  %v5633_v15 = vcombine.low %v1769_v60, %v1779_v6  ;;  %v605_v18 = vor.u32 %v604_v3, %v600_v56  ;;  %v6962_v62 = vld [vmem:[%s6662_s5 + $0xb4] sm:$0xf] }
  0x8b   : > { %v596_v16 = vrot.slane %v595_v1, 4  ;;  %v1978_v19 = vrot.slane %v1976_v4, 5  ;;  %v1986_v25 = vshrl.u32 %v6920_v46, 16  ;;  %v1992_v26 = vshll.u32 %v6926_v59, 16  ;;  %v6966_v4 = vld [vmem:[%s6662_s5 + $0xb8] sm:$0xf] }
  0x8c   : > { %v1984_v23 = vrot.slane %v1982_v13, 5  ;;  %v397_v28 = vshrl.u32 %v6932_v5, 16  ;;  %v2105_v29 = vsel %vm699_vm3, %v5633_v15, 0  ;;  %v606_v31 = vrot.slane %v605_v18, 4 }
  0x8d   : > { %v601_v30 = vsel %vm6680_vm2, %v596_v16, %v600_v56  ;;  %v1979_v33 = vor.u32 %v1978_v19, %v1975_v8  ;;  %5999 = vmatpush3.bf16.xpose.msra.mxu0 %v2105_v29  ;;  %v1988_v35 = vrot.slane %v1986_v25, 4  ;;  %v1994_v37 = vrot.slane %v1992_v26, 5  ;;  %v5619_v29 = vld [vmem:[%s6662_s5 + $0xc0] sm:$0xf] }
  0x8e   : > { %v399_v39 = vrot.slane %v397_v28, 4  ;;  %v400_v41 = vshll.u32 %v6932_v5, 16  ;;  %v611_v43 = vsel %vm6680_vm2, %v606_v31, %v610_v7  ;;  %v406_v45 = vshll.u32 %v6938_v14, 16 }
  0x8f   : > { %v1980_v44 = vrot.slane %v1979_v33, 4  ;;  %v410_v47 = vshrl.u32 %v6938_v14, 16  ;;  %v5454_v49 = vcombine.low %v601_v30, %v611_v43  ;;  %v1989_v50 = vor.u32 %v1988_v35, %v1984_v23  ;;  %v6984_v43 = vld [vmem:[%s6662_s5 + $0xc4] sm:$0xf] }
  0x90   : > { %v402_v52 = vrot.slane %v400_v41, 5  ;;  %v416_v54 = vshll.u32 %v239_v21, 16  ;;  %v408_v58 = vrot.slane %v406_v45, 5  ;;  %v1781_v61 = vshrl.u32 %v5592_v34, 16  ;;  %v248_v21 = vld [vmem:[%s6662_s5 + $0xbc] sm:$0x1] }
  0x91   : > { %v1985_v56 = vsel %vm6680_vm2, %v1980_v44, %v1984_v23  ;;  %v412_v60 = vrot.slane %v410_v47, 4  ;;  %6174 = vmatprep.subr.msk.bf16.mxu1 %vm699_vm3, %v5454_v49  ;;  %v1990_v63 = vrot.slane %v1989_v50, 4  ;;  %v1784_v3 = vshll.u32 %v5592_v34, 16 }
  0x92   : > { %v403_v0 = vor.u32 %v402_v52, %v399_v39  ;;  %v418_v1 = vrot.slane %v416_v54, 5  ;;  %v1783_v7 = vrot.slane %v1781_v61, 4  ;;  %v1790_v8 = vshll.u32 %v6950_v42, 16 }
  0x93   : > { %v413_v6 = vor.u32 %v412_v60, %v408_v58  ;;  %v1794_v13 = vshrl.u32 %v6950_v42, 16  ;;  %v1995_v15 = vsel %vm6680_vm2, %v1990_v63, %v1994_v37  ;;  %v1786_v18 = vrot.slane %v1784_v3, 5 }
  0x94   : > { %v404_v16 = vrot.slane %v403_v0, 4  ;;  %v1800_v19 = vshll.u32 %v6957_v48, 16  ;;  %v5642_v23 = vcombine.low %v1985_v56, %v1995_v15  ;;  %v1792_v26 = vrot.slane %v1790_v8, 5 }
  0x95   : > { %v414_v25 = vrot.slane %v413_v6, 4  ;;  %v1796_v28 = vrot.slane %v1794_v13, 4  ;;  %v1787_v31 = vor.u32 %v1786_v18, %v1783_v7  ;;  %v613_v34 = vshrl.u32 %v6962_v62, 16  ;;  %v6999_v13 = vld [vmem:[%s6662_s5 + $0x58] sm:$0xf] }
  0x96   : > { %v409_v30 = vsel %vm6680_vm2, %v404_v16, %v408_v58  ;;  %v1802_v33 = vrot.slane %v1800_v19, 5  ;;  %6206 = vmatprep.subr.msk.bf16.mxu0 %vm699_vm3, %v5642_v23  ;;  %v616_v39 = vshll.u32 %v6962_v62, 16  ;;  %v622_v41 = vshll.u32 %v6966_v4, 16  ;;  %v6988_v58 = vld [vmem:[%s6662_s5 + $0xc8] sm:$0x1] }
  0x97   : > { %v419_v35 = vsel %vm6680_vm2, %v414_v25, %v418_v1  ;;  %v1797_v37 = vor.u32 %v1796_v28, %v1792_v26  ;;  %v1788_v45 = vrot.slane %v1787_v31, 4  ;;  %v615_v47 = vrot.slane %v613_v34, 4  ;;  %v6994_v1 = vld [vmem:[%s6662_s5 + $0x54] sm:$0xf]  ;;  %v7005_v28 = vld [vmem:[%s6662_s5 + $0x5c] sm:$0x1] }
  0x98   : > { %v5446_v44 = vcombine.low %v409_v30, %v419_v35  ;;  %v626_v49 = vshrl.u32 %v6966_v4, 16  ;;  %v618_v52 = vrot.slane %v616_v39, 5  ;;  %v624_v54 = vrot.slane %v622_v41, 5  ;;  %8665 = vst [vmem:[#allocation6_spill] sm:$0xff] %v7005_v28  ;;  %v5595_v30 = vld [vmem:[%s6662_s5 + $0x60] sm:$0xf] }
  0x99   : > { %v1798_v50 = vrot.slane %v1797_v37, 4  ;;  %v632_v56 = vshll.u32 %v248_v21, 16  ;;  %v1793_v61 = vsel %vm6680_vm2, %v1788_v45, %v1792_v26  ;;  %v1997_v0 = vshrl.u32 %v5619_v29, 16 }
  0x9a   : > { %v725_v60 = vsel %vm699_vm3, %v5446_v44, 0  ;;  %v628_v63 = vrot.slane %v626_v49, 4  ;;  %v619_v6 = vor.u32 %v618_v52, %v615_v47  ;;  %v2000_v8 = vshll.u32 %v5619_v29, 16 }
  0x9b   : > { %5921 = vmatpush3.bf16.xpose.msra.mxu1 %v725_v60  ;;  %v1803_v3 = vsel %vm6680_vm2, %v1798_v50, %v1802_v33  ;;  %v634_v7 = vrot.slane %v632_v56, 5  ;;  %v1999_v18 = vrot.slane %v1997_v0, 4  ;;  %v2006_v19 = vshll.u32 %v6984_v43, 16 }
  0x9c   : > { %v5634_v15 = vcombine.low %v1793_v61, %v1803_v3  ;;  %v629_v16 = vor.u32 %v628_v63, %v624_v54  ;;  %v620_v21 = vrot.slane %v619_v6, 4  ;;  %v2002_v23 = vrot.slane %v2000_v8, 5  ;;  %v7018_v61 = vld [vmem:[%s6662_s5 + $0x64] sm:$0xf]  ;;  %v7022_v3 = vld [vmem:[%s6662_s5 + $0x68] sm:$0x1] }
  0x9d   : > { %v2010_v25 = vshrl.u32 %v6984_v43, 16  ;;  %v2016_v26 = vshll.u32 %v6988_v58, 16  ;;  %v2008_v29 = vrot.slane %v2006_v19, 5  ;;  %v421_v34 = vshrl.u32 %v6994_v1, 16 }
  0x9e   : > { %v2108_v31 = vsel %vm699_vm3, %v5634_v15, 0  ;;  %v630_v33 = vrot.slane %v629_v16, 4  ;;  %v625_v35 = vsel %vm6680_vm2, %v620_v21, %v624_v54  ;;  %v2003_v37 = vor.u32 %v2002_v23, %v1999_v18 }
  0x9f   : > { %6001 = vmatpush3.bf16.xpose.msra.mxu0 %v2108_v31  ;;  %v2012_v39 = vrot.slane %v2010_v25, 4  ;;  %v2018_v41 = vrot.slane %v2016_v26, 5  ;;  %v423_v45 = vrot.slane %v421_v34, 4  ;;  %v424_v47 = vshll.u32 %v6994_v1, 16  ;;  %v5654_v25 = vld [vmem:[%s6662_s5 + $0x6c] sm:$0xe] }
  0xa0   : > { %v635_v44 = vsel %vm6680_vm2, %v630_v33, %v634_v7  ;;  %v430_v49 = vshll.u32 %v6999_v13, 16  ;;  %v2004_v52 = vrot.slane %v2003_v37, 4  ;;  %v434_v60 = vshrl.u32 %v6999_v13, 16 }
  0xa1   : > { %v5455_v50 = vcombine.low %v625_v35, %v635_v44  ;;  %v2013_v56 = vor.u32 %v2012_v39, %v2008_v29  ;;  %v426_v54 = vrot.slane %v424_v47, 5  ;;  %v440_v0 = vshll.u32 %v7005_v28, 16  ;;  %v5646_v35 = vld [vmem:[%s6662_s5 + $0xc] sm:$0xe] }
  0xa2   : > { %v432_v63 = vrot.slane %v430_v49, 5  ;;  %v1805_v6 = vshrl.u32 %v5595_v30, 16  ;;  %v2009_v7 = vsel %vm6680_vm2, %v2004_v52, %v2008_v29  ;;  %v436_v15 = vrot.slane %v434_v60, 4 }
  0xa3   : > { %6175 = vmatprep.subr.msk.bf16.mxu1 %vm699_vm3, %v5455_v50  ;;  %v2014_v8 = vrot.slane %v2013_v56, 4  ;;  %v1808_v16 = vshll.u32 %v5595_v30, 16  ;;  %v427_v18 = vor.u32 %v426_v54, %v423_v45  ;;  %v442_v19 = vrot.slane %v440_v0, 5 }
  0xa4   : > { %v1807_v21 = vrot.slane %v1805_v6, 4  ;;  %v1814_v23 = vshll.u32 %v7018_v61, 16  ;;  %v437_v31 = vor.u32 %v436_v15, %v432_v63  ;;  %v1818_v34 = vshrl.u32 %v7018_v61, 16  ;;  %v6457_v6 = vld [vmem:[%s6662_s5 + $0x60] sm:$0xf] }
  0xa5   : > { %v2019_v26 = vsel %vm6680_vm2, %v2014_v8, %v2018_v41  ;;  %v1810_v33 = vrot.slane %v1808_v16, 5  ;;  %v428_v39 = vrot.slane %v427_v18, 4  ;;  %v1824_v30 = vshll.u32 %v7022_v3, 16  ;;  %v5655_v16 = vld [vmem:[%s6662_s5 + $0x78] sm:$0xe] }
  0xa6   : > { %v5643_v37 = vcombine.low %v2009_v7, %v2019_v26  ;;  %v1816_v29 = vrot.slane %v1814_v23, 5  ;;  %v438_v44 = vrot.slane %v437_v31, 4  ;;  %v1820_v47 = vrot.slane %v1818_v34, 4  ;;  %v7045_v7 = vld [vmem:[%s6662_s5 + $0x64] sm:$0xf] }
  0xa7   : > { %v1811_v45 = vor.u32 %v1810_v33, %v1807_v21  ;;  %v433_v41 = vsel %vm6680_vm2, %v428_v39, %v432_v63  ;;  %v1826_v49 = vrot.slane %v1824_v30, 5  ;;  %v5670_v54 = vrot.slane %v5654_v25, 9  ;;  %v6459_v23 = vld [vmem:[%s6662_s5 + $0x10] sm:$0xf]  ;;  %v6460_v34 = vld [vmem:[%s6662_s5] sm:$0xf] }
  0xa8   : > { %6207 = vmatprep.subr.msk.bf16.mxu0 %vm699_vm3, %v5643_v37  ;;  %v443_v50 = vsel %vm6680_vm2, %v438_v44, %v442_v19  ;;  %v1821_v56 = vor.u32 %v1820_v47, %v1816_v29  ;;  %v5468_v63 = vcombine.low %v6457_v6, %v7045_v7  ;;  %v2322_v8 = vrot.slane %v2320_v32, 4  ;;  %v5647_v30 = vld [vmem:[%s6662_s5 + $0x18] sm:$0xe]  ;;  %v6463_v47 = vld [vmem:[%s6662_s5 + $0x80] sm:$0x1] }
  0xa9   : > { %v1812_v52 = vrot.slane %v1811_v45, 4  ;;  %v5447_v0 = vcombine.low %v433_v41, %v443_v50  ;;  %v5662_v15 = vrot.slane %v5646_v35, 9  ;;  %v2321_v21 = vsel %vm7039_vm6, %v5670_v54, %v2320_v32  ;;  %v7067_v35 = vld [vmem:[%s6662_s5 + $0x4] sm:$0xf]  ;;  %v7089_v6 = vld [vmem:[%s6662_s5 + $0x70] sm:$0xf] }
  0xaa   : > { %v1822_v19 = vrot.slane %v1821_v56, 4  ;;  %v2264_v25 = vrot.slane %v6459_v23, 5  ;;  %v2324_v31 = vsel %vm7039_vm6, %v2322_v8, %v2323_v53  ;;  %v5460_v32 = vcombine.low %v6460_v34, %v7067_v35  ;;  %v6468_v23 = vld [vmem:[%s6662_s5 + $0x88] sm:$0xf]  ;;  %v5648_v34 = vld [vmem:[%s6662_s5 + $0x24] sm:$0xe] }
  0xab   : > { %v1817_v18 = vsel %vm6680_vm2, %v1812_v52, %v1816_v29  ;;  %v728_v26 = vsel %vm699_vm3, %v5447_v0, 0  ;;  %v5692_v9 = vcombine.low %v2321_v21, %v2324_v31  ;;  %v5671_v10 = vrot.slane %v5655_v16, 9  ;;  %v6462_v29 = vld [vmem:[%s6662_s5 + $0x7c] sm:$0xf]  ;;  %v5656_v31 = vld [vmem:[%s6662_s5 + $0x84] sm:$0xe] }
  0xac   : > { %5923 = vmatpush3.bf16.xpose.msra.mxu1 %v728_v26  ;;  %v1827_v33 = vsel %vm6680_vm2, %v1822_v19, %v1826_v49  ;;  %v2266_v37 = vrot.slane %v2264_v25, 4  ;;  %v2327_v53 = vrot.slane %v6462_v29, 5  ;;  %v2265_v44 = vsel %vm7039_vm6, %v5662_v15, %v2264_v25  ;;  %v6464_v49 = vld [vmem:[%s6662_s5 + $0x1c] sm:$0xf]  ;;  %v6467_v19 = vld [vmem:[%s6662_s5 + $0x20] sm:$0x1] }
  0xad   : > { %v5635_v39 = vcombine.low %v1817_v18, %v1827_v33  ;;  %6176 = vmatprep.subr.msk.bf16.mxu1 %vm699_vm3, %v5468_v63  ;;  %v2330_v41 = vrot.slane %v6463_v47, 5  ;;  %v2271_v50 = vrot.slane %v6464_v49, 5  ;;  %v904_v54 = vsel %vm699_vm3, %v5460_v32, 0  ;;  %v6311_v0 = vld [vmem:[%s8648_s1 + $0x18] sm:$0xff]   ;;  %v6469_v26 = vld [vmem:[%s8648_s1 + $0x10] sm:$0xff]   ;;  %v6313_v32 = vld [vmem:[%s8648_s1 + $0x48] sm:$0xff]  }
  0xae   : > { %v2268_v45 = vsel %vm7039_vm6, %v2266_v37, %v2267_v11  ;;  %v2329_v56 = vrot.slane %v2327_v53, 4  ;;  %v6465_v11 = vld [vmem:[%s6662_s5 + $0x6c] sm:$0xf]  ;;  %v5663_v8 = vrot.slane %v5647_v30, 9  ;;  %v2328_v16 = vsel %vm7039_vm6, %v5671_v10, %v2327_v53  ;;  %v6470_v33 = vld [vmem:[%s6662_s5 + $0x28] sm:$0xf] }
  0xaf   : > { %v2111_v52 = vsel %vm699_vm3, %v5635_v39, 0  ;;  %v5684_v55 = vcombine.low %v2265_v44, %v2268_v45  ;;  %v5469_v63 = vcombine.low %v6465_v11, %v7089_v6  ;;  %v2273_v15 = vrot.slane %v2271_v50, 4  ;;  %v6471_v10 = vld [vmem:[%s6662_s5 + $0xc] sm:$0xf]  ;;  %v7113_v29 = vld [vmem:[%s6662_s5 + $0x10] sm:$0xf] }
  0xb0   : > { %6003 = vmatpush3.bf16.xpose.msra.mxu0 %v2111_v52  ;;  %v2331_v18 = vsel %vm7039_vm6, %v2329_v56, %v2330_v41  ;;  %v2274_v21 = vrot.slane %v6467_v19, 5  ;;  %v2334_v25 = vrot.slane %v6468_v23, 5  ;;  %v5461_v53 = vcombine.low %v6471_v10, %v7113_v29  ;;  %v6473_v41 = vld [vmem:[%s6662_s5 + $0x8c] sm:$0x1]  ;;  %v6474_v52 = vld [vmem:[%s8648_s1 + $0x40] sm:$0xff]  }
  0xb1   : > { %6208 = vmatprep.subr.msk.bf16.mxu0 %vm699_vm3, %v5692_v9  ;;  %v2278_v9 = vrot.slane %v6470_v33, 5  ;;  %v2444_v37 = vsel %vm699_vm3, %v5684_v55, 0  ;;  %v5693_v39 = vcombine.low %v2328_v16, %v2331_v18  ;;  %v2272_v30 = vsel %vm7039_vm6, %v5663_v8, %v2271_v50  ;;  %v6475_v55 = vld [vmem:[%s6662_s5 + $0x2c] sm:$0x1]  ;;  %v6476_v11 = vld [vmem:[%s6662_s5 + $0x94] sm:$0xf] }
  0xb2   : > { %v2275_v44 = vsel %vm7039_vm6, %v2273_v15, %v2274_v21  ;;  %v5672_v45 = vrot.slane %v5656_v31, 9  ;;  %v2336_v47 = vrot.slane %v2334_v25, 4  ;;  %v2337_v49 = vrot.slane %v6473_v41, 5  ;;  %v7131_v8 = vld [vmem:[%s8648_s1] sm:$0xff]   ;;  %v6477_v18 = vld [vmem:[%s6662_s5 + $0x78] sm:$0xf] }
  0xb3   : > { %5925 = vmatmul.mubr.msk.bf16.vlgmr.msra.gmra.mrb[0].mxu1 %vm699_vm3, %v6469_v26  ;;  %v5664_v56 = vrot.slane %v5648_v34, 9  ;;  %v2281_v50 = vrot.slane %v6475_v55, 5  ;;  %v907_v15 = vsel %vm699_vm3, %v5461_v53, 0  ;;  %v5685_v16 = vcombine.low %v2272_v30, %v2275_v44  ;;  %v7137_v19 = vld [vmem:[%s6662_s5 + $0x7c] sm:$0xf] }
  0xb4   : > { %5929 = vmatpush3.bf16.xpose.msra.mxu1 %v904_v54  ;;  %5926 = vmatprep.mubr.msk.bf16.mxu1 %vm699_vm3, %v6311_v0  ;;  %v2280_v54 = vrot.slane %v2278_v9, 4  ;;  %v5470_v21 = vcombine.low %v6477_v18, %v7137_v19  ;;  %v5657_v23 = vld [vmem:[%s6662_s5 + $0x90] sm:$0xe]  ;;  %v2335_v26 = vsel %vm7039_vm6, %v5672_v45, %v2334_v25  ;;  %v2338_v31 = vsel %vm7039_vm6, %v2336_v47, %v2337_v49  ;;  %v6480_v30 = vld [vmem:[%s6662_s5 + $0x98] sm:$0x1] }
  0xb5   : > { %6177 = vmatprep.subr.msk.bf16.mxu1 %vm699_vm3, %v5469_v63  ;;  %v2341_v63 = vrot.slane %v6476_v11, 5  ;;  %v2279_v33 = vsel %vm7039_vm6, %v5664_v56, %v2278_v9  ;;  %v5673_v25 = vrot.slane %v5657_v23, 9  ;;  %v2344_v44 = vrot.slane %v6480_v30, 5  ;;  %v7158_v9 = vld [vmem:[%s8648_s1 + $0x50] sm:$0xff]   ;;  %v6481_v47 = vld [vmem:[%s6662_s5 + $0x18] sm:$0xf] }
  0xb6   : > { %v2282_v34 = vsel %vm7039_vm6, %v2280_v54, %v2281_v50  ;;  %v2447_v45 = vsel %vm699_vm3, %v5685_v16, 0  ;;  %v7164_v41 = vld [vmem:[%s6662_s5 + $0x1c] sm:$0xf]  ;;  %v7169_v56 = vld [vmem:[%s6662_s5 + $0x28] sm:$0xf] }
  0xb7   : > { %6005 = vmatmul.mubr.msk.bf16.vlgmr.msra.gmra.mrb[0].mxu0 %vm699_vm3, %v6474_v52  ;;  %v2343_v53 = vrot.slane %v2341_v63, 4  ;;  %v5462_v49 = vcombine.low %v6481_v47, %v7164_v41  ;;  %v6483_v52 = vld [vmem:[%s6662_s5 + $0x24] sm:$0xf]  ;;  %8668 = vst [vmem:[#allocation7_spill] sm:$0xff] %v7169_v56  ;;  %v5686_v55 = vcombine.low %v2279_v33, %v2282_v34  ;;  %v5658_v18 = vld [vmem:[%s6662_s5 + $0x9c] sm:$0xe]  ;;  %v2342_v23 = vsel %vm7039_vm6, %v5673_v25, %v2341_v63 }
  0xb8   : > { %6009 = vmatpush3.bf16.xpose.msra.mxu0 %v2444_v37  ;;  %6006 = vmatprep.mubr.msk.bf16.mxu0 %vm699_vm3, %v6313_v32  ;;  %v5649_v37 = vld [vmem:[%s6662_s5 + $0x30] sm:$0xe]  ;;  %v5463_v54 = vcombine.low %v6483_v52, %v7169_v56  ;;  %v5650_v33 = vld [vmem:[%s6662_s5 + $0x3c] sm:$0xe]  ;;  %v5652_v30 = vld [vmem:[%s6662_s5 + $0x54] sm:$0xe] }
  0xb9   : > { %6209 = vmatprep.subr.msk.bf16.mxu0 %vm699_vm3, %v5693_v39  ;;  %v6479_v39 = vld [vmem:[%s6662_s5 + $0x34] sm:$0xf]  ;;  %v5665_v50 = vrot.slane %v5649_v37, 9  ;;  %v910_v34 = vsel %vm699_vm3, %v5462_v49, 0  ;;  %v7188_v37 = vld [vmem:[%s6662_s5 + $0x88] sm:$0xf] }
  0xba   : > { %v2285_v10 = vrot.slane %v6479_v39, 5  ;;  %v913_v39 = vsel %vm699_vm3, %v5463_v54, 0  ;;  %v6488_v25 = vld [vmem:[%s6662_s5 + $0x90] sm:$0xf]  ;;  %v5666_v28 = vrot.slane %v5650_v33, 9  ;;  %v2369_v33 = vrot.slane %v6984_v43, 5 }
  0xbb   : > { %5927 = vmatmul.mubr.msk.bf16.gmra.mrb[4].mxu1 %vm699_vm3, %v6311_v0  ;;  %v5694_v0 = vcombine.low %v2335_v26, %v2338_v31  ;;  %v2345_v26 = vsel %vm7039_vm6, %v2343_v53, %v2344_v44  ;;  %v2348_v31 = vrot.slane %v6818_v51, 5  ;;  %v7194_v53 = vld [vmem:[%s6662_s5 + $0x94] sm:$0xf]  ;;  %v2450_v44 = vsel %vm699_vm3, %v5686_v55, 0  ;;  %v5653_v56 = vld [vmem:[%s6662_s5 + $0x60] sm:$0xe] }
  0xbc   : > { %5931 = vmatpush3.bf16.xpose.msra.mxu1 %v907_v15  ;;  %5944 = vmatprep.mubr.msk.bf16.mxu1 %vm699_vm3, %v7131_v8  ;;  %v2287_v11 = vrot.slane %v2285_v10, 4  ;;  %v6485_v15 = vld [vmem:[%s6662_s5 + $0x38] sm:$0x1]  ;;  %8669 = vst [vmem:[#allocation8_spill] sm:$0xff] %v7194_v53  ;;  %v5472_v51 = vcombine.low %v6488_v25, %v7194_v53  ;;  %v5695_v49 = vcombine.low %v2342_v23, %v2345_v26  ;;  %v2362_v53 = vrot.slane %v6920_v46, 5 }
  0xbd   : > { %6178 = vmatprep.subr.msk.bf16.mxu1 %vm699_vm3, %v5470_v21  ;;  %v2288_v16 = vrot.slane %v6485_v15, 5  ;;  %v5660_v21 = vld [vmem:[%s6662_s5 + $0xb4] sm:$0xe]  ;;  %v6490_v15 = vld [vmem:[%s6662_s5 + $0xa4] sm:$0x1]  ;;  %v2350_v25 = vrot.slane %v2348_v31, 4 }
  0xbe   : > { %v5676_v47 = vrot.slane %v5660_v21, 9  ;;  %v2351_v54 = vrot.slane %v6490_v15, 5  ;;  %v2365_v55 = vrot.slane %v6926_v59, 5  ;;  %v2364_v59 = vrot.slane %v2362_v53, 4 }
  0xbf   : > { %6007 = vmatmul.mubr.msk.bf16.gmra.mrb[4].mxu0 %vm699_vm3, %v6313_v32  ;;  %v6486_v32 = vld [vmem:[%s6662_s5 + $0x84] sm:$0xf]  ;;  %v2289_v52 = vsel %vm7039_vm6, %v2287_v11, %v2288_v16  ;;  %v2306_v11 = vrot.slane %v6950_v42, 5  ;;  %v2309_v16 = vrot.slane %v6957_v48, 5  ;;  %v5677_v26 = vrot.slane %v5661_v24, 9 }
  0xc0   : > { %6011 = vmatpush3.bf16.xpose.msra.mxu0 %v2447_v45  ;;  %6024 = vmatprep.mubr.msk.bf16.mxu0 %vm699_vm3, %v7158_v9  ;;  %v5471_v63 = vcombine.low %v6486_v32, %v7188_v37  ;;  %v2286_v45 = vsel %vm7039_vm6, %v5665_v50, %v2285_v10  ;;  %v2292_v32 = vrot.slane %v6838_v36, 5  ;;  %v2295_v10 = vrot.slane %v6843_v40, 5  ;;  %v5659_v48 = vld [vmem:[%s6662_s5 + $0xa8] sm:$0xe] }
  0xc1   : > { %6210 = vmatprep.subr.msk.bf16.mxu0 %vm699_vm3, %v5694_v0  ;;  %v5674_v0 = vrot.slane %v5658_v18, 9  ;;  %v5668_v50 = vrot.slane %v5652_v30, 9  ;;  %v5687_v36 = vcombine.low %v2286_v45, %v2289_v52  ;;  %v7217_v46 = vsel %vm7039_vm6, %v5676_v47, %v2362_v53 }
  0xc2   : > { %v2294_v21 = vrot.slane %v2292_v32, 4  ;;  %v2308_v40 = vrot.slane %v2306_v11, 4  ;;  %v2352_v42 = vsel %vm7039_vm6, %v2350_v25, %v2351_v54  ;;  %v5669_v30 = vrot.slane %v5653_v56, 9 }
  0xc3   : > { %v2349_v18 = vsel %vm7039_vm6, %v5674_v0, %v2348_v31  ;;  %v7221_v23 = vsel %vm7039_vm6, %v5668_v50, %v2306_v11  ;;  %v7228_v31 = vsel %vm7039_vm6, %v2364_v59, %v2365_v55  ;;  %v7244_v43 = vsel %vm7039_vm6, %v5677_v26, %v2369_v33  ;;  %v6491_v0 = vld [vmem:[%s6662_s5 + $0x30] sm:$0xf]  ;;  %v5651_v50 = vld [vmem:[%s6662_s5 + $0x48] sm:$0xe] }
  0xc4   : > { %5933 = vmatpush3.bf16.xpose.msra.mxu1 %v910_v34  ;;  %v2372_v34 = vrot.slane %v6988_v58, 5  ;;  %v5698_v24 = vcombine.low %v7217_v46, %v7228_v31  ;;  %v7238_v53 = vsel %vm7039_vm6, %v2308_v40, %v2309_v16  ;;  %v2371_v58 = vrot.slane %v2369_v33, 4  ;;  %v7282_v46 = vld [vmem:[%s6662_s5 + $0xa0] sm:$0xf] }
  0xc5   : > { %6179 = vmatprep.subr.msk.bf16.mxu1 %vm699_vm3, %v5471_v63  ;;  %v2355_v63 = vrot.slane %v6861_v12, 5  ;;  %v2313_v45 = vrot.slane %v7018_v61, 5  ;;  %v7249_v12 = vld [vmem:[%s6662_s5 + $0x34] sm:$0xf]  ;;  %v2316_v56 = vrot.slane %v7022_v3, 5  ;;  %v5675_v52 = vrot.slane %v5659_v48, 9 }
  0xc6   : > { %v5464_v47 = vcombine.low %v6491_v0, %v7249_v12  ;;  %v7257_v15 = vsel %vm7039_vm6, %v2371_v58, %v2372_v34  ;;  %v2453_v25 = vsel %vm699_vm3, %v5687_v36, 0  ;;  %v2358_v3 = vrot.slane %v6864_v17, 5  ;;  %v6495_v0 = vld [vmem:[%s6662_s5 + $0x68] sm:$0x1] }
  0xc7   : > { %v7261_v61 = vsel %vm7039_vm6, %v5669_v30, %v2313_v45  ;;  %v2315_v54 = vrot.slane %v2313_v45, 4  ;;  %v2357_v55 = vrot.slane %v2355_v63, 4  ;;  %v2299_v11 = vrot.slane %v6887_v57, 5 }
  0xc8   : > { %6013 = vmatpush3.bf16.xpose.msra.mxu0 %v2450_v44  ;;  %v5690_v44 = vcombine.low %v7221_v23, %v7238_v53  ;;  %v916_v17 = vsel %vm699_vm3, %v5464_v47, 0  ;;  %v5667_v59 = vrot.slane %v5651_v50, 9  ;;  %v2356_v57 = vsel %vm7039_vm6, %v5675_v52, %v2355_v63  ;;  %v1004_v52 = vld [vmem:[%s6662_s5] sm:$0xe] }
  0xc9   : > { %6211 = vmatprep.subr.msk.bf16.mxu0 %vm699_vm3, %v5695_v49  ;;  %v2293_v49 = vsel %vm7039_vm6, %v5666_v28, %v2292_v32  ;;  %v5696_v28 = vcombine.low %v2349_v18, %v2352_v42  ;;  %v2296_v32 = vsel %vm7039_vm6, %v2294_v21, %v2295_v10  ;;  %v7274_v16 = vsel %vm7039_vm6, %v2315_v54, %v2316_v56  ;;  %v6493_v18 = vld [vmem:[%s6662_s5 + $0x9c] sm:$0xf]  ;;  %v1013_v54 = vld [vmem:[%s6662_s5 + $0x6c] sm:$0xe] }
  0xca   : > { %v5688_v36 = vcombine.low %v2293_v49, %v2296_v32  ;;  %v5473_v10 = vcombine.low %v6493_v18, %v7282_v46  ;;  %v2359_v21 = vsel %vm7039_vm6, %v2357_v55, %v2358_v3  ;;  %v2301_v40 = vrot.slane %v2299_v11, 4 }
  0xcb   : > { %v2302_v26 = vrot.slane %v6895_v2, 5  ;;  %v5697_v48 = vcombine.low %v2356_v57, %v2359_v21  ;;  %v5465_v31 = vcombine.low %v6867_v22, %v6876_v38  ;;  %v2300_v33 = vsel %vm7039_vm6, %v5667_v59, %v2299_v11  ;;  %v6317_v11 = vld [vmem:[%s6662_s5 + $0x78] sm:$0xff]   ;;  %v6498_v59 = vld [vmem:[%s6662_s5 + $0x14] sm:$0x1] }
  0xcc   : > { %5935 = vmatpush3.bf16.xpose.msra.mxu1 %v913_v39  ;;  %v5699_v39 = vcombine.low %v7244_v43, %v7257_v15  ;;  %v2456_v42 = vsel %vm699_vm3, %v5688_v36, 0  ;;  %v5474_v30 = vcombine.low %v6902_v20, %v6908_v27  ;;  %v5466_v38 = vcombine.low %v6932_v5, %v6938_v14  ;;  %v1012_v43 = vld [vmem:[%s6662_s5 + $0x60] sm:$0xe]  ;;  %v6496_v5 = vld [vmem:[%s6662_s5 + $0x8] sm:$0x1] }
  0xcd   : > { %6180 = vmatprep.subr.msk.bf16.mxu1 %vm699_vm3, %v5472_v51  ;;  %v5691_v51 = vcombine.low %v7261_v61, %v7274_v16  ;;  %v2303_v34 = vsel %vm7039_vm6, %v2301_v40, %v2302_v26  ;;  %v919_v2 = vsel %vm699_vm3, %v5465_v31, 0  ;;  %v1113_v58 = vrot.slane %v7045_v7, 5  ;;  %v1014_v61 = vld [vmem:[%s6662_s5 + $0x78] sm:$0xe] }
  0xce   : > { %v5689_v63 = vcombine.low %v2300_v33, %v2303_v34  ;;  %v922_v45 = vsel %vm699_vm3, %v5466_v38, 0  ;;  %v5475_v20 = vcombine.low %v6962_v62, %v6966_v4  ;;  %v5486_v27 = vrot.slane %v1012_v43, 9  ;;  %v6318_v40 = vld [vmem:[%s6662_s5 + $0x18] sm:$0xff]   ;;  %v6499_v33 = vld [vmem:[%s6662_s5 + $0x80] sm:$0x1]  ;;  %v6319_v38 = vld [vmem:[%s6662_s5 + $0x84] sm:$0xff]  }
  0xcf   : > { %v1116_v47 = vrot.slane %v6495_v0, 5  ;;  %v1115_v49 = vrot.slane %v1113_v58, 4  ;;  %v1057_v56 = vrot.slane %v7067_v35, 5  ;;  %v1060_v14 = vrot.slane %v6496_v5, 5  ;;  %v1015_v0 = vld [vmem:[%s6662_s5 + $0x84] sm:$0xe] }
  0xd0   : > { %6015 = vmatpush3.bf16.xpose.msra.mxu0 %v2453_v25  ;;  %v2459_v22 = vsel %vm699_vm3, %v5689_v63, 0  ;;  %v2462_v7 = vsel %vm699_vm3, %v5690_v44, 0  ;;  %v5467_v62 = vcombine.low %v6994_v1, %v6999_v13  ;;  %v1114_v4 = vsel %vm7039_vm6, %v5486_v27, %v1113_v58  ;;  %v6497_v44 = vld [vmem:[%s6662_s5 + $0x74] sm:$0x1] }
  0xd1   : > { %6212 = vmatprep.subr.msk.bf16.mxu0 %vm699_vm3, %v5696_v28  ;;  %v1117_v35 = vsel %vm7039_vm6, %v1115_v49, %v1116_v47  ;;  %v1059_v15 = vrot.slane %v1057_v56, 4  ;;  %v1120_v25 = vrot.slane %v7089_v6, 5  ;;  %v5487_v1 = vrot.slane %v1013_v54, 9  ;;  %v1005_v6 = vld [vmem:[%s6662_s5 + $0xc] sm:$0xe]  ;;  %v7386_v49 = vld [vmem:[%s8648_s1 + $0x20] sm:$0xff]  }
  0xd2   : > { %v925_v23 = vsel %vm699_vm3, %v5467_v62, 0  ;;  %v5508_v53 = vcombine.low %v1114_v4, %v1117_v35  ;;  %v1123_v28 = vrot.slane %v6497_v44, 5  ;;  %v1064_v50 = vrot.slane %v7113_v29, 5  ;;  %v6501_v62 = vld [vmem:[%s6662_s5 + $0x8c] sm:$0x1]  ;;  %v7404_v54 = vld [vmem:[%s8648_s1 + $0x60] sm:$0xff]  }
  0xd3   : > { %v1061_v32 = vsel %vm7039_vm6, %v1059_v15, %v1060_v14  ;;  %v1122_v55 = vrot.slane %v1120_v25, 4  ;;  %v1121_v36 = vsel %vm7039_vm6, %v5487_v1, %v1120_v25  ;;  %v5479_v18 = vrot.slane %v1005_v6, 9  ;;  %v1007_v35 = vld [vmem:[%s6662_s5 + $0x24] sm:$0xe]  ;;  %v1016_v44 = vld [vmem:[%s6662_s5 + $0x90] sm:$0xe] }
  0xd4   : > { %5937 = vmatpush3.bf16.xpose.msra.mxu1 %v916_v17  ;;  %v1066_v29 = vrot.slane %v1064_v50, 4  ;;  %v1067_v57 = vrot.slane %v6498_v59, 5  ;;  %v1127_v16 = vrot.slane %v7137_v19, 5  ;;  %v1130_v34 = vrot.slane %v6499_v33, 5 }
  0xd5   : > { %6181 = vmatprep.subr.msk.bf16.mxu1 %vm699_vm3, %v5473_v10  ;;  %v1124_v10 = vsel %vm7039_vm6, %v1122_v55, %v1123_v28  ;;  %v1071_v63 = vrot.slane %v7164_v41, 5  ;;  %v1134_v47 = vrot.slane %v7188_v37, 5  ;;  %v5489_v14 = vrot.slane %v1015_v0, 9  ;;  %v8671_v28 = vld [vmem:[#allocation8_spill] sm:$0xff] }
  0xd6   : > { %v5509_v26 = vcombine.low %v1121_v36, %v1124_v10  ;;  %v1068_v19 = vsel %vm7039_vm6, %v1066_v29, %v1067_v57  ;;  %v1129_v31 = vrot.slane %v1127_v16, 4  ;;  %v1137_v4 = vrot.slane %v6501_v62, 5  ;;  %v1008_v36 = vld [vmem:[%s6662_s5 + $0x30] sm:$0xe]  ;;  %v6503_v57 = vld [vmem:[%s6662_s5 + $0x98] sm:$0x1] }
  0xd7   : > { %v1073_v27 = vrot.slane %v1071_v63, 4  ;;  %v5481_v1 = vrot.slane %v1007_v35, 9  ;;  %v1018_v35 = vld [vmem:[%s6662_s5 + $0xa8] sm:$0xe] }
  0xd8   : > { %6017 = vmatpush3.bf16.xpose.msra.mxu0 %v2456_v42  ;;  %v1065_v42 = vsel %vm7039_vm6, %v5479_v18, %v1064_v50  ;;  %v6502_v50 = vld [vmem:[%s6662_s5 + $0x2c] sm:$0x1]  ;;  %v1085_v18 = vrot.slane %v7249_v12, 5 }
  0xd9   : > { %6213 = vmatprep.subr.msk.bf16.mxu0 %vm699_vm3, %v5697_v48  ;;  %v5488_v48 = vrot.slane %v1014_v61, 9  ;;  %v5501_v43 = vcombine.low %v1065_v42, %v1068_v19  ;;  %v1144_v61 = vrot.slane %v6503_v57, 5  ;;  %v6504_v42 = vld [vmem:[%s6662_s5 + $0x38] sm:$0x1]  ;;  %v1017_v19 = vld [vmem:[%s6662_s5 + $0x9c] sm:$0xe] }
  0xdc   : > { %5939 = vmatpush3.bf16.xpose.msra.mxu1 %v919_v2  ;;  %v1006_v2 = vld [vmem:[%s6662_s5 + $0x18] sm:$0xe] }
  0xdd   : > { %6182 = vmatprep.subr.msk.bf16.mxu1 %vm699_vm3, %v5474_v30  ;;  %v6332_v30 = vld [vmem:[%s8648_s1 + $0x58] sm:$0xff]   ;;  %v5480_v58 = vrot.slane %v1006_v2, 9  ;;  %v1148_v2 = vrot.slane %v7282_v46, 5 }
  0xdf   : > { %v1072_v37 = vsel %vm7039_vm6, %v5480_v58, %v1071_v63  ;;  %v1009_v63 = vld [vmem:[%s6662_s5 + $0x3c] sm:$0xe]  ;;  %v1150_v0 = vrot.slane %v1148_v2, 4 }
  0xe0   : > { %6019 = vmatpush3.bf16.xpose.msra.mxu0 %v2459_v22  ;;  %v2687_v22 = vsel %vm699_vm3, %v6318_v40, 0  ;;  %v6324_v58 = vld [vmem:[%s6662_s5 + $0x3c] sm:$0xff]   ;;  %v5483_v46 = vrot.slane %v1009_v63, 9 }
  0xe1   : > { %6214 = vmatprep.subr.msk.bf16.mxu0 %vm699_vm3, %v5698_v24  ;;  %v5478_v24 = vrot.slane %v1004_v52, 9  ;;  %v6320_v52 = vld [vmem:[%s6662_s5 + $0x24] sm:$0xff]  }
  0xe2   : > { %v2690_v25 = vsel %vm699_vm3, %v6320_v52, 0 }
  0xe3   : > { %v1058_v3 = vsel %vm7039_vm6, %v5478_v24, %v1057_v56  ;;  %v1240_v56 = vsel %vm699_vm3, %v5501_v43, 0  ;;  %v8670_v24 = vld [vmem:[#allocation7_spill] sm:$0xff]  ;;  %v5491_v43 = vrot.slane %v1017_v19, 9 }
  0xe4   : > { %5941 = vmatpush3.bf16.xpose.msra.mxu1 %v922_v45  ;;  %v5500_v17 = vcombine.low %v1058_v3, %v1061_v32  ;;  %v6500_v45 = vld [vmem:[%s6662_s5 + $0x20] sm:$0x1]  ;;  %v1078_v15 = vrot.slane %v8670_v24, 5  ;;  %v1141_v3 = vrot.slane %v8671_v28, 5  ;;  %v1135_v32 = vsel %vm7039_vm6, %v5489_v14, %v1134_v47  ;;  %v6509_v24 = vld [vmem:[%s6662_s5 + $0xac] sm:$0xf] }
  0xe5   : > { %6183 = vmatprep.subr.msk.bf16.mxu1 %vm699_vm3, %v5475_v20  ;;  %v1074_v41 = vrot.slane %v6500_v45, 5  ;;  %v1131_v20 = vsel %vm7039_vm6, %v1129_v31, %v1130_v34  ;;  %v6323_v31 = vld [vmem:[%s6662_s5 + $0x9c] sm:$0xff]   ;;  %v1149_v62 = vsel %vm7039_vm6, %v5491_v43, %v1148_v2  ;;  %v6327_v43 = vld [vmem:[%s6662_s5 + $0xb4] sm:$0xff]  }
  0xe6   : > { %v1237_v21 = vsel %vm699_vm3, %v5500_v17, 0  ;;  %v1080_v6 = vrot.slane %v1078_v15, 4  ;;  %v5490_v17 = vrot.slane %v1016_v44, 9  ;;  %v1143_v59 = vrot.slane %v1141_v3, 4  ;;  %v6510_v44 = vld [vmem:[%s6662_s5 + $0xb8] sm:$0xf] }
  0xe7   : > { %v1162_v28 = vrot.slane %v6510_v44, 5 }
  0xe8   : > { %6021 = vmatpush3.bf16.xpose.msra.mxu0 %v2462_v7  ;;  %v1136_v7 = vrot.slane %v1134_v47, 4  ;;  %v1142_v40 = vsel %vm7039_vm6, %v5490_v17, %v1141_v3  ;;  %v1145_v34 = vsel %vm7039_vm6, %v1143_v59, %v1144_v61  ;;  %v1106_v17 = vrot.slane %v6999_v13, 5  ;;  %v6328_v59 = vld [vmem:[%s6662_s5 + $0x54] sm:$0xff]   ;;  %v6512_v61 = vld [vmem:[%s6662_s5 + $0xb0] sm:$0x1] }
  0xe9   : > { %6215 = vmatprep.subr.msk.bf16.mxu0 %vm699_vm3, %v5699_v39  ;;  %v2465_v39 = vsel %vm699_vm3, %v5691_v51, 0  ;;  %v6331_v51 = vld [vmem:[%s8648_s1 + $0x8] sm:$0xff]   ;;  %v5512_v45 = vcombine.low %v1142_v40, %v1145_v34  ;;  %v1164_v40 = vrot.slane %v1162_v28, 4 }
  0xea   : > { %v1138_v55 = vsel %vm7039_vm6, %v1136_v7, %v1137_v4  ;;  %v2696_v7 = vsel %vm699_vm3, %v6324_v58, 0  ;;  %v1108_v2 = vrot.slane %v1106_v17, 4  ;;  %v7491_v58 = vsel %vm699_vm3, %v6328_v59, 0 }
  0xeb   : > { %v5511_v29 = vcombine.low %v1135_v32, %v1138_v55  ;;  %v6511_v32 = vld [vmem:[%s6662_s5 + $0x50] sm:$0x1] }
  0xec   : > { %5943 = vmatpush3.bf16.xpose.msra.mxu1 %v925_v23  ;;  %v6321_v23 = vld [vmem:[%s6662_s5 + $0x90] sm:$0xff]   ;;  %v1102_v55 = vrot.slane %v6511_v32, 5 }
  0xed   : > { %6184 = vmatprep.subr.msk.bf16.mxu1 %vm699_vm3, %v5508_v53 }
  0xf0   : > { %6023 = vmatpush3.bf16.xpose.msra.mxu0 %v2465_v39  ;;  %v1081_v39 = vrot.slane %v6502_v50, 5  ;;  %v1011_v50 = vld [vmem:[%s6662_s5 + $0x54] sm:$0xe] }
  0xf1   : > { %6216 = vmatprep.subr.msk.bf16.mxu0 %vm699_vm3, %v6317_v11  ;;  %v6322_v11 = vld [vmem:[%s6662_s5 + $0x30] sm:$0xff]   ;;  %v5485_v19 = vrot.slane %v1011_v50, 9 }
  0xf2   : > { %v1082_v12 = vsel %vm7039_vm6, %v1080_v6, %v1081_v39  ;;  %v1019_v6 = vld [vmem:[%s6662_s5 + $0xb4] sm:$0xe] }
  0xf3   : > { %5945 = vmatmul.mubr.msk.bf16.vlgmr.msra.gmra.mrb[0].mxu1 %vm699_vm3, %v7131_v8  ;;  %v1128_v8 = vsel %vm7039_vm6, %v5488_v48, %v1127_v16  ;;  %v1079_v16 = vsel %vm7039_vm6, %v5481_v1, %v1078_v15  ;;  %v1088_v48 = vrot.slane %v6504_v42, 5  ;;  %v1155_v15 = vrot.slane %v6509_v24, 5  ;;  %v5761_v24 = vld [vmem:[%s6662_s5 + $0x24] sm:$0xf] }
  0xf4   : > { %5949 = vmatpush3.bf16.xpose.msra.mxu1 %v1237_v21  ;;  %5946 = vmatprep.mubr.msk.bf16.mxu1 %vm699_vm3, %v6331_v51  ;;  %v5510_v5 = vcombine.low %v1128_v8, %v1131_v20  ;;  %v2693_v21 = vsel %vm699_vm3, %v6322_v11, 0  ;;  %v5503_v33 = vcombine.low %v1079_v16, %v1082_v12  ;;  %v6506_v8 = vld [vmem:[%s6662_s5 + $0xa4] sm:$0x1]  ;;  %v5492_v11 = vrot.slane %v1018_v35, 9  ;;  %v7476_v12 = vld [vmem:[%s6662_s5 + $0x7c] sm:$0xf] }
  0xf5   : > { %6185 = vmatprep.subr.msk.bf16.mxu1 %vm699_vm3, %v5509_v26  ;;  %v1087_v26 = vrot.slane %v1085_v18, 4  ;;  %v1151_v20 = vrot.slane %v6506_v8, 5  ;;  %v1157_v57 = vrot.slane %v1155_v15, 4  ;;  %v1158_v16 = vrot.slane %v6512_v61, 5  ;;  %v7525_v35 = vld [vmem:[%s6662_s5 + $0x20] sm:$0x1] }
  0xf6   : > { %v5493_v13 = vrot.slane %v1019_v6, 9 }
  0xf7   : > { %6025 = vmatmul.mubr.msk.bf16.vlgmr.msra.gmra.mrb[0].mxu0 %vm699_vm3, %v7158_v9  ;;  %v1075_v9 = vsel %vm7039_vm6, %v1073_v27, %v1074_v41  ;;  %v1089_v41 = vsel %vm7039_vm6, %v1087_v26, %v1088_v48  ;;  %v1246_v27 = vsel %vm699_vm3, %v5503_v33, 0  ;;  %v6513_v26 = vld [vmem:[%s6662_s5 + $0xbc] sm:$0x1] }
  0xf8   : > { %6029 = vmatpush3.bf16.xpose.msra.mxu0 %v2687_v22  ;;  %6026 = vmatprep.mubr.msk.bf16.mxu0 %vm699_vm3, %v6332_v30  ;;  %v5502_v53 = vcombine.low %v1072_v37, %v1075_v9  ;;  %v6508_v37 = vld [vmem:[%s6662_s5 + $0x4c] sm:$0xf]  ;;  %v1165_v42 = vrot.slane %v6513_v26, 5 }
  0xf9   : > { %6217 = vmatprep.subr.msk.bf16.mxu0 %vm699_vm3, %v6319_v38  ;;  %v1099_v14 = vrot.slane %v6508_v37, 5  ;;  %v7518_v37 = vld [vmem:[%s6662_s5 + $0x80] sm:$0x1] }
  0xfa   : > { %v1243_v10 = vsel %vm699_vm3, %v5502_v53, 0  ;;  %v3055_v50 = vshll.u32 %v7518_v37, 16 }
  0xfb   : > { %5947 = vmatmul.mubr.msk.bf16.gmra.mrb[4].mxu1 %vm699_vm3, %v6331_v51  ;;  %v5482_v51 = vrot.slane %v1008_v36, 9  ;;  %v1101_v3 = vrot.slane %v1099_v14, 4  ;;  %v5782_v36 = vld [vmem:[%s6662_s5 + $0x78] sm:$0xf] }
  0xfc   : > { %5951 = vmatpush3.bf16.xpose.msra.mxu1 %v1240_v56  ;;  %5964 = vmatprep.mubr.msk.bf16.mxu1 %vm699_vm3, %v7386_v49  ;;  %v6507_v56 = vld [vmem:[%s6662_s5 + $0x44] sm:$0x1]  ;;  %v3036_v34 = vshrl.u32 %v5782_v36, 16  ;;  %v3039_v63 = vshll.u32 %v5782_v36, 16  ;;  %v2871_v36 = vshll.u32 %v5761_v24, 16 }
  0xfd   : > { %6186 = vmatprep.subr.msk.bf16.mxu1 %vm699_vm3, %v5510_v5  ;;  %v1086_v38 = vsel %vm7039_vm6, %v5482_v51, %v1085_v18  ;;  %v1095_v52 = vrot.slane %v6507_v56, 5  ;;  %v1010_v5 = vld [vmem:[%s6662_s5 + $0x48] sm:$0xe]  ;;  %v1103_v48 = vsel %vm7039_vm6, %v1101_v3, %v1102_v55  ;;  %v7509_v56 = vsel %vm7039_vm6, %v5493_v13, %v1162_v28  ;;  %v5785_v55 = vld [vmem:[%s6662_s5 + $0x84] sm:$0xf] }
  0xfe   : > { %v5504_v9 = vcombine.low %v1086_v38, %v1089_v41  ;;  %v5484_v1 = vrot.slane %v1010_v5, 9  ;;  %v6326_v18 = vld [vmem:[%s6662_s5 + $0x48] sm:$0xff]   ;;  %v1107_v5 = vsel %vm7039_vm6, %v5485_v19, %v1106_v17  ;;  %v2868_v17 = vshrl.u32 %v5761_v24, 16 }
  0xff   : > { %6027 = vmatmul.mubr.msk.bf16.gmra.mrb[4].mxu0 %vm699_vm3, %v6332_v30  ;;  %v6505_v30 = vld [vmem:[%s6662_s5 + $0x40] sm:$0xf]  ;;  %v2699_v38 = vsel %vm699_vm3, %v6326_v18, 0  ;;  %v6334_v41 = vld [vmem:[%s6662_s5 + $0x6c] sm:$0xff]   ;;  %v3063_v26 = vshll.u32 %v5785_v55, 16 }
 0x100   : > { %6031 = vmatpush3.bf16.xpose.msra.mxu0 %v2690_v25  ;;  %6044 = vmatprep.mubr.msk.bf16.mxu0 %vm699_vm3, %v7404_v54  ;;  %v1092_v22 = vrot.slane %v6505_v30, 5  ;;  %v6325_v25 = vld [vmem:[%s6662_s5 + $0xa8] sm:$0xff]   ;;  %v1249_v39 = vsel %vm699_vm3, %v5504_v9, 0  ;;  %v1100_v51 = vsel %vm7039_vm6, %v5484_v1, %v1099_v14  ;;  %v3045_v30 = vshll.u32 %v7476_v12, 16 }
 0x101   : > { %6218 = vmatprep.subr.msk.bf16.mxu0 %vm699_vm3, %v6321_v23  ;;  %v1152_v23 = vsel %vm7039_vm6, %v1150_v0, %v1151_v20  ;;  %v1159_v20 = vsel %vm7039_vm6, %v1157_v57, %v1158_v16  ;;  %v5758_v0 = vld [vmem:[%s6662_s5 + $0x18] sm:$0xf]  ;;  %v3038_v14 = vrot.slane %v3036_v34, 4  ;;  %v7530_v1 = vld [vmem:[%s6662_s5 + $0x28] sm:$0xf]  ;;  %v7537_v3 = vsel %vm699_vm3, %v6334_v41, 0 }
 0x102   : > { %v1094_v47 = vrot.slane %v1092_v22, 4  ;;  %v1093_v4 = vsel %vm7039_vm6, %v5483_v46, %v1092_v22  ;;  %v3049_v22 = vshrl.u32 %v7476_v12, 16  ;;  %v5506_v46 = vcombine.low %v1100_v51, %v1103_v48  ;;  %v6329_v57 = vld [vmem:[%s6662_s5 + $0xc0] sm:$0xff]   ;;  %v7556_v48 = vld [vmem:[%s6662_s5 + $0x2c] sm:$0x1] }
 0x103   : > { %v2881_v59 = vshrl.u32 %v7530_v1, 16  ;;  %v2873_v34 = vrot.slane %v2871_v36, 5 }
 0x104   : > { %5953 = vmatpush3.bf16.xpose.msra.mxu1 %v1243_v10  ;;  %v1096_v53 = vsel %vm7039_vm6, %v1094_v47, %v1095_v52  ;;  %v5513_v10 = vcombine.low %v1149_v62, %v1152_v23  ;;  %v7505_v47 = vld [vmem:[%s6662_s5 + $0x1c] sm:$0xf]  ;;  %v7513_v52 = vsel %vm7039_vm6, %v1164_v40, %v1165_v42  ;;  %v7522_v62 = vrot.slane %v3045_v30, 5 }
 0x105   : > { %6187 = vmatprep.subr.msk.bf16.mxu1 %vm699_vm3, %v5511_v29  ;;  %v5505_v29 = vcombine.low %v1093_v4, %v1096_v53  ;;  %v3051_v4 = vrot.slane %v3049_v22, 4  ;;  %v2847_v23 = vshll.u32 %v5758_v0, 16  ;;  %v2853_v53 = vshll.u32 %v7505_v47, 16 }
 0x106   : > { %v1255_v44 = vsel %vm699_vm3, %v5506_v46, 0  ;;  %v5515_v28 = vcombine.low %v7509_v56, %v7513_v52  ;;  %v2857_v32 = vshrl.u32 %v7505_v47, 16  ;;  %v3060_v40 = vshrl.u32 %v5785_v55, 16  ;;  %v5764_v46 = vld [vmem:[%s6662_s5 + $0x30] sm:$0xf] }
 0x107   : > { %v1252_v8 = vsel %vm699_vm3, %v5505_v29, 0  ;;  %v2877_v29 = vshll.u32 %v7530_v1, 16  ;;  %v2849_v16 = vrot.slane %v2847_v23, 5  ;;  %v7550_v51 = vrot.slane %v2853_v53, 5 }
 0x108   : > { %6033 = vmatpush3.bf16.xpose.msra.mxu0 %v2693_v21  ;;  %v6330_v21 = vld [vmem:[%s6662_s5 + $0x60] sm:$0xff]   ;;  %v2859_v13 = vrot.slane %v2857_v32, 4  ;;  %v7566_v30 = vrot.slane %v3055_v50, 5  ;;  %v3062_v56 = vrot.slane %v3060_v40, 4  ;;  %v3065_v52 = vrot.slane %v3063_v26, 5 }
 0x109   : > { %6219 = vmatprep.subr.msk.bf16.mxu0 %vm699_vm3, %v6323_v31  ;;  %v8672_v31 = vld [vmem:[#allocation6_spill] sm:$0xff]  ;;  %v7568_v22 = vrot.slane %v2877_v29, 5  ;;  %v2892_v32 = vshrl.u32 %v5764_v46, 16  ;;  %v2895_v55 = vshll.u32 %v5764_v46, 16  ;;  %v7608_v40 = vld [vmem:[%s6662_s5 + $0x38] sm:$0x1] }
 0x10a   : > { %v1109_v33 = vrot.slane %v8672_v31, 5 }
 0x10b   : > { %v2894_v26 = vrot.slane %v2892_v32, 4  ;;  %v5767_v32 = vld [vmem:[%s6662_s5 + $0x3c] sm:$0xf] }
 0x10c   : > { %5955 = vmatpush3.bf16.xpose.msra.mxu1 %v1246_v27  ;;  %v7501_v27 = vsel %vm699_vm3, %v6330_v21, 0  ;;  %v1110_v9 = vsel %vm7039_vm6, %v1108_v2, %v1109_v33  ;;  %v2863_v21 = vshll.u32 %v7525_v35, 16  ;;  %v2870_v33 = vrot.slane %v2868_v17, 4  ;;  %v5788_v2 = vld [vmem:[%s6662_s5 + $0x90] sm:$0xf] }
 0x10d   : > { %6188 = vmatprep.subr.msk.bf16.mxu1 %vm699_vm3, %v5512_v45  ;;  %v1156_v45 = vsel %vm7039_vm6, %v5492_v11, %v1155_v15  ;;  %v5507_v6 = vcombine.low %v1107_v5, %v1110_v9  ;;  %v7544_v11 = vld [vmem:[%s6662_s5 + $0x88] sm:$0xf]  ;;  %v3084_v24 = vshrl.u32 %v5788_v2, 16 }
 0x10e   : > { %v5514_v15 = vcombine.low %v1156_v45, %v1159_v20  ;;  %v3069_v42 = vshll.u32 %v7544_v11, 16  ;;  %v3073_v31 = vshrl.u32 %v7544_v11, 16  ;;  %v7578_v20 = vrot.slane %v2863_v21, 5 }
 0x110   : > { %6035 = vmatpush3.bf16.xpose.msra.mxu0 %v2696_v7  ;;  %v3041_v7 = vrot.slane %v3039_v63, 5  ;;  %v7564_v63 = vsel %vm699_vm3, %v5507_v6, 0  ;;  %v7583_v5 = vrot.slane %v3069_v42, 5  ;;  %v3075_v9 = vrot.slane %v3073_v31, 4 }
 0x111   : > { %6220 = vmatprep.subr.msk.bf16.mxu0 %vm699_vm3, %v6325_v25  ;;  %v2844_v25 = vshrl.u32 %v5758_v0, 16  ;;  %v2860_v0 = vor.u32 %v2859_v13, %v7550_v51  ;;  %v2897_v42 = vrot.slane %v2895_v55, 5 }
 0x112   : > { %v3042_v18 = vor.u32 %v3041_v7, %v3038_v14  ;;  %v7586_v14 = vld [vmem:[%s6662_s5 + $0x34] sm:$0xf]  ;;  %v2874_v7 = vor.u32 %v2873_v34, %v2870_v33  ;;  %v3076_v29 = vor.u32 %v3075_v9, %v7583_v5  ;;  %v6336_v34 = vld [vmem:[%s6662_s5 + $0x6c] sm:$0xff]  }
 0x113   : > { %v2846_v61 = vrot.slane %v2844_v25, 4  ;;  %v3087_v25 = vshll.u32 %v5788_v2, 16  ;;  %v2901_v6 = vshll.u32 %v7586_v14, 16  ;;  %v2905_v50 = vshrl.u32 %v7586_v14, 16 }
 0x114   : > { %5957 = vmatpush3.bf16.xpose.msra.mxu1 %v1249_v39  ;;  %v6338_v39 = vld [vmem:[%s6662_s5 + $0xc] sm:$0xff]   ;;  %v7574_v45 = vrot.slane %v3042_v18, 4  ;;  %v2861_v36 = vrot.slane %v2860_v0, 4  ;;  %v3066_v18 = vor.u32 %v3065_v52, %v3062_v56  ;;  %v5791_v0 = vld [vmem:[%s6662_s5 + $0x9c] sm:$0xf]  ;;  %v3077_v52 = vrot.slane %v3076_v29, 4 }
 0x115   : > { %6189 = vmatprep.subr.msk.bf16.mxu1 %vm699_vm3, %v5513_v10  ;;  %v3052_v10 = vor.u32 %v3051_v4, %v7522_v62  ;;  %v7559_v19 = vsel %vm699_vm3, %v6338_v39, 0  ;;  %v2887_v4 = vshll.u32 %v7556_v48, 16  ;;  %v6333_v39 = vld [vmem:[%s6662_s5 + $0xcc] sm:$0xff]   ;;  %v3089_v21 = vrot.slane %v3087_v25, 5 }
 0x116   : > { %v7610_v31 = vrot.slane %v2901_v6, 5  ;;  %v2907_v33 = vrot.slane %v2905_v50, 4  ;;  %v2866_v46 = vsel %vm6680_vm2, %v2861_v36, %v7578_v20  ;;  %v3067_v56 = vrot.slane %v3066_v18, 4  ;;  %v6340_v50 = vld [vmem:[%s6662_s5 + $0x18] sm:$0xff]  }
 0x117   : > { %v7576_v41 = vrot.slane %v3052_v10, 4  ;;  %v3111_v25 = vshll.u32 %v5791_v0, 16 }
 0x118   : > { %6037 = vmatpush3.bf16.xpose.msra.mxu0 %v2699_v38  ;;  %v2883_v38 = vrot.slane %v2881_v59, 4  ;;  %v2889_v59 = vrot.slane %v2887_v4, 5  ;;  %v2898_v4 = vor.u32 %v2897_v42, %v2894_v26  ;;  %v3072_v55 = vsel %vm6680_vm2, %v3067_v56, %v7583_v5  ;;  %v7665_v26 = vld [vmem:[%s6662_s5 + $0xa4] sm:$0x1] }
 0x119   : > { %6221 = vmatprep.subr.msk.bf16.mxu0 %vm699_vm3, %v6327_v43  ;;  %v7571_v43 = vld [vmem:[%s6662_s5 + $0x94] sm:$0xf]  ;;  %v2916_v5 = vshrl.u32 %v5767_v32, 16  ;;  %v3113_v42 = vrot.slane %v3111_v25, 5 }
 0x11a   : > { %v3093_v23 = vshll.u32 %v7571_v43, 16  ;;  %v3097_v53 = vshrl.u32 %v7571_v43, 16 }
 0x11c   : > { %5959 = vmatpush3.bf16.xpose.msra.mxu1 %v1252_v8  ;;  %v2850_v8 = vor.u32 %v2849_v16, %v2846_v61  ;;  %v7602_v16 = vld [vmem:[%s6662_s5 + $0x98] sm:$0x1]  ;;  %v7604_v13 = vrot.slane %v3093_v23, 5 }
 0x11d   : > { %6190 = vmatprep.subr.msk.bf16.mxu1 %vm699_vm3, %v5514_v15  ;;  %v2884_v15 = vor.u32 %v2883_v38, %v7568_v22  ;;  %v3048_v38 = vsel %vm6680_vm2, %v7574_v45, %v7522_v62  ;;  %v7631_v62 = vld [vmem:[%s6662_s5 + $0xa0] sm:$0xf] }
 0x11e   : > { %v2851_v17 = vrot.slane %v2850_v8, 4  ;;  %v3117_v23 = vshll.u32 %v7631_v62, 16 }
 0x11f   : > { %v2885_v61 = vrot.slane %v2884_v15, 4  ;;  %v3108_v15 = vshrl.u32 %v5791_v0, 16 }
 0x120   : > { %6039 = vmatpush3.bf16.xpose.msra.mxu0 %v7491_v58  ;;  %v7589_v58 = vld [vmem:[%s6662_s5 + $0x8c] sm:$0x1]  ;;  %v2856_v8 = vsel %vm6680_vm2, %v2851_v17, %v7550_v51 }
 0x121   : > { %6222 = vmatprep.subr.msk.bf16.mxu0 %vm699_vm3, %v6329_v57  ;;  %v3079_v10 = vshll.u32 %v7589_v58, 16  ;;  %v3086_v57 = vrot.slane %v3084_v24, 4  ;;  %v2890_v20 = vsel %vm6680_vm2, %v2885_v61, %v2889_v59  ;;  %v2908_v24 = vor.u32 %v2907_v33, %v7610_v31  ;;  %v6339_v59 = vld [vmem:[%s6662_s5 + $0x78] sm:$0xff]  }
 0x122   : > { %v7667_v33 = vrot.slane %v3117_v23, 5 }
 0x123   : > { %v3081_v9 = vrot.slane %v3079_v10, 5  ;;  %v3090_v45 = vor.u32 %v3089_v21, %v3086_v57  ;;  %v6342_v10 = vld [vmem:[%s6662_s5 + $0x24] sm:$0xff]   ;;  %v2899_v57 = vrot.slane %v2898_v4, 4  ;;  %v2909_v61 = vrot.slane %v2908_v24, 4 }
 0x124   : > { %5961 = vmatpush3.bf16.xpose.msra.mxu1 %v1255_v44  ;;  %v2875_v44 = vrot.slane %v2874_v7, 4  ;;  %v3103_v7 = vshll.u32 %v7602_v16, 16  ;;  %v3110_v21 = vrot.slane %v3108_v15, 4  ;;  %v2918_v4 = vrot.slane %v2916_v5, 4  ;;  %v7708_v15 = vld [vmem:[%s6662_s5 + $0x4c] sm:$0xf] }
 0x125   : > { %6191 = vmatprep.subr.msk.bf16.mxu1 %vm699_vm3, %v5515_v28  ;;  %v3099_v28 = vrot.slane %v3097_v53, 4  ;;  %v3121_v53 = vshrl.u32 %v7631_v62, 16  ;;  %v3082_v6 = vsel %vm6680_vm2, %v3077_v52, %v3081_v9  ;;  %v3091_v36 = vrot.slane %v3090_v45, 4 }
 0x126   : > { %v5821_v0 = vcombine.low %v3072_v55, %v3082_v6  ;;  %v7682_v9 = vsel %vm699_vm3, %v6342_v10, 0  ;;  %v6341_v10 = vld [vmem:[%s6662_s5 + $0x84] sm:$0xff]  }
 0x127   : > { %v3100_v51 = vor.u32 %v3099_v28, %v7604_v13  ;;  %v7661_v28 = vld [vmem:[%s8648_s1 + $0x28] sm:$0xff]   ;;  %v3096_v52 = vsel %vm6680_vm2, %v3091_v36, %v7604_v13  ;;  %v3127_v13 = vshll.u32 %v7665_v26, 16  ;;  %v2949_v36 = vshll.u32 %v7708_v15, 16 }
 0x128   : > { %6041 = vmatpush3.bf16.xpose.msra.mxu0 %v7501_v27  ;;  %v3058_v27 = vsel %vm6680_vm2, %v7576_v41, %v7566_v30  ;;  %v2880_v30 = vsel %vm6680_vm2, %v2875_v44, %v7568_v22  ;;  %v2911_v41 = vshll.u32 %v7608_v40, 16  ;;  %v7654_v44 = vld [vmem:[%s6662_s5 + $0x40] sm:$0xf] }
 0x129   : > { %6223 = vmatprep.subr.msk.bf16.mxu0 %vm699_vm3, %v6333_v39  ;;  %v5820_v22 = vcombine.low %v3048_v38, %v3058_v27  ;;  %v3105_v39 = vrot.slane %v3103_v7, 5  ;;  %v5813_v17 = vcombine.low %v2880_v30, %v2890_v20  ;;  %v3101_v18 = vrot.slane %v3100_v51, 4  ;;  %v5794_v7 = vld [vmem:[%s6662_s5 + $0xa8] sm:$0xf]  ;;  %v7695_v51 = vld [vmem:[%s6662_s5 + $0xac] sm:$0xf] }
 0x12a   : > { %v2913_v29 = vrot.slane %v2911_v41, 5  ;;  %v1483_v27 = vsel %vm699_vm3, %v6340_v50, 0  ;;  %v5770_v41 = vld [vmem:[%s6662_s5 + $0x48] sm:$0xf]  ;;  %v3114_v20 = vor.u32 %v3113_v42, %v3110_v21  ;;  %v3145_v55 = vshrl.u32 %v7695_v51, 16 }
 0x12b   : > { %v7676_v56 = vsel %vm699_vm3, %v5813_v17, 0  ;;  %v3106_v30 = vsel %vm6680_vm2, %v3101_v18, %v3105_v39  ;;  %v2940_v6 = vshrl.u32 %v5770_v41, 16  ;;  %v2943_v50 = vshll.u32 %v5770_v41, 16  ;;  %v5797_v21 = vld [vmem:[%s6662_s5 + $0xb4] sm:$0xf] }
 0x12c   : > { %5963 = vmatpush3.bf16.xpose.msra.mxu1 %v7564_v63  ;;  %v5812_v63 = vcombine.low %v2856_v8, %v2866_v46  ;;  %v2925_v8 = vshll.u32 %v7654_v44, 16  ;;  %v2929_v46 = vshrl.u32 %v7654_v44, 16  ;;  %v2914_v45 = vsel %vm6680_vm2, %v2909_v61, %v2913_v29 }
 0x12d   : > { %6192 = vmatprep.subr.msk.bf16.mxu1 %vm699_vm3, %v6336_v34  ;;  %v3123_v34 = vrot.slane %v3121_v53, 4  ;;  %v3132_v53 = vshrl.u32 %v5794_v7, 16  ;;  %v5822_v39 = vcombine.low %v3096_v52, %v3106_v30  ;;  %v3129_v17 = vrot.slane %v3127_v13, 5 }
 0x12e   : > { %v3297_v38 = vsel %vm699_vm3, %v5812_v63, 0  ;;  %v7713_v25 = vrot.slane %v2925_v8, 5  ;;  %v2931_v23 = vrot.slane %v2929_v46, 4  ;;  %v3141_v63 = vshll.u32 %v7695_v51, 16  ;;  %v7737_v8 = vld [vmem:[%s6662_s5 + $0xb8] sm:$0xf] }
 0x12f   : > { %v2953_v18 = vshrl.u32 %v7708_v15, 16  ;;  %v3147_v52 = vrot.slane %v3145_v55, 4  ;;  %v2945_v30 = vrot.slane %v2943_v50, 5  ;;  %v3156_v13 = vshrl.u32 %v5797_v21, 16 }
 0x130   : > { %6043 = vmatpush3.bf16.xpose.msra.mxu0 %v7537_v3  ;;  %v2919_v3 = vshll.u32 %v5767_v32, 16  ;;  %v3135_v32 = vshll.u32 %v5794_v7, 16  ;;  %v2932_v42 = vor.u32 %v2931_v23, %v7713_v25  ;;  %v7739_v46 = vrot.slane %v3141_v63, 5  ;;  %v5773_v63 = vld [vmem:[%s6662_s5 + $0x54] sm:$0xf] }
 0x131   : > { %6224 = vmatprep.subr.msk.bf16.mxu0 %vm699_vm3, %v5820_v22  ;;  %v7711_v22 = vld [vmem:[%s6662_s5 + $0x44] sm:$0x1]  ;;  %v2942_v7 = vrot.slane %v2940_v6, 4  ;;  %v3159_v41 = vshll.u32 %v5797_v21, 16  ;;  %v2964_v21 = vshrl.u32 %v5773_v63, 16 }
 0x132   : > { %v2921_v24 = vrot.slane %v2919_v3, 5  ;;  %v2935_v61 = vshll.u32 %v7711_v22, 16  ;;  %v3134_v3 = vrot.slane %v3132_v53, 4  ;;  %v2933_v55 = vrot.slane %v2932_v42, 4 }
 0x133   : > { %5965 = vmatmul.mubr.msk.bf16.vlgmr.msra.gmra.mrb[0].mxu1 %vm699_vm3, %v7386_v49  ;;  %v2904_v49 = vsel %vm6680_vm2, %v2899_v57, %v7610_v31  ;;  %v3124_v31 = vor.u32 %v3123_v34, %v7667_v33  ;;  %v7734_v34 = vld [vmem:[%s6662_s5 + $0xb0] sm:$0x1]  ;;  %v3148_v50 = vor.u32 %v3147_v52, %v7739_v46 }
 0x134   : > { %5969 = vmatpush3.bf16.xpose.msra.mxu1 %v7559_v19  ;;  %5966 = vmatprep.mubr.msk.bf16.mxu1 %vm699_vm3, %v7661_v28  ;;  %v7703_v19 = vld [vmem:[%s8648_s1 + $0x68] sm:$0xff]   ;;  %v5814_v29 = vcombine.low %v2904_v49, %v2914_v45  ;;  %v2922_v5 = vor.u32 %v2921_v24, %v2918_v4  ;;  %v7746_v49 = vrot.slane %v2949_v36, 5  ;;  %v2955_v45 = vrot.slane %v2953_v18, 4  ;;  %v7769_v18 = vld [vmem:[%s6662_s5 + $0x58] sm:$0xf]  ;;  %v6344_v52 = vld [vmem:[%s6662_s5 + $0x30] sm:$0xff]  }
 0x135   : > { %6193 = vmatprep.subr.msk.bf16.mxu1 %vm699_vm3, %v6339_v59  ;;  %v3115_v59 = vrot.slane %v3114_v20, 4  ;;  %v3125_v57 = vrot.slane %v3124_v31, 4  ;;  %v7753_v20 = vld [vmem:[%s8648_s1 + $0x70] sm:$0xff]   ;;  %v3165_v31 = vshll.u32 %v7737_v8, 16  ;;  %v3169_v4 = vshrl.u32 %v7737_v8, 16 }
 0x136   : > { %v2923_v53 = vrot.slane %v2922_v5, 4 }
 0x137   : > { %6045 = vmatmul.mubr.msk.bf16.vlgmr.msra.gmra.mrb[0].mxu0 %vm699_vm3, %v7404_v54  ;;  %v7726_v54 = vld [vmem:[%s8648_s1 + $0x30] sm:$0xff]   ;;  %v3120_v24 = vsel %vm6680_vm2, %v3115_v59, %v7667_v33  ;;  %v3130_v23 = vsel %vm6680_vm2, %v3125_v57, %v3129_v17  ;;  %v2946_v17 = vor.u32 %v2945_v30, %v2942_v7  ;;  %v3161_v59 = vrot.slane %v3159_v41, 5  ;;  %v7780_v57 = vld [vmem:[%s6662_s5 + $0xbc] sm:$0x1] }
 0x138   : > { %6049 = vmatpush3.bf16.xpose.msra.mxu0 %v3297_v38  ;;  %6046 = vmatprep.mubr.msk.bf16.mxu0 %vm699_vm3, %v7703_v19  ;;  %v3137_v38 = vrot.slane %v3135_v32, 5  ;;  %v3151_v32 = vshll.u32 %v7734_v34, 16  ;;  %v6343_v33 = vld [vmem:[%s6662_s5 + $0x90] sm:$0xff]   ;;  %v5823_v5 = vcombine.low %v3120_v24, %v3130_v23  ;;  %v2928_v42 = vsel %vm6680_vm2, %v2923_v53, %v7713_v25  ;;  %v7796_v24 = vld [vmem:[%s6662_s5 + $0xc4] sm:$0xf] }
 0x139   : > { %6225 = vmatprep.subr.msk.bf16.mxu0 %vm699_vm3, %v5821_v0  ;;  %v7742_v0 = vld [vmem:[%s6662_s5 + $0x50] sm:$0x1]  ;;  %v3149_v30 = vrot.slane %v3148_v50, 4  ;;  %v2947_v41 = vrot.slane %v2946_v17, 4  ;;  %v3175_v25 = vshll.u32 %v7780_v57, 16  ;;  %v2966_v53 = vrot.slane %v2964_v21, 4 }
 0x13a   : > { %v3138_v6 = vor.u32 %v3137_v38, %v3134_v3  ;;  %v2959_v36 = vshll.u32 %v7742_v0, 16  ;;  %v2973_v3 = vshll.u32 %v7769_v18, 16  ;;  %v2977_v38 = vshrl.u32 %v7769_v18, 16 }
 0x13b   : > { %5967 = vmatmul.mubr.msk.bf16.gmra.mrb[4].mxu1 %vm699_vm3, %v7661_v28  ;;  %v3303_v28 = vsel %vm699_vm3, %v5814_v29, 0  ;;  %v3158_v29 = vrot.slane %v3156_v13, 4  ;;  %v5800_v13 = vld [vmem:[%s6662_s5 + $0xc0] sm:$0xf]  ;;  %v2952_v21 = vsel %vm6680_vm2, %v2947_v41, %v7746_v49 }
 0x13c   : > { %5971 = vmatpush3.bf16.xpose.msra.mxu1 %v1483_v27  ;;  %5984 = vmatprep.mubr.msk.bf16.mxu1 %vm699_vm3, %v7726_v54  ;;  %v2937_v27 = vrot.slane %v2935_v61, 5  ;;  %v7782_v61 = vrot.slane %v3165_v31, 5  ;;  %v3139_v7 = vrot.slane %v3138_v6, 4  ;;  %v3180_v6 = vshrl.u32 %v5800_v13, 16 }
 0x13d   : > { %6194 = vmatprep.subr.msk.bf16.mxu1 %vm699_vm3, %v6341_v10  ;;  %v2956_v10 = vor.u32 %v2955_v45, %v7746_v49  ;;  %v3153_v45 = vrot.slane %v3151_v32, 5  ;;  %v3162_v23 = vor.u32 %v3161_v59, %v3158_v29  ;;  %v7801_v32 = vld [vmem:[%s6662_s5 + $0x5c] sm:$0x1]  ;;  %v3183_v50 = vshll.u32 %v5800_v13, 16  ;;  %v7827_v49 = vld [vmem:[%s6662_s5 + $0xc8] sm:$0x1] }
 0x13e   : > { %v6345_v29 = vld [vmem:[%s6662_s5 + $0x9c] sm:$0xff]   ;;  %v3144_v59 = vsel %vm6680_vm2, %v3139_v7, %v7739_v46 }
 0x13f   : > { %6047 = vmatmul.mubr.msk.bf16.gmra.mrb[4].mxu0 %vm699_vm3, %v7703_v19  ;;  %v3171_v19 = vrot.slane %v3169_v4, 4  ;;  %v2957_v31 = vrot.slane %v2956_v10, 4  ;;  %v2961_v4 = vrot.slane %v2959_v36, 5  ;;  %v1489_v36 = vsel %vm699_vm3, %v6344_v52, 0 }
 0x140   : > { %6051 = vmatpush3.bf16.xpose.msra.mxu0 %v7676_v56  ;;  %6064 = vmatprep.mubr.msk.bf16.mxu0 %vm699_vm3, %v7753_v20  ;;  %v2967_v56 = vshll.u32 %v5773_v63, 16  ;;  %v3189_v10 = vshll.u32 %v7796_v24, 16  ;;  %v2983_v52 = vshll.u32 %v7801_v32, 16 }
 0x141   : > { %6226 = vmatprep.subr.msk.bf16.mxu0 %vm699_vm3, %v5822_v39  ;;  %v2938_v39 = vsel %vm6680_vm2, %v2933_v55, %v2937_v27  ;;  %v3172_v27 = vor.u32 %v3171_v19, %v7782_v61  ;;  %v7803_v55 = vrot.slane %v2973_v3, 5  ;;  %v3154_v19 = vsel %vm6680_vm2, %v3149_v30, %v3153_v45 }
 0x142   : > { %v2969_v63 = vrot.slane %v2967_v56, 5  ;;  %v5815_v17 = vcombine.low %v2928_v42, %v2938_v39  ;;  %v2962_v56 = vsel %vm6680_vm2, %v2957_v31, %v2961_v4  ;;  %v5776_v42 = vld [vmem:[%s6662_s5 + $0x60] sm:$0xf]  ;;  %v7823_v39 = vld [vmem:[%s6662_s5 + $0x64] sm:$0xf]  ;;  %v3182_v30 = vrot.slane %v3180_v6, 4 }
 0x143   : > { %v3173_v3 = vrot.slane %v3172_v27, 4  ;;  %8674 = vst [vmem:[#allocation7_spill] sm:$0xff] %v7823_v39  ;;  %v3185_v45 = vrot.slane %v3183_v50, 5  ;;  %v7829_v13 = vrot.slane %v3189_v10, 5  ;;  %v2991_v31 = vshll.u32 %v5776_v42, 16 }
 0x144   : > { %5973 = vmatpush3.bf16.xpose.msra.mxu1 %v7682_v9  ;;  %v2979_v9 = vrot.slane %v2977_v38, 4  ;;  %v3177_v38 = vrot.slane %v3175_v25, 5  ;;  %v2970_v46 = vor.u32 %v2969_v63, %v2966_v53  ;;  %v3306_v4 = vsel %vm699_vm3, %v5815_v17, 0  ;;  %v6346_v53 = vld [vmem:[%s6662_s5 + $0x3c] sm:$0xff]   ;;  %v5803_v50 = vld [vmem:[%s6662_s5 + $0xcc] sm:$0xf] }
 0x145   : > { %6195 = vmatprep.subr.msk.bf16.mxu1 %vm699_vm3, %v6343_v33  ;;  %v3193_v33 = vshrl.u32 %v7796_v24, 16  ;;  %v2997_v25 = vshll.u32 %v7823_v39, 16  ;;  %v5824_v27 = vcombine.low %v3144_v59, %v3154_v19  ;;  %v5816_v63 = vcombine.low %v2952_v21, %v2962_v56 }
 0x146   : > { %v2980_v7 = vor.u32 %v2979_v9, %v7803_v55  ;;  %v2985_v6 = vrot.slane %v2983_v52, 5  ;;  %v2971_v17 = vrot.slane %v2970_v46, 4  ;;  %v2993_v21 = vrot.slane %v2991_v31, 5  ;;  %v6347_v46 = vld [vmem:[%s6662_s5 + $0xa8] sm:$0xff]  }
 0x147   : > { %v3195_v41 = vrot.slane %v3193_v33, 4  ;;  %v3199_v33 = vshll.u32 %v7827_v49, 16  ;;  %v7850_v56 = vrot.slane %v2997_v25, 5  ;;  %v1492_v52 = vsel %vm699_vm3, %v6346_v53, 0  ;;  %v6348_v25 = vld [vmem:[%s6662_s5 + $0x48] sm:$0xff]  }
 0x148   : > { %6053 = vmatpush3.bf16.xpose.msra.mxu0 %v3303_v28  ;;  %v3163_v28 = vrot.slane %v3162_v23, 4  ;;  %v3001_v23 = vshrl.u32 %v7823_v39, 16  ;;  %v2981_v10 = vrot.slane %v2980_v7, 4  ;;  %v7867_v39 = vld [vmem:[%s6662_s5 + $0x70] sm:$0xf] }
 0x149   : > { %6227 = vmatprep.subr.msk.bf16.mxu0 %vm699_vm3, %v5823_v5  ;;  %v2988_v5 = vshrl.u32 %v5776_v42, 16  ;;  %v7844_v42 = vld [vmem:[%s6662_s5 + $0xd0] sm:$0xf]  ;;  %v3196_v59 = vor.u32 %v3195_v41, %v7829_v13  ;;  %v3201_v31 = vrot.slane %v3199_v33, 5  ;;  %8676 = vst [vmem:[#allocation6_spill] sm:$0xff] %v7867_v39 }
 0x14a   : > { %v3168_v9 = vsel %vm6680_vm2, %v3163_v28, %v7782_v61  ;;  %8675 = vst [vmem:[#allocation8_spill] sm:$0xff] %v7844_v42  ;;  %v7848_v61 = vld [vmem:[%s6662_s5 + $0x68] sm:$0x1]  ;;  %v3003_v28 = vrot.slane %v3001_v23, 4  ;;  %v3213_v7 = vshll.u32 %v7844_v42, 16  ;;  %v2986_v23 = vsel %vm6680_vm2, %v2981_v10, %v2985_v6 }
 0x14b   : > { %v2990_v19 = vrot.slane %v2988_v5, 4  ;;  %v2976_v5 = vsel %vm6680_vm2, %v2971_v17, %v7803_v55  ;;  %v3197_v53 = vrot.slane %v3196_v59, 4  ;;  %v7872_v55 = vld [vmem:[%s6662_s5 + $0xd4] sm:$0x1]  ;;  %v3025_v59 = vshrl.u32 %v7867_v39, 16 }
 0x14c   : > { %5975 = vmatpush3.bf16.xpose.msra.mxu1 %v1489_v36  ;;  %v3178_v36 = vsel %vm6680_vm2, %v3173_v3, %v3177_v38  ;;  %v3204_v3 = vshrl.u32 %v5803_v50, 16  ;;  %v3207_v38 = vshll.u32 %v5803_v50, 16  ;;  %v3007_v50 = vshll.u32 %v7848_v61, 16 }
 0x14d   : > { %6196 = vmatprep.subr.msk.bf16.mxu1 %vm699_vm3, %v6345_v29  ;;  %v3186_v29 = vor.u32 %v3185_v45, %v3182_v30  ;;  %v3217_v30 = vshrl.u32 %v7844_v42, 16  ;;  %v3309_v45 = vsel %vm699_vm3, %v5816_v63, 0  ;;  %v5825_v41 = vcombine.low %v3168_v9, %v3178_v36 }
 0x14e   : > { %v2994_v63 = vor.u32 %v2993_v21, %v2990_v19  ;;  %v3004_v9 = vor.u32 %v3003_v28, %v7850_v56  ;;  %v3206_v36 = vrot.slane %v3204_v3, 4  ;;  %v3209_v42 = vrot.slane %v3207_v38, 5 }
 0x14f   : > { %v3215_v17 = vrot.slane %v3213_v7, 5  ;;  %v3219_v33 = vrot.slane %v3217_v30, 4  ;;  %v1495_v19 = vsel %vm699_vm3, %v6348_v25, 0  ;;  %v5817_v21 = vcombine.low %v2976_v5, %v2986_v23  ;;  %v6349_v30 = vld [vmem:[%s6662_s5 + $0xb4] sm:$0xff]  }
 0x150   : > { %6055 = vmatpush3.bf16.xpose.msra.mxu0 %v3306_v4  ;;  %v5779_v4 = vld [vmem:[%s6662_s5 + $0x6c] sm:$0xf]  ;;  %v3009_v3 = vrot.slane %v3007_v50, 5  ;;  %v3202_v38 = vsel %vm6680_vm2, %v3197_v53, %v3201_v31  ;;  %v3223_v7 = vshll.u32 %v7872_v55, 16  ;;  %v6350_v53 = vld [vmem:[%s6662_s5 + $0x54] sm:$0xff]  }
 0x151   : > { %6228 = vmatprep.subr.msk.bf16.mxu0 %vm699_vm3, %v5824_v27  ;;  %v3187_v27 = vrot.slane %v3186_v29, 4  ;;  %v3012_v6 = vshrl.u32 %v5779_v4, 16  ;;  %v3015_v10 = vshll.u32 %v5779_v4, 16  ;;  %v3021_v29 = vshll.u32 %v7867_v39, 16  ;;  %v7886_v39 = vld [vmem:[%s6662_s5 + $0x74] sm:$0x1] }
 0x152   : > { %v3210_v4 = vor.u32 %v3209_v42, %v3206_v36  ;;  %v3220_v25 = vor.u32 %v3219_v33, %v3215_v17  ;;  %v3031_v33 = vshll.u32 %v7886_v39, 16 }
 0x153   : > { %v3192_v28 = vsel %vm6680_vm2, %v3187_v27, %v7829_v13  ;;  %v3014_v5 = vrot.slane %v3012_v6, 4  ;;  %v3017_v23 = vrot.slane %v3015_v10, 5  ;;  %v3023_v13 = vrot.slane %v3021_v29, 5  ;;  %v5838_v6 = vld [vmem:[%s6662_s5 + $0x78] sm:$0xe] }
 0x154   : > { %5977 = vmatpush3.bf16.xpose.msra.mxu1 %v1492_v52  ;;  %v2995_v52 = vrot.slane %v2994_v63, 4  ;;  %v3312_v27 = vsel %vm699_vm3, %v5817_v21, 0  ;;  %v5826_v31 = vcombine.low %v3192_v28, %v3202_v38  ;;  %v3211_v63 = vrot.slane %v3210_v4, 4  ;;  %v6353_v21 = vld [vmem:[%s6662_s5 + $0xc0] sm:$0xff]  }
 0x155   : > { %6197 = vmatprep.subr.msk.bf16.mxu1 %vm699_vm3, %v6347_v46  ;;  %v3005_v46 = vrot.slane %v3004_v9, 4  ;;  %v3221_v9 = vrot.slane %v3220_v25, 4  ;;  %v3018_v36 = vor.u32 %v3017_v23, %v3014_v5  ;;  %v3527_v29 = vrot.slane %v7476_v12, 5  ;;  %v6354_v5 = vld [vmem:[%s6662_s5 + $0x60] sm:$0xff]  }
 0x156   : > { %v3000_v50 = vsel %vm6680_vm2, %v2995_v52, %v7850_v56  ;;  %v1498_v56 = vsel %vm699_vm3, %v6350_v53, 0  ;;  %v3216_v28 = vsel %vm6680_vm2, %v3211_v63, %v3215_v17  ;;  %v3033_v52 = vrot.slane %v3031_v33, 5 }
 0x157   : > { %v3010_v42 = vsel %vm6680_vm2, %v3005_v46, %v3009_v3  ;;  %v3019_v38 = vrot.slane %v3018_v36, 4  ;;  %v5830_v46 = vld [vmem:[%s6662_s5 + $0x18] sm:$0xe]  ;;  %v3529_v12 = vrot.slane %v3527_v29, 4  ;;  %v3471_v4 = vrot.slane %v7505_v47, 5 }
 0x158   : > { %6057 = vmatpush3.bf16.xpose.msra.mxu0 %v3309_v45  ;;  %v3027_v45 = vrot.slane %v3025_v59, 4  ;;  %v5818_v59 = vcombine.low %v3000_v50, %v3010_v42  ;;  %v5846_v23 = vrot.slane %v5830_v46, 9  ;;  %v5839_v50 = vld [vmem:[%s6662_s5 + $0x84] sm:$0xe]  ;;  %v3534_v42 = vrot.slane %v7544_v11, 5 }
 0x159   : > { %6229 = vmatprep.subr.msk.bf16.mxu0 %vm699_vm3, %v5825_v41  ;;  %v3225_v41 = vrot.slane %v3223_v7, 5  ;;  %v3473_v53 = vrot.slane %v3471_v4, 4  ;;  %v5855_v2 = vrot.slane %v5839_v50, 9  ;;  %v3537_v33 = vrot.slane %v7589_v58, 5 }
 0x15a   : > { %v3028_v10 = vor.u32 %v3027_v45, %v3023_v13  ;;  %v3315_v25 = vsel %vm699_vm3, %v5818_v59, 0  ;;  %v3024_v45 = vsel %vm6680_vm2, %v3019_v38, %v3023_v13  ;;  %v3536_v36 = vrot.slane %v3534_v42, 4 }
 0x15b   : > { %v3226_v3 = vsel %vm6680_vm2, %v3221_v9, %v3225_v41  ;;  %v1501_v41 = vsel %vm699_vm3, %v6354_v5, 0  ;;  %v3478_v11 = vrot.slane %v7530_v1, 5  ;;  %v3481_v58 = vrot.slane %v7556_v48, 5 }
 0x15c   : > { %5979 = vmatpush3.bf16.xpose.msra.mxu1 %v1495_v19  ;;  %v5854_v19 = vrot.slane %v5838_v6, 9  ;;  %v3029_v7 = vrot.slane %v3028_v10, 4  ;;  %v5827_v17 = vcombine.low %v3216_v28, %v3226_v3  ;;  %v5831_v6 = vld [vmem:[%s6662_s5 + $0x24] sm:$0xe]  ;;  %v5840_v28 = vld [vmem:[%s6662_s5 + $0x90] sm:$0xe] }
 0x15d   : > { %6198 = vmatprep.subr.msk.bf16.mxu1 %vm699_vm3, %v6349_v30  ;;  %v3530_v30 = vrot.slane %v7518_v37, 5  ;;  %v5847_v59 = vrot.slane %v5831_v6, 9  ;;  %v3541_v1 = vrot.slane %v7571_v43, 5  ;;  %v6357_v3 = vld [vmem:[%s8648_s1 + $0x38] sm:$0xff]   ;;  %v3544_v43 = vrot.slane %v7602_v16, 5 }
 0x15e   : > { %v3034_v47 = vsel %vm6680_vm2, %v3029_v7, %v3033_v52  ;;  %v5856_v7 = vrot.slane %v5840_v28, 9 }
 0x15f   : > { %v3531_v37 = vsel %vm7039_vm6, %v3529_v12, %v3530_v30  ;;  %v5819_v13 = vcombine.low %v3024_v45, %v3034_v47  ;;  %v3479_v46 = vsel %vm7039_vm6, %v5847_v59, %v3478_v11  ;;  %v3543_v12 = vrot.slane %v3541_v1, 4  ;;  %v5832_v30 = vld [vmem:[%s6662_s5 + $0x30] sm:$0xe]  ;;  %v5841_v45 = vld [vmem:[%s6662_s5 + $0x9c] sm:$0xe] }
 0x160   : > { %6059 = vmatpush3.bf16.xpose.msra.mxu0 %v3312_v27  ;;  %v3528_v27 = vsel %vm7039_vm6, %v5854_v19, %v3527_v29  ;;  %v3538_v19 = vsel %vm7039_vm6, %v3536_v36, %v3537_v33  ;;  %v5848_v16 = vrot.slane %v5832_v30, 9  ;;  %v5842_v36 = vld [vmem:[%s6662_s5 + $0xa8] sm:$0xe]  ;;  %v3555_v33 = vrot.slane %v7695_v51, 5  ;;  %v5835_v30 = vld [vmem:[%s6662_s5 + $0x54] sm:$0xe] }
 0x161   : > { %6230 = vmatprep.subr.msk.bf16.mxu0 %vm699_vm3, %v5826_v31  ;;  %v3474_v31 = vrot.slane %v7525_v35, 5  ;;  %v5876_v63 = vcombine.low %v3528_v27, %v3531_v37  ;;  %v3472_v35 = vsel %vm7039_vm6, %v5846_v23, %v3471_v4  ;;  %v3318_v10 = vsel %vm699_vm3, %v5819_v13, 0  ;;  %v7988_v13 = vld [vmem:[%s8648_s1 + $0x80] sm:$0xff]   ;;  %v5834_v59 = vld [vmem:[%s6662_s5 + $0x48] sm:$0xe] }
 0x162   : > { %v3485_v4 = vrot.slane %v7586_v14, 5  ;;  %v3542_v23 = vsel %vm7039_vm6, %v5856_v7, %v3541_v1  ;;  %v3545_v14 = vsel %vm7039_vm6, %v3543_v12, %v3544_v43  ;;  %v3548_v27 = vrot.slane %v7631_v62, 5 }
 0x163   : > { %v3475_v9 = vsel %vm7039_vm6, %v3473_v53, %v3474_v31  ;;  %v7973_v31 = vld [vmem:[%s8648_s1 + $0x88] sm:$0xff]   ;;  %v5878_v37 = vcombine.low %v3542_v23, %v3545_v14  ;;  %v3551_v53 = vrot.slane %v7665_v26, 5  ;;  %v5850_v28 = vrot.slane %v5834_v59, 9 }
 0x164   : > { %5981 = vmatpush3.bf16.xpose.msra.mxu1 %v1498_v56  ;;  %v5868_v29 = vcombine.low %v3472_v35, %v3475_v9  ;;  %v3535_v56 = vsel %vm7039_vm6, %v5855_v2, %v3534_v42  ;;  %v3486_v62 = vsel %vm7039_vm6, %v5848_v16, %v3485_v4  ;;  %v3550_v50 = vrot.slane %v3548_v27, 4  ;;  %v5833_v42 = vld [vmem:[%s6662_s5 + $0x3c] sm:$0xe] }
 0x165   : > { %6199 = vmatprep.subr.msk.bf16.mxu1 %vm699_vm3, %v6353_v21  ;;  %v3480_v21 = vrot.slane %v3478_v11, 4  ;;  %v5877_v52 = vcombine.low %v3535_v56, %v3538_v19  ;;  %v5849_v35 = vrot.slane %v5833_v42, 9  ;;  %v3495_v9 = vrot.slane %v7711_v22, 5 }
 0x166   : > { %v3651_v38 = vsel %vm699_vm3, %v5868_v29, 0  ;;  %v3558_v29 = vrot.slane %v7734_v34, 5  ;;  %v3557_v56 = vrot.slane %v3555_v33, 4  ;;  %v3499_v19 = vrot.slane %v7708_v15, 5 }
 0x167   : > { %v3482_v48 = vsel %vm7039_vm6, %v3480_v21, %v3481_v58  ;;  %v3509_v14 = vrot.slane %v7801_v32, 5  ;;  %v3572_v32 = vrot.slane %v7827_v49, 5  ;;  %v8678_v49 = vld [vmem:[#allocation8_spill] sm:$0xff] }
 0x168   : > { %6061 = vmatpush3.bf16.xpose.msra.mxu0 %v3315_v25  ;;  %v6358_v25 = vld [vmem:[%s8648_s1 + $0x78] sm:$0xff]   ;;  %v5869_v5 = vcombine.low %v3479_v46, %v3482_v48  ;;  %v3559_v34 = vsel %vm7039_vm6, %v3557_v56, %v3558_v29  ;;  %v3501_v1 = vrot.slane %v3499_v19, 4  ;;  %v3500_v7 = vsel %vm7039_vm6, %v5850_v28, %v3499_v19 }
 0x169   : > { %6231 = vmatprep.subr.msk.bf16.mxu0 %vm699_vm3, %v5827_v17  ;;  %v3487_v17 = vrot.slane %v3485_v4, 4 }
 0x16a   : > { %v3654_v47 = vsel %vm699_vm3, %v5869_v5, 0  ;;  %v5851_v5 = vrot.slane %v5835_v30, 9 }
 0x16c   : > { %5983 = vmatpush3.bf16.xpose.msra.mxu1 %v1501_v41  ;;  %v3492_v41 = vrot.slane %v7654_v44, 5  ;;  %v3552_v44 = vsel %vm7039_vm6, %v3550_v50, %v3551_v53  ;;  %v8677_v53 = vld [vmem:[#allocation7_spill] sm:$0xff] }
 0x16d   : > { %6233 = vmatprep.subr.msk.bf16.mxu1 %vm699_vm3, %v5876_v63 }
 0x16e   : > { %v3494_v2 = vrot.slane %v3492_v41, 4  ;;  %v3493_v22 = vsel %vm7039_vm6, %v5849_v35, %v3492_v41  ;;  %v3576_v35 = vrot.slane %v8678_v49, 5 }
 0x170   : > { %6063 = vmatpush3.bf16.xpose.msra.mxu0 %v3318_v10  ;;  %v5858_v10 = vrot.slane %v5842_v36, 9  ;;  %v3496_v51 = vsel %vm7039_vm6, %v3494_v2, %v3495_v9 }
 0x171   : > { %6232 = vmatprep.subr.msk.bf16.mxu0 %vm699_vm3, %v5876_v63  ;;  %v5871_v21 = vcombine.low %v3493_v22, %v3496_v51 }
 0x172   : > { %v3556_v58 = vsel %vm7039_vm6, %v5858_v10, %v3555_v33  ;;  %v8679_v10 = vld [vmem:[#allocation6_spill] sm:$0xff] }
 0x173   : > { %5985 = vmatmul.mubr.msk.bf16.vlgmr.msra.gmra.mrb[0].mxu1 %vm699_vm3, %v7726_v54  ;;  %v3488_v54 = vrot.slane %v7608_v40, 5  ;;  %v5857_v40 = vrot.slane %v5841_v45, 9  ;;  %v3660_v15 = vsel %vm699_vm3, %v5871_v21, 0  ;;  %v5880_v46 = vcombine.low %v3556_v58, %v3559_v34 }
 0x174   : > { %6096 = vmatpush3.bf16.xpose.msra.mxu1 %v3651_v38  ;;  %5986 = vmatprep.mubr.msk.bf16.mxu1 %vm699_vm3, %v6357_v3  ;;  %v3520_v29 = vrot.slane %v8679_v10, 5  ;;  %v3523_v21 = vrot.slane %v7886_v39, 5 }
 0x175   : > { %6235 = vmatprep.subr.msk.bf16.mxu1 %vm699_vm3, %v5877_v52  ;;  %v3549_v63 = vsel %vm7039_vm6, %v5857_v40, %v3548_v27  ;;  %v5836_v40 = vld [vmem:[%s6662_s5 + $0x60] sm:$0xe] }
 0x176   : > { %v5879_v11 = vcombine.low %v3549_v63, %v3552_v44  ;;  %v5852_v50 = vrot.slane %v5836_v40, 9  ;;  %v5845_v63 = vld [vmem:[%s6662_s5 + $0xcc] sm:$0xe]  ;;  %v3522_v19 = vrot.slane %v3520_v29, 4 }
 0x177   : > { %6065 = vmatmul.mubr.msk.bf16.vlgmr.msra.gmra.mrb[0].mxu0 %vm699_vm3, %v7753_v20  ;;  %v3489_v20 = vsel %vm7039_vm6, %v3487_v17, %v3488_v54  ;;  %v5844_v17 = vld [vmem:[%s6662_s5 + $0xc0] sm:$0xe]  ;;  %v5861_v36 = vrot.slane %v5845_v63, 9 }
 0x178   : > { %6069 = vmatpush3.bf16.xpose.msra.mxu0 %v3651_v38  ;;  %6066 = vmatprep.mubr.msk.bf16.mxu0 %vm699_vm3, %v6358_v25  ;;  %v5870_v26 = vcombine.low %v3486_v62, %v3489_v20  ;;  %v5843_v38 = vld [vmem:[%s6662_s5 + $0xb4] sm:$0xe]  ;;  %v5860_v27 = vrot.slane %v5844_v17, 9  ;;  %v3524_v34 = vsel %vm7039_vm6, %v3522_v19, %v3523_v21 }
 0x179   : > { %6234 = vmatprep.subr.msk.bf16.mxu0 %vm699_vm3, %v5877_v52  ;;  %v3562_v52 = vrot.slane %v7737_v8, 5  ;;  %v5859_v48 = vrot.slane %v5843_v38, 9  ;;  %v3506_v8 = vrot.slane %v7769_v18, 5  ;;  %v3577_v56 = vsel %vm7039_vm6, %v5861_v36, %v3576_v35 }
 0x17a   : > { %v3657_v6 = vsel %vm699_vm3, %v5870_v26, 0  ;;  %v3516_v26 = vrot.slane %v7848_v61, 5  ;;  %v5837_v61 = vld [vmem:[%s6662_s5 + $0x6c] sm:$0xe]  ;;  %s5366_s5 = sshll.u32 %s8533_s12, 4  ;;  %s8600_s5 = int_to_ptr.vmem [resolvable:$true] %s5366_s5 }
 0x17b   : > { %5987 = vmatmul.mubr.msk.bf16.gmra.mrb[4].mxu1 %vm699_vm3, %v6357_v3  ;;  %v3502_v3 = vrot.slane %v7742_v0, 5  ;;  %v3564_v43 = vrot.slane %v3562_v52, 4  ;;  %v3565_v0 = vrot.slane %v7780_v57, 5  ;;  %v3508_v16 = vrot.slane %v3506_v8, 4  ;;  %s6514_s23 = scalar_lea.vmem %s8600_s5, 1024  ;;  %p6521_p0 = scmp.lt.s32.totalorder %s8600_s5, %s6519_s28 }
 0x17c   : > { %6097 = vmatpush3.bf16.xpose.msra.mxu1 %v3654_v47  ;;  %6086 = vmatprep.mubr.msk.bf16.mxu1 %vm699_vm3, %v7973_v31  ;;  %v3569_v57 = vrot.slane %v7796_v24, 5  ;;  %v3507_v45 = vsel %vm7039_vm6, %v5851_v5, %v3506_v8  ;;  %v3513_v24 = vrot.slane %v8677_v53, 5  ;;  %v5853_v51 = vrot.slane %v5837_v61, 9  ;;  %p6515_p11 = scmp.ne.s32.totalorder %s8600_s5, %s6514_s23  ;;  %p6522_p1 = scmp.lt.s32.totalorder %s6520_s29, %s6514_s23 }
 0x17d   : > { %6237 = vmatprep.subr.msk.bf16.mxu1 %vm699_vm3, %v5878_v37  ;;  %v3503_v12 = vsel %vm7039_vm6, %v3501_v1, %v3502_v3  ;;  %v3566_v23 = vsel %vm7039_vm6, %v3564_v43, %v3565_v0 }
 0x17e   : > { %v5872_v4 = vcombine.low %v3500_v7, %v3503_v12  ;;  %v3570_v20 = vsel %vm7039_vm6, %v5860_v27, %v3569_v57  ;;  %v3515_v41 = vrot.slane %v3513_v24, 4  ;;  %v3514_v9 = vsel %vm7039_vm6, %v5852_v50, %v3513_v24  ;;  %p6516_p12 = pnand %p6515_p11, %p6647_p5  ;;  %p6523_p2 = por %p6522_p1, %p6521_p0 }
 0x17f   : > { %6067 = vmatmul.mubr.msk.bf16.gmra.mrb[4].mxu0 %vm699_vm3, %v6358_v25  ;;  %v3563_v25 = vsel %vm7039_vm6, %v5859_v48, %v3562_v52  ;;  %v3521_v28 = vsel %vm7039_vm6, %v5853_v51, %v3520_v29 }
 0x180   : > { %6071 = vmatpush3.bf16.xpose.msra.mxu0 %v3654_v47  ;;  %6084 = vmatprep.mubr.msk.bf16.mxu0 %vm699_vm3, %v7988_v13  ;;  %v3663_v18 = vsel %vm699_vm3, %v5872_v4, 0  ;;  %v5881_v54 = vcombine.low %v3563_v25, %v3566_v23  ;;  %v3510_v47 = vsel %vm7039_vm6, %v3508_v16, %v3509_v14  ;;  %v3517_v33 = vsel %vm7039_vm6, %v3515_v41, %v3516_v26  ;;  %p6517_p13 = pneg %p6516_p12 }
 0x181   : > { %6236 = vmatprep.subr.msk.bf16.mxu0 %vm699_vm3, %v5878_v37  ;;  %v3571_v37 = vrot.slane %v3569_v57, 4  ;;  %v5873_v62 = vcombine.low %v3507_v45, %v3510_v47  ;;  %v5874_v22 = vcombine.low %v3514_v9, %v3517_v33  ;;  %v5875_v1 = vcombine.low %v3521_v28, %v3524_v34 }
 0x182   : > { %v3772_v16 = vlaneseq  ;;  %p6524_p3 = pnand %p6523_p2, %p6517_p13 }
 0x183   : > { %v3573_v42 = vsel %vm7039_vm6, %v3571_v37, %v3572_v32  ;;  %v3666_v44 = vsel %vm699_vm3, %v5873_v62, 0  ;;  %v3672_v39 = vsel %vm699_vm3, %v5875_v1, 0 }
 0x184   : > { %6098 = vmatpush3.bf16.xpose.msra.mxu1 %v3657_v6  ;;  %v5882_v2 = vcombine.low %v3570_v20, %v3573_v42  ;;  %v8082_v14 = vshrl.u32 %v3772_v16, 7 }
 0x185   : > { %6239 = vmatprep.subr.msk.bf16.mxu1 %vm699_vm3, %v5879_v11 }
 0x188   : > { %6073 = vmatpush3.bf16.xpose.msra.mxu0 %v3657_v6  ;;  %v3578_v6 = vrot.slane %v3576_v35, 4 }
 0x189   : > { %6238 = vmatprep.subr.msk.bf16.mxu0 %vm699_vm3, %v5879_v11  ;;  %v3579_v11 = vrot.slane %v7872_v55, 5  ;;  %v3669_v55 = vsel %vm699_vm3, %v5874_v22, 0 }
 0x18b   : > { %v3580_v59 = vsel %vm7039_vm6, %v3578_v6, %v3579_v11 }
 0x18c   : > { %6099 = vmatpush3.bf16.xpose.msra.mxu1 %v3660_v15  ;;  %v5883_v58 = vcombine.low %v3577_v56, %v3580_v59 }
 0x18d   : > { %6241 = vmatprep.subr.msk.bf16.mxu1 %vm699_vm3, %v5880_v46 }
 0x190   : > { %6075 = vmatpush3.bf16.xpose.msra.mxu0 %v3660_v15 }
 0x191   : > { %6240 = vmatprep.subr.msk.bf16.mxu0 %vm699_vm3, %v5880_v46 }
 0x194   : > { %6100 = vmatpush3.bf16.xpose.msra.mxu1 %v3663_v18 }
 0x195   : > { %6243 = vmatprep.subr.msk.bf16.mxu1 %vm699_vm3, %v5881_v54 }
 0x198   : > { %6077 = vmatpush3.bf16.xpose.msra.mxu0 %v3663_v18 }
 0x199   : > { %6242 = vmatprep.subr.msk.bf16.mxu0 %vm699_vm3, %v5881_v54 }
 0x19c   : > { %6101 = vmatpush3.bf16.xpose.msra.mxu1 %v3666_v44 }
 0x19d   : > { %6245 = vmatprep.subr.msk.bf16.mxu1 %vm699_vm3, %v5882_v2 }
 0x1a0   : > { %6079 = vmatpush3.bf16.xpose.msra.mxu0 %v3666_v44 }
 0x1a1   : > { %6244 = vmatprep.subr.msk.bf16.mxu0 %vm699_vm3, %v5882_v2 }
 0x1a4   : > { %6102 = vmatpush3.bf16.xpose.msra.mxu1 %v3669_v55 }
 0x1a5   : > { %6247 = vmatprep.subr.msk.bf16.mxu1 %vm699_vm3, %v5883_v58 }
 0x1a8   : > { %6081 = vmatpush3.bf16.xpose.msra.mxu0 %v3669_v55 }
 0x1a9   : > { %6246 = vmatprep.subr.msk.bf16.mxu0 %vm699_vm3, %v5883_v58 }
 0x1ac   : > { %6103 = vmatpush3.bf16.xpose.msra.mxu1 %v3672_v39 }
 0x1b0   : > { %6083 = vmatpush3.bf16.xpose.msra.mxu0 %v3672_v39 }
 0x1b3   : > { %6087 = vmatmul.mubr.msk.bf16.vlgmr.msra.gmra.mrb[8].mxu1 %vm699_vm3, %v7973_v31  ;;  %v6578_v31 = vmov 1983009808  }
 0x1b4   : > { %v3770_v23 = vunpack.c.l.s4 %v6578_v31 }
 0x1b7   : > { %6085 = vmatmul.mubr.msk.bf16.vlgmr.msra.gmra.mrb[0].mxu0 %vm699_vm3, %v7988_v13  ;;  %v3771_v13 = vunpack.c.0.s8 %v3770_v23 }
 0x1b9   : > { %v8085_v54 = vsub.s32 %v3771_v13, %v8082_v14 }
 0x246   : > { %v1561_v3 = vpop.f32.mrb[0].mxu1 }
 0x247   : > { %v1563_v60 = vpop.f32.mrb[1].mxu1 }
 0x248   : > { %v1565_v38 = vpop.f32.mrb[2].mxu1 }
 0x249   : > { %v1567_v52 = vpop.f32.mrb[3].mxu1 }
 0x24e   : > { %v1571_v15 = vpop.f32.mrb[4].mxu1 }
 0x24f   : > { %v1573_v46 = vpop.f32.mrb[5].mxu1 }
 0x250   : > { %v1575_v7 = vpop.f32.mrb[6].mxu1 }
 0x251   : > { %v1577_v48 = vpop.f32.mrb[7].mxu1 }
 0x252   : > { %v3388_v12 = vpop.f32.mrb[4].mxu0 }
 0x253   : > { %v6108_v43 = vadd.f32 %v3388_v12, %v1571_v15  ;;  %v3390_v0 = vpop.f32.mrb[5].mxu0 }
 0x254   : > { %v6110_v30 = vadd.f32 %v3390_v0, %v1573_v46  ;;  %v3392_v8 = vpop.f32.mrb[6].mxu0 }
 0x255   : > { %v6112_v4 = vadd.f32 %v3392_v8, %v1575_v7  ;;  %v3394_v25 = vpop.f32.mrb[7].mxu0 }
 0x256   : > { %v6114_v5 = vadd.f32 %v3394_v25, %v1577_v48 }
 0x286   : > { %v3742_v17 = vpop.f32.mrb[8].mxu1 }
 0x287   : > { %v6109_v57 = vadd.f32 %v6108_v43, %v3742_v17  ;;  %v3744_v18 = vpop.f32.mrb[9].mxu1 }
 0x288   : > { %v6111_v45 = vadd.f32 %v6110_v30, %v3744_v18  ;;  %v3746_v27 = vpop.f32.mrb[10].mxu1 }
 0x289   : > { %v8087_v47 = vadd.f32 %v6112_v4, %v3746_v27  ;;  %v3748_v37 = vpop.f32.mrb[11].mxu1 }
 0x28a   : > { %v3732_v32 = vpop.f32.mrb[0].mxu0  ;;  %v3803_v40 = vcombine.low %v6109_v57, %v6111_v45  ;;  %v3804_v53 = vcombine.high %v6109_v57, %v6111_v45  ;;  %v6115_v24 = vadd.f32 %v6114_v5, %v3748_v37 }
 0x28b   : > { %v6104_v62 = vadd.f32 %v3732_v32, %v1561_v3  ;;  %v3734_v20 = vpop.f32.mrb[1].mxu0 }
 0x28c   : > { %v6105_v50 = vadd.f32 %v3734_v20, %v1563_v60  ;;  %v8090_v42 = vrot.slane %v3803_v40, %v8085_v54  ;;  %v3736_v41 = vpop.f32.mrb[2].mxu0  ;;  %v3821_v26 = vcombine.low %v8087_v47, %v6115_v24  ;;  %v3822_v35 = vcombine.high %v8087_v47, %v6115_v24 }
 0x28d   : > { %v6106_v63 = vadd.f32 %v3736_v41, %v1565_v38  ;;  %v3738_v49 = vpop.f32.mrb[3].mxu0  ;;  %v8095_v36 = vrot.slane %v3804_v53, %v8085_v54 }
 0x28e   : > { %v3767_v44 = vcombine.low %v6104_v62, %v6105_v50  ;;  %v3768_v2 = vcombine.high %v6104_v62, %v6105_v50  ;;  %v6107_v9 = vadd.f32 %v3738_v49, %v1567_v52  ;;  %v3925_v33 = vrot.slane %v8090_v42, %v8085_v54 }
 0x28f   : > { %v8101_v6 = vcombine.high %v8090_v42, %v8090_v42  ;;  %v3941_v59 = vrot.slane %v8095_v36, %v8085_v54  ;;  %v8139_v0 = vcombine.high %v8095_v36, %v8095_v36  ;;  %v8142_v30 = vrot.slane %v3821_v26, %v8085_v54 }
 0x290   : > { %v8104_v11 = vrot.slane %v3767_v44, %v8085_v54  ;;  %v8107_v61 = vrot.slane %v3768_v2, %v8085_v54  ;;  %v3785_v10 = vcombine.low %v6106_v63, %v6107_v9  ;;  %v3786_v29 = vcombine.high %v6106_v63, %v6107_v9 }
 0x291   : > { %v3926_v55 = vcombine.high %v3925_v33, %v3925_v33  ;;  %v3933_v58 = vrot.slane %v8101_v6, %v8085_v54  ;;  %v3942_v7 = vcombine.high %v3941_v59, %v3941_v59  ;;  %v4056_v31 = vsel %vm4015_vm7, %v3925_v33, 0.0 }
 0x292   : > { %v3877_v22 = vrot.slane %v8107_v61, %v8085_v54  ;;  %v3861_v51 = vrot.slane %v8104_v11, %v8085_v54  ;;  %v8115_v56 = vcombine.high %v8107_v61, %v8107_v61  ;;  %v8122_v28 = vrot.slane %v3785_v10, %v8085_v54 }
 0x293   : > { %v8132_v38 = vcombine.high %v8104_v11, %v8104_v11  ;;  %v4057_v48 = vsel %vm4015_vm7, %v3926_v55, 0.0  ;;  %v3934_v12 = vcombine.high %v3933_v58, %v3933_v58  ;;  %v8150_v25 = vrot.slane %v3786_v29, %v8085_v54 }
 0x294   : > { %v3878_v19 = vcombine.high %v3877_v22, %v3877_v22  ;;  %v3862_v21 = vcombine.high %v3861_v51, %v3861_v51  ;;  %v4026_v34 = vsel %vm4015_vm7, %v3877_v22, 0.0  ;;  %v3885_v1 = vrot.slane %v8115_v56, %v8085_v54 }
 0x295   : > { %v4016_v3 = vsel %vm4015_vm7, %v3861_v51, 0.0  ;;  %v3869_v43 = vrot.slane %v8132_v38, %v8085_v54  ;;  %v8147_v4 = vcombine.high %v8122_v28, %v8122_v28  ;;  %v3949_v23 = vrot.slane %v8139_v0, %v8085_v54 }
 0x296   : > { %v4027_v39 = vsel %vm4015_vm7, %v3878_v19, 0.0  ;;  %v4017_v60 = vsel %vm4015_vm7, %v3862_v21, 0.0  ;;  %v3886_v46 = vcombine.high %v3885_v1, %v3885_v1  ;;  %v4031_v5 = vsel %vm4015_vm7, %v3885_v1, 0.0 }
 0x297   : > { %v4028_v52 = vadd.f32 %v4027_v39, %v4026_v34  ;;  %v4018_v15 = vadd.f32 %v4017_v60, %v4016_v3  ;;  %v4058_v13 = vadd.f32 %v4057_v48, %v4056_v31  ;;  %v3893_v17 = vrot.slane %v8122_v28, %v8085_v54 }
 0x298   : > { %v4032_v8 = vsel %vm4015_vm7, %v3886_v46, 0.0  ;;  %v3901_v57 = vrot.slane %v8147_v4, %v8085_v54  ;;  %v4067_v18 = vsel %vm4015_vm7, %v3942_v7, 0.0  ;;  %v4062_v45 = vsel %vm4015_vm7, %v3934_v12, 0.0 }
 0x299   : > { %4029 = vadd.xlane.f32.xlu1 %v4028_v52  ;;  %4019 = vadd.xlane.f32.xlu0 %v4018_v15  ;;  %v4033_v16 = vadd.f32 %v4032_v8, %v4031_v5  ;;  %v3870_v27 = vcombine.high %v3869_v43, %v3869_v43  ;;  %v3950_v47 = vcombine.high %v3949_v23, %v3949_v23  ;;  %v4066_v32 = vsel %vm4015_vm7, %v3941_v59, 0.0 }
 0x29a   : > { %v8163_v37 = vrot.slane %v3822_v35, %v8085_v54  ;;  %v4061_v40 = vsel %vm4015_vm7, %v3933_v58, 0.0  ;;  %v3909_v53 = vrot.slane %v8150_v25, %v8085_v54  ;;  %v8171_v24 = vcombine.high %v8150_v25, %v8150_v25 }
 0x29b   : > { %v4068_v62 = vadd.f32 %v4067_v18, %v4066_v32  ;;  %v4063_v20 = vadd.f32 %v4062_v45, %v4061_v40  ;;  %v3894_v50 = vcombine.high %v3893_v17, %v3893_v17  ;;  %v3902_v41 = vcombine.high %v3901_v57, %v3901_v57 }
 0x29c   : > { %v4022_v26 = vsel %vm4015_vm7, %v3870_v27, 0.0  ;;  %v4072_v63 = vsel %vm4015_vm7, %v3950_v47, 0.0  ;;  %v3917_v49 = vrot.slane %v8171_v24, %v8085_v54  ;;  %v8179_v35 = vcombine.high %v8142_v30, %v8142_v30 }
 0x29d   : > { %4034 = vadd.xlane.f32.xlu1 %v4033_v16  ;;  %4059 = vadd.xlane.f32.xlu0 %v4058_v13  ;;  %v4021_v44 = vsel %vm4015_vm7, %v3869_v43, 0.0  ;;  %v4071_v2 = vsel %vm4015_vm7, %v3949_v23, 0.0  ;;  %v3910_v9 = vcombine.high %v3909_v53, %v3909_v53  ;;  %v4037_v29 = vsel %vm4015_vm7, %v3894_v50, 0.0 }
 0x29e   : > { %v4023_v33 = vadd.f32 %v4022_v26, %v4021_v44  ;;  %v4073_v10 = vadd.f32 %v4072_v63, %v4071_v2  ;;  %v4042_v22 = vsel %vm4015_vm7, %v3902_v41, 0.0  ;;  %v3918_v51 = vcombine.high %v3917_v49, %v3917_v49 }
 0x29f   : > { %v3957_v59 = vrot.slane %v8142_v30, %v8085_v54  ;;  %v3965_v19 = vrot.slane %v8179_v35, %v8085_v54  ;;  %v8191_v21 = vcombine.high %v8163_v37, %v8163_v37  ;;  %v4036_v55 = vsel %vm4015_vm7, %v3893_v17, 0.0 }
 0x2a0   : > { %v4041_v58 = vsel %vm4015_vm7, %v3901_v57, 0.0  ;;  %v4038_v34 = vadd.f32 %v4037_v29, %v4036_v55  ;;  %v4047_v39 = vsel %vm4015_vm7, %v3910_v9, 0.0  ;;  %v3973_v3 = vrot.slane %v8163_v37, %v8085_v54 }
 0x2a1   : > { %4069 = vadd.xlane.f32.xlu0 %v4068_v62  ;;  %4064 = vadd.xlane.f32.xlu1 %v4063_v20  ;;  %v4043_v1 = vadd.f32 %v4042_v22, %v4041_v58  ;;  %v4052_v60 = vsel %vm4015_vm7, %v3918_v51, 0.0  ;;  %v3958_v52 = vcombine.high %v3957_v59, %v3957_v59  ;;  %v3966_v15 = vcombine.high %v3965_v19, %v3965_v19 }
 0x2a2   : > { %v3981_v46 = vrot.slane %v8191_v21, %v8085_v54  ;;  %v4046_v7 = vsel %vm4015_vm7, %v3909_v53, 0.0  ;;  %v4051_v48 = vsel %vm4015_vm7, %v3917_v49, 0.0  ;;  %v3974_v31 = vcombine.high %v3973_v3, %v3973_v3 }
 0x2a3   : > { %v4048_v12 = vadd.f32 %v4047_v39, %v4046_v7  ;;  %v4053_v43 = vadd.f32 %v4052_v60, %v4051_v48  ;;  %v4077_v8 = vsel %vm4015_vm7, %v3958_v52, 0.0  ;;  %v4082_v5 = vsel %vm4015_vm7, %v3966_v15, 0.0 }
 0x2a4   : > { %v3982_v23 = vcombine.high %v3981_v46, %v3981_v46  ;;  %v4076_v16 = vsel %vm4015_vm7, %v3957_v59, 0.0  ;;  %v4081_v13 = vsel %vm4015_vm7, %v3965_v19, 0.0  ;;  %v4087_v18 = vsel %vm4015_vm7, %v3974_v31, 0.0 }
 0x2a5   : > { %4024 = vadd.xlane.f32.xlu0 %v4023_v33  ;;  %4074 = vadd.xlane.f32.xlu1 %v4073_v10  ;;  %v4078_v17 = vadd.f32 %v4077_v8, %v4076_v16  ;;  %v4083_v57 = vadd.f32 %v4082_v5, %v4081_v13  ;;  %v4086_v27 = vsel %vm4015_vm7, %v3973_v3, 0.0  ;;  %v4091_v47 = vsel %vm4015_vm7, %v3981_v46, 0.0 }
 0x2a6   : > { %v4092_v45 = vsel %vm4015_vm7, %v3982_v23, 0.0  ;;  %v4088_v32 = vadd.f32 %v4087_v18, %v4086_v27  ;;  %v6579_v53 = vmov 0  }
 0x2a7   : > { %v4093_v40 = vadd.f32 %v4092_v45, %v4091_v47  ;;  %6293 = vset.pattern.permute.xlu1 %v6579_v53  ;;  %6294 = vset.pattern.permute.xlu0 %v6579_v53 }
 0x2a9   : > { %4039 = vadd.xlane.f32.xlu0 %v4038_v34  ;;  %4044 = vadd.xlane.f32.xlu1 %v4043_v1 }
 0x2ad   : > { %4049 = vadd.xlane.f32.xlu0 %v4048_v12  ;;  %4054 = vadd.xlane.f32.xlu1 %v4053_v43 }
 0x2b1   : > { %4079 = vadd.xlane.f32.xlu0 %v4078_v17  ;;  %4084 = vadd.xlane.f32.xlu1 %v4083_v57 }
 0x2b5   : > { %4089 = vadd.xlane.f32.xlu0 %v4088_v32  ;;  %4094 = vadd.xlane.f32.xlu1 %v4093_v40 }
 0x326   : > { %v4030_v62 = vpop.xlane.xlu1 %4029  ;;  %v4020_v20 = vpop.xlane.xlu0 %4019 }
 0x327   : > { %v4096_v50 = vsel %vm4015_vm7, %v4020_v20, 0.0  ;;  %v4110_v41 = vsel %vm4015_vm7, %v4030_v62, 0.0 }
 0x328   : > { %v4097_v26 = vrot.slane %v4096_v50, 4  ;;  %v4111_v2 = vrot.slane %v4110_v41, 4 }
 0x32a   : > { %v4098_v63 = vadd.f32 %v4097_v26, %v4096_v50  ;;  %v4035_v49 = vpop.xlane.xlu1 %4034  ;;  %v4060_v44 = vpop.xlane.xlu0 %4059  ;;  %v4112_v51 = vadd.f32 %v4111_v2, %v4110_v41 }
 0x32b   : > { %v4152_v9 = vsel %vm4015_vm7, %v4060_v44, 0.0  ;;  %v4117_v19 = vsel %vm4015_vm7, %v4035_v49, 0.0 }
 0x32c   : > { %v4153_v33 = vrot.slane %v4152_v9, 4  ;;  %v4099_v10 = vrot.slane %v4098_v63, 2  ;;  %v4113_v60 = vrot.slane %v4112_v51, 2  ;;  %v4118_v52 = vrot.slane %v4117_v19, 4 }
 0x32e   : > { %v4070_v29 = vpop.xlane.xlu0 %4069  ;;  %v4065_v22 = vpop.xlane.xlu1 %4064  ;;  %v4154_v55 = vadd.f32 %v4153_v33, %v4152_v9  ;;  %v4100_v58 = vadd.f32 %v4099_v10, %v4098_v63  ;;  %v4114_v23 = vadd.f32 %v4113_v60, %v4112_v51  ;;  %v4119_v16 = vadd.f32 %v4118_v52, %v4117_v19 }
 0x32f   : > { %v4166_v59 = vsel %vm4015_vm7, %v4070_v29, 0.0  ;;  %v4159_v1 = vsel %vm4015_vm7, %v4065_v22, 0.0 }
 0x330   : > { %v4167_v34 = vrot.slane %v4166_v59, 4  ;;  %v4155_v7 = vrot.slane %v4154_v55, 2  ;;  %v4101_v48 = vrot.slane %v4100_v58, 1  ;;  %v4160_v12 = vrot.slane %v4159_v1, 4 }
 0x331   : > { %v4115_v62 = vrot.slane %v4114_v23, 1  ;;  %v4120_v20 = vrot.slane %v4119_v16, 2 }
 0x332   : > { %v4025_v39 = vpop.xlane.xlu0 %4024  ;;  %v4075_v3 = vpop.xlane.xlu1 %4074  ;;  %v4168_v15 = vadd.f32 %v4167_v34, %v4166_v59  ;;  %v4156_v17 = vadd.f32 %v4155_v7, %v4154_v55  ;;  %v4102_v45 = vadd.f32 %v4101_v48, %v4100_v58  ;;  %v4161_v27 = vadd.f32 %v4160_v12, %v4159_v1 }
 0x333   : > { %v4103_v46 = vsel %vm4015_vm7, %v4025_v39, 0.0  ;;  %v4173_v8 = vsel %vm4015_vm7, %v4075_v3, 0.0  ;;  %v4116_v51 = vadd.f32 %v4115_v62, %v4114_v23  ;;  %v4121_v59 = vadd.f32 %v4120_v20, %v4119_v16 }
 0x334   : > { %v4104_v43 = vrot.slane %v4103_v46, 4  ;;  %v4169_v5 = vrot.slane %v4168_v15, 2  ;;  %v4174_v57 = vrot.slane %v4173_v8, 4  ;;  %v4157_v41 = vrot.slane %v4156_v17, 1 }
 0x335   : > { %v4208_v44 = vmul.f32 0.001953125, %v4102_v45  ;;  %v4162_v2 = vrot.slane %v4161_v27, 2  ;;  %v4210_v7 = vmul.f32 0.001953125, %v4116_v51  ;;  %v4122_v12 = vrot.slane %v4121_v59, 1 }
 0x336   : > { %v4040_v31 = vpop.xlane.xlu0 %4039  ;;  %v4105_v13 = vadd.f32 %v4104_v43, %v4103_v46  ;;  %v4170_v32 = vadd.f32 %v4169_v5, %v4168_v15  ;;  %v4175_v26 = vadd.f32 %v4174_v57, %v4173_v8  ;;  %v4158_v19 = vadd.f32 %v4157_v41, %v4156_v17 }
 0x337   : > { %v4124_v18 = vsel %vm4015_vm7, %v4040_v31, 0.0  ;;  %v8222_v34 = vsub.f32 %v8104_v11, %v4208_v44  ;;  %v4163_v60 = vadd.f32 %v4162_v2, %v4161_v27 }
 0x338   : > { %v4106_v47 = vrot.slane %v4105_v13, 2  ;;  %v4125_v40 = vrot.slane %v4124_v18, 4  ;;  %v4171_v9 = vrot.slane %v4170_v32, 1  ;;  %v4176_v55 = vrot.slane %v4175_v26, 2 }
 0x339   : > { %v4216_v43 = vmul.f32 0.001953125, %v4158_v19  ;;  %v4240_v11 = vmul.f32 %v8222_v34, %v8222_v34  ;;  %v4164_v17 = vrot.slane %v4163_v60, 1 }
 0x33a   : > { %v4050_v53 = vpop.xlane.xlu0 %4049  ;;  %v4107_v50 = vadd.f32 %v4106_v47, %v4105_v13  ;;  %v4126_v63 = vadd.f32 %v4125_v40, %v4124_v18  ;;  %v4172_v3 = vadd.f32 %v4171_v9, %v4170_v32  ;;  %v4177_v8 = vadd.f32 %v4176_v55, %v4175_v26 }
 0x33b   : > { %v4138_v49 = vsel %vm4015_vm7, %v4050_v53, 0.0  ;;  %v4278_v27 = vrot.slane %v4240_v11, %v8085_v54  ;;  %v8230_v32 = vsub.f32 %v8107_v61, %v4210_v7  ;;  %v4123_v40 = vadd.f32 %v4122_v12, %v4121_v59 }
 0x33c   : > { %v4108_v33 = vrot.slane %v4107_v50, 1  ;;  %v4127_v10 = vrot.slane %v4126_v63, 2  ;;  %v4139_v29 = vrot.slane %v4138_v49, 4  ;;  %v4218_v13 = vmul.f32 0.001953125, %v4172_v3 }
 0x33d   : > { %v8233_v53 = vsub.f32 %v8090_v42, %v4216_v43  ;;  %v4178_v62 = vrot.slane %v4177_v8, 1  ;;  %v4279_v41 = vcombine.high %v4278_v27, %v4278_v27  ;;  %v4432_v61 = vsel %vm4015_vm7, %v4278_v27, 0.0 }
 0x33e   : > { %v4080_v22 = vpop.xlane.xlu0 %4079  ;;  %v4140_v58 = vadd.f32 %v4139_v29, %v4138_v49  ;;  %v4128_v1 = vadd.f32 %v4127_v10, %v4126_v63  ;;  %v4109_v52 = vadd.f32 %v4108_v33, %v4107_v50  ;;  %v8236_v26 = vsub.f32 %v8095_v36, %v4218_v13 }
 0x33f   : > { %v4180_v39 = vsel %vm4015_vm7, %v4080_v22, 0.0  ;;  %v4165_v63 = vadd.f32 %v4164_v17, %v4163_v60  ;;  %v4433_v33 = vsel %vm4015_vm7, %v4279_v41, 0.0  ;;  %v4211_v42 = vmul.f32 0.001953125, %v4123_v40 }
 0x340   : > { %v4141_v15 = vrot.slane %v4140_v58, 2  ;;  %v4181_v48 = vrot.slane %v4180_v39, 4  ;;  %v4129_v31 = vrot.slane %v4128_v1, 1  ;;  %v4209_v57 = vmul.f32 0.001953125, %v4109_v52 }
 0x341   : > { %v4434_v10 = vadd.f32 %v4433_v33, %v4432_v61  ;;  %v4179_v22 = vadd.f32 %v4178_v62, %v4177_v8  ;;  %v4242_v36 = vmul.f32 %v8230_v32, %v8230_v32  ;;  %v4250_v55 = vmul.f32 %v8236_v26, %v8236_v26 }
 0x342   : > { %v4090_v46 = vpop.xlane.xlu0 %4089  ;;  %v4142_v5 = vadd.f32 %v4141_v15, %v4140_v58  ;;  %v4182_v23 = vadd.f32 %v4181_v48, %v4180_v39  ;;  %v4130_v20 = vadd.f32 %v4129_v31, %v4128_v1  ;;  %v8239_v49 = vsub.f32 %v8132_v38, %v4209_v57 }
 0x343   : > { %v4194_v16 = vsel %vm4015_vm7, %v4090_v46, 0.0  ;;  %4435 = vadd.xlane.f32.xlu0 %v4434_v10  ;;  %v4248_v38 = vmul.f32 %v8233_v53, %v8233_v53  ;;  %v4217_v1 = vmul.f32 0.001953125, %v4165_v63  ;;  %v4294_v3 = vrot.slane %v4242_v36, %v8085_v54 }
 0x344   : > { %v4143_v18 = vrot.slane %v4142_v5, 1  ;;  %v4183_v45 = vrot.slane %v4182_v23, 2  ;;  %v4195_v47 = vrot.slane %v4194_v16, 4  ;;  %v4212_v51 = vmul.f32 0.001953125, %v4130_v20 }
 0x345   : > { %v4241_v58 = vmul.f32 %v8239_v49, %v8239_v49  ;;  %v4342_v15 = vrot.slane %v4248_v38, %v8085_v54  ;;  %v4219_v7 = vmul.f32 0.001953125, %v4179_v22  ;;  %v4295_v48 = vcombine.high %v4294_v3, %v4294_v3 }
 0x346   : > { %v4184_v50 = vadd.f32 %v4183_v45, %v4182_v23  ;;  %v4196_v44 = vadd.f32 %v4195_v47, %v4194_v16  ;;  %v4144_v2 = vadd.f32 %v4143_v18, %v4142_v5  ;;  %v4358_v12 = vrot.slane %v4250_v55, %v8085_v54 }
 0x347   : > { %v4286_v46 = vrot.slane %v4241_v58, %v8085_v54  ;;  %v8256_v43 = vsub.f32 %v8115_v56, %v4211_v42  ;;  %v8259_v8 = vsub.f32 %v8122_v28, %v4212_v51  ;;  %v4343_v31 = vcombine.high %v4342_v15, %v4342_v15 }
 0x348   : > { %v4185_v9 = vrot.slane %v4184_v50, 1  ;;  %v4197_v29 = vrot.slane %v4196_v44, 2  ;;  %v4214_v39 = vmul.f32 0.001953125, %v4144_v2  ;;  %v8262_v23 = vsub.f32 %v8101_v6, %v4217_v1 }
 0x349   : > { %v4442_v16 = vsel %vm4015_vm7, %v4294_v3, 0.0  ;;  %v4443_v13 = vsel %vm4015_vm7, %v4295_v48, 0.0  ;;  %v4287_v18 = vcombine.high %v4286_v46, %v4286_v46  ;;  %v8273_v28 = vsub.f32 %v8139_v0, %v4219_v7  ;;  %v4045_v48 = vpop.xlane.xlu1 %4044 }
 0x34a   : > { %v4186_v59 = vadd.f32 %v4185_v9, %v4184_v50  ;;  %v4198_v19 = vadd.f32 %v4197_v29, %v4196_v44  ;;  %v8265_v11 = vsub.f32 %v8150_v25, %v4214_v39  ;;  %v4444_v57 = vadd.f32 %v4443_v13, %v4442_v16 }
 0x34b   : > { %v4473_v45 = vsel %vm4015_vm7, %v4343_v31, 0.0  ;;  %v4359_v6 = vcombine.high %v4358_v12, %v4358_v12  ;;  %v4472_v25 = vsel %vm4015_vm7, %v4342_v15, 0.0  ;;  %v4437_v27 = vsel %vm4015_vm7, %v4286_v46, 0.0 }
 0x34c   : > { %v4220_v60 = vmul.f32 0.001953125, %v4186_v59  ;;  %v4199_v52 = vrot.slane %v4198_v19, 1  ;;  %4445 = vadd.xlane.f32.xlu0 %v4444_v57  ;;  %v4438_v47 = vsel %vm4015_vm7, %v4287_v18, 0.0  ;;  %v4243_v0 = vmul.f32 %v8256_v43, %v8256_v43 }
 0x34d   : > { %v4439_v62 = vadd.f32 %v4438_v47, %v4437_v27  ;;  %v4246_v20 = vmul.f32 %v8265_v11, %v8265_v11  ;;  %v4474_v50 = vadd.f32 %v4473_v45, %v4472_v25  ;;  %v4249_v63 = vmul.f32 %v8262_v23, %v8262_v23  ;;  %v4055_v25 = vpop.xlane.xlu1 %4054 }
 0x34e   : > { %v4200_v5 = vadd.f32 %v4199_v52, %v4198_v19  ;;  %v8270_v17 = vsub.f32 %v8142_v30, %v4220_v60  ;;  %v4244_v30 = vmul.f32 %v8259_v8, %v8259_v8  ;;  %v4483_v2 = vsel %vm4015_vm7, %v4359_v6, 0.0 }
 0x34f   : > { %4440 = vadd.xlane.f32.xlu1 %v4439_v62  ;;  %v4326_v9 = vrot.slane %v4246_v20, %v8085_v54  ;;  %v4482_v61 = vsel %vm4015_vm7, %v4358_v12, 0.0  ;;  %v4350_v42 = vrot.slane %v4249_v63, %v8085_v54  ;;  %v4251_v51 = vmul.f32 %v8273_v28, %v8273_v28 }
 0x350   : > { %v4222_v56 = vmul.f32 0.001953125, %v4200_v5  ;;  %v4310_v41 = vrot.slane %v4244_v30, %v8085_v54  ;;  %v4252_v44 = vmul.f32 %v8270_v17, %v8270_v17  ;;  %4475 = vadd.xlane.f32.xlu0 %v4474_v50  ;;  %v4484_v36 = vadd.f32 %v4483_v2, %v4482_v61 }
 0x351   : > { %v4327_v22 = vcombine.high %v4326_v9, %v4326_v9  ;;  %v4351_v38 = vcombine.high %v4350_v42, %v4350_v42  ;;  %v4366_v46 = vrot.slane %v4251_v51, %v8085_v54  ;;  %v4462_v12 = vsel %vm4015_vm7, %v4326_v9, 0.0 }
 0x352   : > { %v8282_v40 = vsub.f32 %v8163_v37, %v4222_v56  ;;  %v4302_v37 = vrot.slane %v4243_v0, %v8085_v54  ;;  %v4311_v33 = vcombine.high %v4310_v41, %v4310_v41  ;;  %v4374_v10 = vrot.slane %v4252_v44, %v8085_v54 }
 0x353   : > { %v4452_v55 = vsel %vm4015_vm7, %v4310_v41, 0.0  ;;  %v4463_v52 = vsel %vm4015_vm7, %v4327_v22, 0.0  ;;  %v4478_v15 = vsel %vm4015_vm7, %v4351_v38, 0.0  ;;  %v4477_v5 = vsel %vm4015_vm7, %v4350_v42, 0.0  ;;  %v4085_v41 = vpop.xlane.xlu1 %4084 }
 0x354   : > { %v4303_v29 = vcombine.high %v4302_v37, %v4302_v37  ;;  %v4254_v59 = vmul.f32 %v8282_v40, %v8282_v40  ;;  %v4453_v19 = vsel %vm4015_vm7, %v4311_v33, 0.0  ;;  %v4447_v58 = vsel %vm4015_vm7, %v4302_v37, 0.0  ;;  %4485 = vadd.xlane.f32.xlu0 %v4484_v36 }
 0x355   : > { %v4454_v39 = vadd.f32 %v4453_v19, %v4452_v55  ;;  %v4375_v60 = vcombine.high %v4374_v10, %v4374_v10  ;;  %v4367_v31 = vcombine.high %v4366_v46, %v4366_v46  ;;  %v4464_v16 = vadd.f32 %v4463_v52, %v4462_v12  ;;  %v4913_v52 = vld [vmem:[%s8650_s3 + $0x2] sm:$0x3]  ;;  %v4915_v12 = vld [vmem:[%s8650_s3 + $0x6] sm:$0x3] }
 0x356   : > { %v4448_v1 = vsel %vm4015_vm7, %v4303_v29, 0.0  ;;  %v4390_v7 = vrot.slane %v4254_v59, %v8085_v54  ;;  %v4479_v13 = vadd.f32 %v4478_v15, %v4477_v5  ;;  %v4492_v45 = vsel %vm4015_vm7, %v4374_v10, 0.0  ;;  %v4912_v29 = vld [vmem:[%s8650_s3] sm:$0x3] }
 0x357   : > { %v4449_v3 = vadd.f32 %v4448_v1, %v4447_v58  ;;  %v4493_v56 = vsel %vm4015_vm7, %v4375_v60, 0.0  ;;  %v4488_v57 = vsel %vm4015_vm7, %v4367_v31, 0.0  ;;  %v4487_v6 = vsel %vm4015_vm7, %v4366_v46, 0.0  ;;  %v4095_v9 = vpop.xlane.xlu1 %4094 }
 0x358   : > { %4455 = vadd.xlane.f32.xlu0 %v4454_v39  ;;  %v4391_v18 = vcombine.high %v4390_v7, %v4390_v7  ;;  %v4494_v27 = vadd.f32 %v4493_v56, %v4492_v45  ;;  %v4489_v47 = vadd.f32 %v4488_v57, %v4487_v6  ;;  %v4131_v62 = vsel %vm4015_vm7, %v4045_v48, 0.0  ;;  %v4917_v56 = vld [vmem:[%s8650_s3 + $0xa] sm:$0x3] }
 0x359   : > { %4450 = vadd.xlane.f32.xlu1 %v4449_v3  ;;  %v4502_v0 = vsel %vm4015_vm7, %v4390_v7, 0.0  ;;  %v4132_v50 = vrot.slane %v4131_v62, 4  ;;  %v4145_v63 = vsel %vm4015_vm7, %v4055_v25, 0.0  ;;  %v4187_v37 = vsel %vm4015_vm7, %v4085_v41, 0.0 }
 0x35a   : > { %v4503_v30 = vsel %vm4015_vm7, %v4391_v18, 0.0  ;;  %v4146_v2 = vrot.slane %v4145_v63, 4  ;;  %v4188_v42 = vrot.slane %v4187_v37, 4  ;;  %v4201_v10 = vsel %vm4015_vm7, %v4095_v9, 0.0 }
 0x35b   : > { %v4504_v20 = vadd.f32 %v4503_v30, %v4502_v0  ;;  %v4133_v44 = vadd.f32 %v4132_v50, %v4131_v62  ;;  %v4202_v36 = vrot.slane %v4201_v10, 4  ;;  %v4921_v30 = vld [vmem:[%s8650_s3 + $0x12] sm:$0x3]  ;;  %v4923_v50 = vld [vmem:[%s8650_s3 + $0x16] sm:$0x3] }
 0x35c   : > { %4465 = vadd.xlane.f32.xlu0 %v4464_v16  ;;  %v4147_v33 = vadd.f32 %v4146_v2, %v4145_v63  ;;  %v4189_v59 = vadd.f32 %v4188_v42, %v4187_v37  ;;  %v4925_v2 = vld [vmem:[%s8650_s3 + $0x1a] sm:$0x3] }
 0x35d   : > { %4480 = vadd.xlane.f32.xlu1 %v4479_v13  ;;  %v4134_v61 = vrot.slane %v4133_v44, 2  ;;  %v4203_v58 = vadd.f32 %v4202_v36, %v4201_v10 }
 0x35e   : > { %v4148_v51 = vrot.slane %v4147_v33, 2  ;;  %v4190_v55 = vrot.slane %v4189_v59, 2 }
 0x35f   : > { %v4135_v22 = vadd.f32 %v4134_v61, %v4133_v44  ;;  %v4204_v60 = vrot.slane %v4203_v58, 2 }
 0x360   : > { %4495 = vadd.xlane.f32.xlu0 %v4494_v27  ;;  %v4149_v38 = vadd.f32 %v4148_v51, %v4147_v33  ;;  %v4191_v3 = vadd.f32 %v4190_v55, %v4189_v59 }
 0x361   : > { %4490 = vadd.xlane.f32.xlu1 %v4489_v47  ;;  %v4136_v19 = vrot.slane %v4135_v22, 1  ;;  %v4205_v48 = vadd.f32 %v4204_v60, %v4203_v58  ;;  %v4914_v58 = vld [vmem:[%s8650_s3 + $0x4] sm:$0x3]  ;;  %v4922_v60 = vld [vmem:[%s8650_s3 + $0x14] sm:$0x3] }
 0x362   : > { %v4150_v39 = vrot.slane %v4149_v38, 1  ;;  %v4192_v7 = vrot.slane %v4191_v3, 1 }
 0x363   : > { %v4137_v1 = vadd.f32 %v4136_v19, %v4135_v22  ;;  %v4206_v13 = vrot.slane %v4205_v48, 1 }
 0x364   : > { %4505 = vadd.xlane.f32.xlu0 %v4504_v20  ;;  %v4151_v46 = vadd.f32 %v4150_v39, %v4149_v38  ;;  %v4193_v16 = vadd.f32 %v4192_v7, %v4191_v3  ;;  %v4918_v39 = vld [vmem:[%s8650_s3 + $0xc] sm:$0x3]  ;;  %v4920_v3 = vld [vmem:[%s8650_s3 + $0x10] sm:$0x3] }
 0x365   : > { %v4213_v15 = vmul.f32 0.001953125, %v4137_v1  ;;  %v4207_v45 = vadd.f32 %v4206_v13, %v4205_v48  ;;  %v4916_v1 = vld [vmem:[%s8650_s3 + $0x8] sm:$0x3] }
 0x366   : > { %v4215_v31 = vmul.f32 0.001953125, %v4151_v46  ;;  %v4221_v18 = vmul.f32 0.001953125, %v4193_v16 }
 0x367   : > { %v8333_v5 = vsub.f32 %v8147_v4, %v4213_v15  ;;  %v4919_v4 = vld [vmem:[%s8650_s3 + $0xe] sm:$0x3]  ;;  %v4223_v27 = vmul.f32 0.001953125, %v4207_v45 }
 0x368   : > { %v8339_v57 = vsub.f32 %v8171_v24, %v4215_v31  ;;  %v8347_v25 = vsub.f32 %v8179_v35, %v4221_v18 }
 0x369   : > { %v4245_v6 = vmul.f32 %v8333_v5, %v8333_v5  ;;  %v8356_v62 = vsub.f32 %v8191_v21, %v4223_v27 }
 0x36a   : > { %v4247_v24 = vmul.f32 %v8339_v57, %v8339_v57  ;;  %v4253_v35 = vmul.f32 %v8347_v25, %v8347_v25 }
 0x36b   : > { %v4318_v47 = vrot.slane %v4245_v6, %v8085_v54  ;;  %v4255_v21 = vmul.f32 %v8356_v62, %v8356_v62 }
 0x36c   : > { %v4334_v20 = vrot.slane %v4247_v24, %v8085_v54  ;;  %v4382_v44 = vrot.slane %v4253_v35, %v8085_v54 }
 0x36d   : > { %v4319_v0 = vcombine.high %v4318_v47, %v4318_v47  ;;  %v4457_v37 = vsel %vm4015_vm7, %v4318_v47, 0.0  ;;  %v4398_v42 = vrot.slane %v4255_v21, %v8085_v54 }
 0x36e   : > { %v4335_v63 = vcombine.high %v4334_v20, %v4334_v20  ;;  %v4383_v33 = vcombine.high %v4382_v44, %v4382_v44  ;;  %v4467_v10 = vsel %vm4015_vm7, %v4334_v20, 0.0  ;;  %v4497_v59 = vsel %vm4015_vm7, %v4382_v44, 0.0 }
 0x36f   : > { %v4458_v41 = vsel %vm4015_vm7, %v4319_v0, 0.0  ;;  %v4399_v51 = vcombine.high %v4398_v42, %v4398_v42  ;;  %v4507_v38 = vsel %vm4015_vm7, %v4398_v42, 0.0 }
 0x370   : > { %v4459_v9 = vadd.f32 %v4458_v41, %v4457_v37  ;;  %v4468_v61 = vsel %vm4015_vm7, %v4335_v63, 0.0  ;;  %v4498_v22 = vsel %vm4015_vm7, %v4383_v33, 0.0 }
 0x371   : > { %v4499_v36 = vadd.f32 %v4498_v22, %v4497_v59  ;;  %v4508_v19 = vsel %vm4015_vm7, %v4399_v51, 0.0 }
 0x372   : > { %4930 = vperm.xlu1 %6293, %v4912_v29   ;;  %v4469_v29 = vadd.f32 %v4468_v61, %v4467_v10  ;;  %v4509_v55 = vadd.f32 %v4508_v19, %v4507_v38 }
 0x37a   : > { %4934 = vperm.xlu0 %6294, %v4913_v52   ;;  %v4924_v52 = vld [vmem:[%s8650_s3 + $0x18] sm:$0x3] }
 0x37e   : > { %4942 = vperm.xlu0 %6294, %v4915_v12  }
 0x382   : > { %4950 = vperm.xlu0 %6294, %v4917_v56  }
 0x386   : > { %4958 = vperm.xlu0 %6294, %v4919_v4  }
 0x38a   : > { %4966 = vperm.xlu0 %6294, %v4921_v30  }
 0x38e   : > { %4974 = vperm.xlu0 %6294, %v4923_v50  }
 0x392   : > { %4982 = vperm.xlu0 %6294, %v4925_v2  }
 0x396   : > { %4460 = vadd.xlane.f32.xlu1 %v4459_v9 }
 0x39a   : > { %4470 = vadd.xlane.f32.xlu1 %v4469_v29 }
 0x39e   : > { %4500 = vadd.xlane.f32.xlu1 %v4499_v36 }
 0x3a2   : > { %4510 = vadd.xlane.f32.xlu1 %v4509_v55 }
 0x3b3   : > { %4938 = vperm.xlu1 %6293, %v4914_v58  }
 0x3b7   : > { %4946 = vperm.xlu1 %6293, %v4916_v1  }
 0x3bb   : > { %4954 = vperm.xlu1 %6293, %v4918_v39  }
 0x3bf   : > { %4962 = vperm.xlu1 %6293, %v4920_v3  }
 0x3c3   : > { %4970 = vperm.xlu1 %6293, %v4922_v60  }
 0x3c7   : > { %4978 = vperm.xlu1 %6293, %v4924_v52  }
 0x3d0   : > { %v4436_v15 = vpop.xlane.xlu0 %4435 }
 0x3d1   : > { %v4512_v46 = vsel %vm4015_vm7, %v4436_v15, 0.0 }
 0x3d2   : > { %v4513_v7 = vrot.slane %v4512_v46, 4 }
 0x3d4   : > { %v4514_v48 = vadd.f32 %v4513_v7, %v4512_v46 }
 0x3d6   : > { %v4515_v12 = vrot.slane %v4514_v48, 2 }
 0x3d8   : > { %v4516_v31 = vadd.f32 %v4515_v12, %v4514_v48 }
 0x3d9   : > { %v4446_v16 = vpop.xlane.xlu0 %4445 }
 0x3da   : > { %v4526_v13 = vsel %vm4015_vm7, %v4446_v16, 0.0  ;;  %v4517_v56 = vrot.slane %v4516_v31, 1 }
 0x3db   : > { %v4527_v18 = vrot.slane %v4526_v13, 4 }
 0x3dc   : > { %v4441_v45 = vpop.xlane.xlu1 %4440  ;;  %v4518_v6 = vadd.f32 %v4517_v56, %v4516_v31 }
 0x3dd   : > { %v4528_v4 = vadd.f32 %v4527_v18, %v4526_v13  ;;  %v4476_v27 = vpop.xlane.xlu0 %4475  ;;  %v4519_v47 = vsel %vm4015_vm7, %v4441_v45, 0.0 }
 0x3de   : > { %v4568_v24 = vsel %vm4015_vm7, %v4476_v27, 0.0  ;;  %v4520_v30 = vrot.slane %v4519_v47, 4  ;;  %v4624_v35 = vmul.f32 0.001953125, %v4518_v6 }
 0x3df   : > { %v4529_v0 = vrot.slane %v4528_v4, 2  ;;  %v4569_v20 = vrot.slane %v4568_v24, 4 }
 0x3e0   : > { %v4521_v50 = vadd.f32 %v4520_v30, %v4519_v47  ;;  %v4640_v42 = vadd.f32 1e-05, %v4624_v35 }
 0x3e1   : > { %v4530_v41 = vadd.f32 %v4529_v0, %v4528_v4  ;;  %v4570_v63 = vadd.f32 %v4569_v20, %v4568_v24  ;;  %v4486_v44 = vpop.xlane.xlu0 %4485 }
 0x3e2   : > { %v4582_v21 = vsel %vm4015_vm7, %v4486_v44, 0.0  ;;  %v4522_v2 = vrot.slane %v4521_v50, 2  ;;  %6361 = vrsqrt.f32 %v4640_v42 }
 0x3e3   : > { %v4531_v37 = vrot.slane %v4530_v41, 1  ;;  %v4571_v9 = vrot.slane %v4570_v63, 2  ;;  %v4583_v61 = vrot.slane %v4582_v21, 4 }
 0x3e4   : > { %v4523_v10 = vadd.f32 %v4522_v2, %v4521_v50 }
 0x3e5   : > { %v4532_v22 = vadd.f32 %v4531_v37, %v4530_v41  ;;  %v4572_v51 = vadd.f32 %v4571_v9, %v4570_v63  ;;  %v4584_v59 = vadd.f32 %v4583_v61, %v4582_v21  ;;  %v4456_v36 = vpop.xlane.xlu0 %4455 }
 0x3e6   : > { %v4451_v33 = vpop.xlane.xlu1 %4450  ;;  %v4524_v38 = vrot.slane %v4523_v10, 1  ;;  %v4540_v55 = vsel %vm4015_vm7, %v4456_v36, 0.0 }
 0x3e7   : > { %v4533_v29 = vsel %vm4015_vm7, %v4451_v33, 0.0  ;;  %v4626_v58 = vmul.f32 0.001953125, %v4532_v22  ;;  %v4573_v1 = vrot.slane %v4572_v51, 1  ;;  %v4585_v39 = vrot.slane %v4584_v59, 2 }
 0x3e8   : > { %v4534_v19 = vrot.slane %v4533_v29, 4  ;;  %v4541_v3 = vrot.slane %v4540_v55, 4  ;;  %v4525_v52 = vadd.f32 %v4524_v38, %v4523_v10 }
 0x3e9   : > { %v4642_v7 = vadd.f32 1e-05, %v4626_v58  ;;  %v4574_v48 = vadd.f32 %v4573_v1, %v4572_v51  ;;  %v4586_v12 = vadd.f32 %v4585_v39, %v4584_v59  ;;  %v4466_v16 = vpop.xlane.xlu0 %4465 }
 0x3ea   : > { %v4481_v60 = vpop.xlane.xlu1 %4480  ;;  %v4535_v15 = vadd.f32 %v4534_v19, %v4533_v29  ;;  %v4542_v31 = vadd.f32 %v4541_v3, %v4540_v55  ;;  %v4554_v56 = vsel %vm4015_vm7, %v4466_v16, 0.0  ;;  %v4625_v35 = vmul.f32 0.001953125, %v4525_v52  ;;  %v4672_v3 = vld [vmem:[%s8649_s2] sm:$0x3] }
 0x3eb   : > { %v4575_v46 = vsel %vm4015_vm7, %v4481_v60, 0.0  ;;  %6363 = vrsqrt.f32 %v4642_v7  ;;  %v4632_v45 = vmul.f32 0.001953125, %v4574_v48  ;;  %v4587_v6 = vrot.slane %v4586_v12, 1 }
 0x3ec   : > { %v4536_v13 = vrot.slane %v4535_v15, 2  ;;  %v4576_v18 = vrot.slane %v4575_v46, 4  ;;  %v4543_v4 = vrot.slane %v4542_v31, 2  ;;  %v4555_v24 = vrot.slane %v4554_v56, 4  ;;  %v6362_v38 = vpop.eup %6361 }
 0x3ed   : > { %v4648_v0 = vadd.f32 1e-05, %v4632_v45  ;;  %v4588_v20 = vadd.f32 %v4587_v6, %v4586_v12  ;;  %v4496_v41 = vpop.xlane.xlu0 %4495  ;;  %v4641_v51 = vadd.f32 1e-05, %v4625_v35  ;;  %v4674_v12 = vld [vmem:[%s8649_s2 + $0x4] sm:$0x3] }
 0x3ee   : > { %v4491_v27 = vpop.xlane.xlu1 %4490  ;;  %v4537_v47 = vadd.f32 %v4536_v13, %v4535_v15  ;;  %v4577_v30 = vadd.f32 %v4576_v18, %v4575_v46  ;;  %v4544_v50 = vadd.f32 %v4543_v4, %v4542_v31  ;;  %v4556_v44 = vadd.f32 %v4555_v24, %v4554_v56 }
 0x3ef   : > { %v4589_v2 = vsel %vm4015_vm7, %v4491_v27, 0.0  ;;  %6365 = vrsqrt.f32 %v4648_v0  ;;  %v4634_v37 = vmul.f32 0.001953125, %v4588_v20  ;;  %v4596_v61 = vsel %vm4015_vm7, %v4496_v41, 0.0 }
 0x3f0   : > { %v4538_v63 = vrot.slane %v4537_v47, 1  ;;  %v4578_v21 = vrot.slane %v4577_v30, 2  ;;  %v4545_v9 = vrot.slane %v4544_v50, 1  ;;  %v4557_v42 = vrot.slane %v4556_v44, 2 }
 0x3f1   : > { %v4597_v29 = vrot.slane %v4596_v61, 4  ;;  %v4650_v22 = vadd.f32 1e-05, %v4634_v37  ;;  %v4590_v36 = vrot.slane %v4589_v2, 4  ;;  %v4506_v19 = vpop.xlane.xlu0 %4505  ;;  %v4688_v18 = vmul.f32 %v6362_v38, %v4672_v3  ;;  %v4673_v38 = vld [vmem:[%s8649_s2 + $0x2] sm:$0x3] }
 0x3f2   : > { %v4539_v33 = vadd.f32 %v4538_v63, %v4537_v47  ;;  %v4579_v10 = vadd.f32 %v4578_v21, %v4577_v30  ;;  %v4546_v59 = vadd.f32 %v4545_v9, %v4544_v50  ;;  %v4558_v58 = vadd.f32 %v4557_v42, %v4556_v44  ;;  %v4680_v30 = vld [vmem:[%s8649_s2 + $0x10] sm:$0x3] }
 0x3f3   : > { %v4598_v39 = vadd.f32 %v4597_v29, %v4596_v61  ;;  %6367 = vrsqrt.f32 %v4650_v22  ;;  %v4591_v60 = vadd.f32 %v4590_v36, %v4589_v2  ;;  %v4610_v52 = vsel %vm4015_vm7, %v4506_v19, 0.0  ;;  %4706 = vperm.xlu0 %6294, %v4688_v18   ;;  %v4682_v61 = vld [vmem:[%s8649_s2 + $0x14] sm:$0x3] }
 0x3f4   : > { %v4627_v55 = vmul.f32 0.001953125, %v4539_v33  ;;  %v4580_v1 = vrot.slane %v4579_v10, 1  ;;  %v4628_v15 = vmul.f32 0.001953125, %v4546_v59  ;;  %v4559_v46 = vrot.slane %v4558_v58, 1 }
 0x3f5   : > { %v4599_v48 = vrot.slane %v4598_v39, 2  ;;  %v6364_v31 = vpop.eup %6363  ;;  %v4592_v13 = vrot.slane %v4591_v60, 2  ;;  %v4611_v56 = vrot.slane %v4610_v52, 4  ;;  %6369 = vrsqrt.f32 %v4641_v51 }
 0x3f6   : > { %v4581_v7 = vadd.f32 %v4580_v1, %v4579_v10  ;;  %v4643_v16 = vadd.f32 1e-05, %v4627_v55  ;;  %v4560_v45 = vadd.f32 %v4559_v46, %v4558_v58  ;;  %v4690_v24 = vmul.f32 %v6364_v31, %v4674_v12  ;;  %v4681_v1 = vld [vmem:[%s8649_s2 + $0x12] sm:$0x3]  ;;  %v4676_v12 = vld [vmem:[%s8649_s2 + $0x8] sm:$0x3] }
 0x3f7   : > { %v4600_v4 = vadd.f32 %v4599_v48, %v4598_v39  ;;  %v4593_v27 = vadd.f32 %v4592_v13, %v4591_v60  ;;  %v4612_v47 = vadd.f32 %v4611_v56, %v4610_v52  ;;  %v4644_v50 = vadd.f32 1e-05, %v4628_v15  ;;  %v4675_v52 = vld [vmem:[%s8649_s2 + $0x6] sm:$0x3]  ;;  %v4683_v31 = vld [vmem:[%s8649_s2 + $0x16] sm:$0x3] }
 0x3f8   : > { %v4633_v6 = vmul.f32 0.001953125, %v4581_v7  ;;  %6371 = vrsqrt.f32 %v4643_v16  ;;  %4714 = vperm.xlu1 %6293, %v4690_v24   ;;  %v4630_v44 = vmul.f32 0.001953125, %v4560_v45  ;;  %v4678_v45 = vld [vmem:[%s8649_s2 + $0xc] sm:$0x3] }
 0x3f9   : > { %v4601_v20 = vrot.slane %v4600_v4, 1  ;;  %v6366_v35 = vpop.eup %6365  ;;  %v4594_v41 = vrot.slane %v4593_v27, 1  ;;  %v4613_v63 = vrot.slane %v4612_v47, 2 }
 0x3fa   : > { %v4649_v0 = vadd.f32 1e-05, %v4633_v6  ;;  %v4696_v2 = vmul.f32 %v6366_v35, %v4680_v30  ;;  %v4646_v29 = vadd.f32 1e-05, %v4630_v44  ;;  %v4686_v30 = vld [vmem:[%s8649_s2 + $0x1c] sm:$0x3] }
 0x3fb   : > { %v4602_v21 = vadd.f32 %v4601_v20, %v4600_v4  ;;  %v4595_v37 = vadd.f32 %v4594_v41, %v4593_v27  ;;  %v4614_v9 = vadd.f32 %v4613_v63, %v4612_v47  ;;  %v4684_v27 = vld [vmem:[%s8649_s2 + $0x18] sm:$0x3]  ;;  %v8445_v20 = vpop.permute.xlu1 %4930 }
 0x3fc   : > { %6373 = vrsqrt.f32 %v4649_v0  ;;  %4738 = vperm.xlu1 %6293, %v4696_v2  }
 0x3fd   : > { %v6368_v33 = vpop.eup %6367  ;;  %v4635_v42 = vmul.f32 0.001953125, %v4595_v37  ;;  %v4615_v10 = vrot.slane %v4614_v9, 1  ;;  %6375 = vrsqrt.f32 %v4644_v50  ;;  %v4636_v22 = vmul.f32 0.001953125, %v4602_v21 }
 0x3fe   : > { %v4698_v51 = vmul.f32 %v6368_v33, %v4682_v61 }
 0x3ff   : > { %v4651_v59 = vadd.f32 1e-05, %v4635_v42  ;;  %v4616_v36 = vadd.f32 %v4615_v10, %v4614_v9  ;;  %v6370_v19 = vpop.eup %6369  ;;  %v4652_v55 = vadd.f32 1e-05, %v4636_v22 }
 0x400   : > { %4746 = vperm.xlu1 %6293, %v4698_v51   ;;  %v4689_v3 = vmul.f32 %v6370_v19, %v4673_v38 }
 0x401   : > { %6377 = vrsqrt.f32 %v4651_v59  ;;  %v4638_v58 = vmul.f32 0.001953125, %v4616_v36 }
 0x402   : > { %6379 = vrsqrt.f32 %v4646_v29  ;;  %v6372_v39 = vpop.eup %6371 }
 0x403   : > { %6381 = vrsqrt.f32 %v4652_v55  ;;  %v4654_v46 = vadd.f32 1e-05, %v4638_v58  ;;  %v4691_v7 = vmul.f32 %v6372_v39, %v4675_v52 }
 0x404   : > { %4710 = vperm.xlu1 %6293, %v4689_v3  }
 0x405   : > { %6383 = vrsqrt.f32 %v4654_v46 }
 0x406   : > { %v6374_v60 = vpop.eup %6373 }
 0x407   : > { %v4697_v15 = vmul.f32 %v6374_v60, %v4681_v1  ;;  %v6376_v48 = vpop.eup %6375 }
 0x408   : > { %4718 = vperm.xlu1 %6293, %v4691_v7   ;;  %v4692_v13 = vmul.f32 %v6376_v48, %v4676_v12 }
 0x409   : > { %4742 = vperm.xlu0 %6294, %v4697_v15  }
 0x40b   : > { %v6378_v16 = vpop.eup %6377 }
 0x40c   : > { %v6380_v56 = vpop.eup %6379  ;;  %v4699_v18 = vmul.f32 %v6378_v16, %v4683_v31  ;;  %4722 = vperm.xlu1 %6293, %v4692_v13  }
 0x40d   : > { %v4694_v6 = vmul.f32 %v6380_v56, %v4678_v45  ;;  %v6382_v4 = vpop.eup %6381 }
 0x40e   : > { %4750 = vperm.xlu0 %6294, %v4699_v18   ;;  %v4700_v47 = vmul.f32 %v6382_v4, %v4684_v27  ;;  %v4677_v4 = vld [vmem:[%s8649_s2 + $0xa] sm:$0x3] }
 0x40f   : > { %v6384_v24 = vpop.eup %6383 }
 0x410   : > { %4730 = vperm.xlu1 %6293, %v4694_v6   ;;  %v4702_v0 = vmul.f32 %v6384_v24, %v4686_v30  ;;  %v4679_v30 = vld [vmem:[%s8649_s2 + $0xe] sm:$0x3] }
 0x414   : > { %4754 = vperm.xlu1 %6293, %v4700_v47  }
 0x418   : > { %4762 = vperm.xlu1 %6293, %v4702_v0  }
 0x423   : > { %v4461_v35 = vpop.xlane.xlu1 %4460 }
 0x424   : > { %v4547_v50 = vsel %vm4015_vm7, %v4461_v35, 0.0 }
 0x425   : > { %v4548_v41 = vrot.slane %v4547_v50, 4 }
 0x427   : > { %v4549_v63 = vadd.f32 %v4548_v41, %v4547_v50  ;;  %v4471_v44 = vpop.xlane.xlu1 %4470  ;;  %v4685_v50 = vld [vmem:[%s8649_s2 + $0x1a] sm:$0x3] }
 0x428   : > { %v4561_v21 = vsel %vm4015_vm7, %v4471_v44, 0.0 }
 0x429   : > { %v4550_v2 = vrot.slane %v4549_v63, 2  ;;  %v4562_v37 = vrot.slane %v4561_v21, 4 }
 0x42b   : > { %v4551_v9 = vadd.f32 %v4550_v2, %v4549_v63  ;;  %v4563_v61 = vadd.f32 %v4562_v37, %v4561_v21  ;;  %v4501_v33 = vpop.xlane.xlu1 %4500  ;;  %v4926_v63 = vld [vmem:[%s8650_s3 + $0x1c] sm:$0x3]  ;;  %v4687_v21 = vld [vmem:[%s8649_s2 + $0x1e] sm:$0x3] }
 0x42c   : > { %v4603_v42 = vsel %vm4015_vm7, %v4501_v33, 0.0 }
 0x42d   : > { %v4552_v10 = vrot.slane %v4551_v9, 1  ;;  %v4564_v29 = vrot.slane %v4563_v61, 2  ;;  %v4604_v22 = vrot.slane %v4603_v42, 4 }
 0x42f   : > { %v4553_v51 = vadd.f32 %v4552_v10, %v4551_v9  ;;  %v4565_v59 = vadd.f32 %v4564_v29, %v4563_v61  ;;  %v4605_v36 = vadd.f32 %v4604_v22, %v4603_v42  ;;  %v4511_v19 = vpop.xlane.xlu1 %4510  ;;  %v4927_v9 = vld [vmem:[%s8650_s3 + $0x1e] sm:$0x3]  ;;  %v4935_v61 = vpop.permute.xlu0 %4934 }
 0x430   : > { %v4617_v38 = vsel %vm4015_vm7, %v4511_v19, 0.0 }
 0x431   : > { %v4629_v55 = vmul.f32 0.001953125, %v4553_v51  ;;  %v4566_v58 = vrot.slane %v4565_v59, 1  ;;  %v4606_v1 = vrot.slane %v4605_v36, 2  ;;  %v4618_v39 = vrot.slane %v4617_v38, 4 }
 0x433   : > { %v4645_v3 = vadd.f32 1e-05, %v4629_v55  ;;  %v4567_v60 = vadd.f32 %v4566_v58, %v4565_v59  ;;  %v4607_v52 = vadd.f32 %v4606_v1, %v4605_v36  ;;  %v4619_v15 = vadd.f32 %v4618_v39, %v4617_v38  ;;  %v4943_v33 = vpop.permute.xlu0 %4942  ;;  %v4939_v42 = vpop.permute.xlu1 %4938 }
 0x434   : > { %v6580_v38 = vmov 269488144  }
 0x435   : > { %6385 = vrsqrt.f32 %v4645_v3  ;;  %v4631_v46 = vmul.f32 0.001953125, %v4567_v60  ;;  %v4608_v7 = vrot.slane %v4607_v52, 1  ;;  %v4620_v48 = vrot.slane %v4619_v15, 2 }
 0x436   : > { %v4769_v55 = vunpack.c.l.s4 %v6580_v38 }
 0x437   : > { %v4647_v12 = vadd.f32 1e-05, %v4631_v46  ;;  %v4609_v31 = vadd.f32 %v4608_v7, %v4607_v52  ;;  %v4621_v16 = vadd.f32 %v4620_v48, %v4619_v15  ;;  %v8469_v10 = vpop.permute.xlu0 %4950  ;;  %v8471_v29 = vpop.permute.xlu1 %4946 }
 0x438   : > { %v4770_v39 = vunpack.c.0.s8 %v4769_v55 }
 0x439   : > { %6387 = vrsqrt.f32 %v4647_v12  ;;  %v4637_v13 = vmul.f32 0.001953125, %v4609_v31  ;;  %v4622_v56 = vrot.slane %v4621_v16, 1 }
 0x43a   : > { %v8484_v60 = vsub.s32 %v4770_v39, %v8082_v14 }
 0x43b   : > { %v4653_v18 = vadd.f32 1e-05, %v4637_v13  ;;  %v4623_v45 = vadd.f32 %v4622_v56, %v4621_v16  ;;  %v8473_v22 = vpop.permute.xlu0 %4958  ;;  %v8475_v51 = vpop.permute.xlu1 %4954 }
 0x43c   : > { %v4998_v31 = vrot.slane %v8445_v20, %v8484_v60 }
 0x43d   : > { %6389 = vrsqrt.f32 %v4653_v18  ;;  %v4639_v6 = vmul.f32 0.001953125, %v4623_v45  ;;  %v5012_v18 = vrot.slane %v4939_v42, %v8484_v60 }
 0x43f   : > { %v6386_v27 = vpop.eup %6385  ;;  %v4655_v47 = vadd.f32 1e-05, %v4639_v6  ;;  %v4967_v59 = vpop.permute.xlu0 %4966 }
 0x440   : > { %v4693_v24 = vmul.f32 %v6386_v27, %v4677_v4  ;;  %v4963_v36 = vpop.permute.xlu1 %4962 }
 0x441   : > { %6391 = vrsqrt.f32 %v4655_v47 }
 0x442   : > { %4726 = vperm.xlu1 %6293, %v4693_v24  }
 0x443   : > { %v6388_v0 = vpop.eup %6387  ;;  %v8477_v19 = vpop.permute.xlu0 %4974 }
 0x444   : > { %v4695_v35 = vmul.f32 %v6388_v0, %v4679_v30  ;;  %v4971_v58 = vpop.permute.xlu1 %4970 }
 0x445   : > { %v5068_v30 = vrot.slane %v4971_v58, %v8484_v60 }
 0x446   : > { %4734 = vperm.xlu1 %6293, %v4695_v35  }
 0x447   : > { %v6390_v41 = vpop.eup %6389  ;;  %v8479_v1 = vpop.permute.xlu0 %4982 }
 0x448   : > { %v4701_v44 = vmul.f32 %v6390_v41, %v4685_v50  ;;  %v8481_v3 = vpop.permute.xlu1 %4978 }
 0x44a   : > { %4986 = vperm.xlu1 %6293, %v4926_v63   ;;  %4758 = vperm.xlu0 %6294, %v4701_v44  }
 0x44b   : > { %v6392_v2 = vpop.eup %6391 }
 0x44c   : > { %v4703_v37 = vmul.f32 %v6392_v2, %v4687_v21  ;;  %v5019_v21 = vrot.slane %v4943_v33, %v8484_v60  ;;  %v5075_v33 = vrot.slane %v8477_v19, %v8484_v60 }
 0x44e   : > { %4766 = vperm.xlu0 %6294, %v4703_v37  }
 0x452   : > { %4990 = vperm.xlu0 %6294, %v4927_v9  }
 0x472   : > { %v4707_v52 = vpop.permute.xlu0 %4706 }
 0x473   : > { %v4774_v15 = vrot.slane %v4707_v52, %v8484_v60 }
 0x475   : > { %v4896_v48 = vmul.f32 %v4774_v15, %v8222_v34  ;;  %v5054_v34 = vrot.slane %v4963_v36, %v8484_v60 }
 0x477   : > { %v4715_v46 = vpop.permute.xlu1 %4714  ;;  %v8493_v56 = vadd.f32 %v4998_v31, %v4896_v48 }
 0x478   : > { %v4788_v7 = vrot.slane %v4715_v46, %v8484_v60 }
 0x479   : > { %v5886_v27 = vmul.f32 -1.442695, %v8493_v56 }
 0x47a   : > { %v4898_v13 = vmul.f32 %v4788_v7, %v8230_v32  ;;  %v5005_v32 = vrot.slane %v4935_v61, %v8484_v60 }
 0x47b   : > { %v4739_v12 = vpop.permute.xlu1 %4738  ;;  %6393 = vpow2.f32 %v5886_v27 }
 0x47c   : > { %v4830_v16 = vrot.slane %v4739_v12, %v8484_v60  ;;  %v8498_v4 = vadd.f32 %v5012_v18, %v4898_v13 }
 0x47e   : > { %v4904_v6 = vmul.f32 %v4830_v16, %v8233_v53  ;;  %v5061_v53 = vrot.slane %v4967_v59, %v8484_v60  ;;  %v5888_v50 = vmul.f32 -1.442695, %v8498_v4 }
 0x47f   : > { %v4747_v14 = vpop.permute.xlu1 %4746 }
 0x480   : > { %v4844_v45 = vrot.slane %v4747_v14, %v8484_v60  ;;  %v8506_v0 = vadd.f32 %v5054_v34, %v4904_v6  ;;  %6395 = vpow2.f32 %v5888_v50 }
 0x482   : > { %v4906_v20 = vmul.f32 %v4844_v45, %v8236_v26  ;;  %v5894_v61 = vmul.f32 -1.442695, %v8506_v0 }
 0x483   : > { %v4711_v47 = vpop.permute.xlu1 %4710 }
 0x484   : > { %v4781_v24 = vrot.slane %v4711_v47, %v8484_v60  ;;  %v8512_v26 = vadd.f32 %v5068_v30, %v4906_v20 }
 0x485   : > { %v6394_v15 = vpop.eup %6393 }
 0x486   : > { %v4897_v41 = vmul.f32 %v4781_v24, %v8239_v49  ;;  %v5896_v36 = vmul.f32 -1.442695, %v8512_v26  ;;  %v5184_v48 = vadd.f32 1.0, %v6394_v15 }
 0x487   : > { %v4719_v44 = vpop.permute.xlu1 %4718 }
 0x488   : > { %v4743_v35 = vpop.permute.xlu0 %4742  ;;  %v5121_v2 = vadd.f32 %v5005_v32, %v4897_v41  ;;  %v4795_v9 = vrot.slane %v4719_v44, %v8484_v60 }
 0x489   : > { %v4837_v63 = vrot.slane %v4743_v35, %v8484_v60 }
 0x48a   : > { %v5887_v42 = vmul.f32 -1.442695, %v5121_v2  ;;  %v4899_v49 = vmul.f32 %v4795_v9, %v8256_v43  ;;  %v6396_v7 = vpop.eup %6395 }
 0x48b   : > { %v4905_v37 = vmul.f32 %v4837_v63, %v8262_v23  ;;  %v5186_v16 = vadd.f32 1.0, %v6396_v7  ;;  %v4723_v41 = vpop.permute.xlu1 %4722 }
 0x48c   : > { %6397 = vpow2.f32 %v5887_v42  ;;  %v5123_v55 = vadd.f32 %v5019_v21, %v4899_v49 }
 0x48d   : > { %v5129_v59 = vadd.f32 %v5061_v53, %v4905_v37  ;;  %v4751_v58 = vpop.permute.xlu0 %4750  ;;  %6399 = vpow2.f32 %v5894_v61 }
 0x48e   : > { %v4851_v23 = vrot.slane %v4751_v58, %v8484_v60  ;;  %v5889_v39 = vmul.f32 -1.442695, %v5123_v55 }
 0x48f   : > { %v5895_v38 = vmul.f32 -1.442695, %v5129_v59  ;;  %v4731_v58 = vpop.permute.xlu1 %4730 }
 0x490   : > { %v4907_v52 = vmul.f32 %v4851_v23, %v8273_v28  ;;  %v4816_v7 = vrot.slane %v4731_v58, %v8484_v60 }
 0x491   : > { %6401 = vpow2.f32 %v5895_v38 }
 0x492   : > { %6403 = vpow2.f32 %v5896_v36  ;;  %v5131_v43 = vadd.f32 %v5075_v33, %v4907_v52 }
 0x493   : > { %6405 = vpow2.f32 %v5889_v39  ;;  %v4755_v52 = vpop.permute.xlu1 %4754 }
 0x494   : > { %v5897_v46 = vmul.f32 -1.442695, %v5131_v43 }
 0x496   : > { %v6398_v12 = vpop.eup %6397  ;;  %6407 = vpow2.f32 %v5897_v46 }
 0x497   : > { %v6400_v31 = vpop.eup %6399  ;;  %v5185_v13 = vadd.f32 1.0, %v6398_v12  ;;  %6409 = vrcp.f32 %v5184_v48  ;;  %v5026_v48 = vrot.slane %v8471_v29, %v8484_v60  ;;  %v5033_v29 = vrot.slane %v8469_v10, %v8484_v60 }
 0x498   : > { %v5192_v6 = vadd.f32 1.0, %v6400_v31  ;;  %v4902_v31 = vmul.f32 %v4816_v7, %v8265_v11 }
 0x499   : > { %6411 = vrcp.f32 %v5185_v13  ;;  %v5040_v13 = vrot.slane %v8475_v51, %v8484_v60 }
 0x49a   : > { %6413 = vrcp.f32 %v5186_v16  ;;  %v4763_v16 = vpop.permute.xlu1 %4762 }
 0x49b   : > { %v6402_v19 = vpop.eup %6401  ;;  %v4872_v51 = vrot.slane %v4763_v16, %v8484_v60 }
 0x49c   : > { %v6404_v14 = vpop.eup %6403  ;;  %v5193_v18 = vadd.f32 1.0, %v6402_v19 }
 0x49d   : > { %v6406_v45 = vpop.eup %6405  ;;  %v5194_v34 = vadd.f32 1.0, %v6404_v14  ;;  %v8552_v14 = vadd.f32 %v5040_v13, %v4902_v31 }
 0x49e   : > { %v5187_v28 = vadd.f32 1.0, %v6406_v45  ;;  %6415 = vrcp.f32 %v5193_v18 }
 0x4a0   : > { %6417 = vrcp.f32 %v5187_v28  ;;  %v6408_v27 = vpop.eup %6407 }
 0x4a1   : > { %6419 = vrcp.f32 %v5192_v6  ;;  %v5195_v20 = vadd.f32 1.0, %v6408_v27  ;;  %v6410_v47 = vpop.eup %6409  ;;  %v5892_v6 = vmul.f32 -1.442695, %v8552_v14  ;;  %v5082_v27 = vrot.slane %v8481_v3, %v8484_v60 }
 0x4a2   : > { %6421 = vrcp.f32 %v5194_v34  ;;  %v5232_v53 = vmul.f32 %v6410_v47, %v8493_v56 }
 0x4a3   : > { %v6412_v32 = vpop.eup %6411  ;;  %6423 = vrcp.f32 %v5195_v20 }
 0x4a4   : > { %v5233_v24 = vmul.f32 %v6412_v32, %v5121_v2  ;;  %v6414_v30 = vpop.eup %6413  ;;  %v5047_v32 = vrot.slane %v8473_v22, %v8484_v60 }
 0x4a5   : > { %v5234_v63 = vmul.f32 %v6414_v30, %v8498_v4 }
 0x4a6   : > { %v5264_v44 = vcombine.low %v5232_v53, %v5233_v24 }
 0x4a8   : > { %v6416_v35 = vpop.eup %6415  ;;  %v5272_v2 = vrot.slane %v5264_v44, %v8085_v54 }
 0x4a9   : > { %v5241_v61 = vmul.f32 %v6416_v35, %v5129_v59  ;;  %v4802_v59 = vrot.slane %v4723_v41, %v8484_v60  ;;  %v5089_v41 = vrot.slane %v8479_v1, %v8484_v60 }
 0x4aa   : > { %v6418_v50 = vpop.eup %6417 }
 0x4ab   : > { %v5235_v21 = vmul.f32 %v6418_v50, %v5123_v55  ;;  %v6420_v37 = vpop.eup %6419 }
 0x4ac   : > { %v6422_v9 = vpop.eup %6421  ;;  %v5240_v49 = vmul.f32 %v6420_v37, %v8506_v0 }
 0x4ad   : > { %v5265_v42 = vcombine.low %v5234_v63, %v5235_v21  ;;  %v6424_v56 = vpop.eup %6423  ;;  %v5242_v38 = vmul.f32 %v6422_v9, %v8512_v26 }
 0x4ae   : > { %v5300_v33 = vcombine.low %v5240_v49, %v5241_v61  ;;  %v5243_v55 = vmul.f32 %v6424_v56, %v5131_v43  ;;  %v4900_v43 = vmul.f32 %v4802_v59, %v8259_v8  ;;  %v4858_v8 = vrot.slane %v4755_v52, %v8484_v60 }
 0x4af   : > { %v5279_v36 = vrot.slane %v5265_v42, %v8085_v54 }
 0x4b0   : > { %v5301_v0 = vcombine.low %v5242_v38, %v5243_v55  ;;  %v5308_v39 = vrot.slane %v5300_v33, %v8085_v54  ;;  %v8546_v12 = vadd.f32 %v5026_v48, %v4900_v43  ;;  %v4908_v11 = vmul.f32 %v4858_v8, %v8270_v17 }
 0x4b1   : > { %v5280_v4 = vcombine.low %v5272_v2, %v5279_v36  ;;  %v5281_v23 = vcombine.high %v5272_v2, %v5279_v36 }
 0x4b2   : > { %v5315_v26 = vrot.slane %v5301_v0, %v8085_v54  ;;  %v5890_v19 = vmul.f32 -1.442695, %v8546_v12  ;;  %v8567_v10 = vadd.f32 %v5082_v27, %v4908_v11 }
 0x4b3   : > { %5344 = vst [vmem:[%s8533_s12] sm:$0xff] %v5280_v4  ;;  %5345 = vst [vmem:[%s8533_s12 + $0x8] sm:$0xff] %v5281_v23 }
 0x4b4   : > { %v5316_v15 = vcombine.low %v5308_v39, %v5315_v26  ;;  %v5317_v46 = vcombine.high %v5308_v39, %v5315_v26  ;;  %6425 = vpow2.f32 %v5890_v19  ;;  %v5898_v22 = vmul.f32 -1.442695, %v8567_v10 }
 0x4b5   : > { %6427 = vpow2.f32 %v5892_v6 }
 0x4b6   : > { %5348 = vst [vmem:[%s8533_s12 + $0x20] sm:$0xff] %v5316_v15  ;;  %5349 = vst [vmem:[%s8533_s12 + $0x28] sm:$0xff] %v5317_v46 }
 0x4c1   : > { %v4727_v18 = vpop.permute.xlu1 %4726 }
 0x4c2   : > { %v4809_v45 = vrot.slane %v4727_v18, %v8484_v60 }
 0x4c4   : > { %v4901_v28 = vmul.f32 %v4809_v45, %v8333_v5  ;;  %v4910_v5 = vmul.f32 %v4872_v51, %v8282_v40  ;;  %v6426_v40 = vpop.eup %6425 }
 0x4c5   : > { %v4735_v34 = vpop.permute.xlu1 %4734  ;;  %v5188_v49 = vadd.f32 1.0, %v6426_v40  ;;  %v6428_v2 = vpop.eup %6427 }
 0x4c6   : > { %v5125_v20 = vadd.f32 %v5033_v29, %v4901_v28  ;;  %v4823_v47 = vrot.slane %v4735_v34, %v8484_v60  ;;  %v5190_v58 = vadd.f32 1.0, %v6428_v2 }
 0x4c8   : > { %v5891_v24 = vmul.f32 -1.442695, %v5125_v20  ;;  %v4903_v17 = vmul.f32 %v4823_v47, %v8339_v57 }
 0x4c9   : > { %v4759_v30 = vpop.permute.xlu0 %4758  ;;  %v4987_v35 = vpop.permute.xlu1 %4986 }
 0x4ca   : > { %6429 = vpow2.f32 %v5891_v24  ;;  %v5127_v53 = vadd.f32 %v5047_v32, %v4903_v17  ;;  %v4865_v3 = vrot.slane %v4759_v30, %v8484_v60  ;;  %v5096_v50 = vrot.slane %v4987_v35, %v8484_v60 }
 0x4cc   : > { %v5893_v63 = vmul.f32 -1.442695, %v5127_v53  ;;  %v4909_v44 = vmul.f32 %v4865_v3, %v8347_v25  ;;  %v8577_v21 = vadd.f32 %v5096_v50, %v4910_v5 }
 0x4cd   : > { %v4767_v57 = vpop.permute.xlu0 %4766 }
 0x4ce   : > { %6431 = vpow2.f32 %v5893_v63  ;;  %v5133_v37 = vadd.f32 %v5089_v41, %v4909_v44  ;;  %v5900_v9 = vmul.f32 -1.442695, %v8577_v21  ;;  %v4879_v61 = vrot.slane %v4767_v57, %v8484_v60 }
 0x4cf   : > { %6433 = vpow2.f32 %v5898_v22 }
 0x4d0   : > { %v5899_v42 = vmul.f32 -1.442695, %v5133_v37  ;;  %6435 = vpow2.f32 %v5900_v9  ;;  %v4911_v36 = vmul.f32 %v4879_v61, %v8356_v62 }
 0x4d1   : > { %v4991_v1 = vpop.permute.xlu0 %4990 }
 0x4d2   : > { %6437 = vpow2.f32 %v5899_v42  ;;  %v5103_v25 = vrot.slane %v4991_v1, %v8484_v60 }
 0x4d3   : > { %6439 = vrcp.f32 %v5188_v49 }
 0x4d4   : > { %v6430_v56 = vpop.eup %6429  ;;  %v5135_v38 = vadd.f32 %v5103_v25, %v4911_v36 }
 0x4d5   : > { %v5189_v33 = vadd.f32 1.0, %v6430_v56 }
 0x4d6   : > { %v5901_v4 = vmul.f32 -1.442695, %v5135_v38 }
 0x4d7   : > { %6441 = vrcp.f32 %v5189_v33 }
 0x4d8   : > { %v6432_v23 = vpop.eup %6431  ;;  %6443 = vpow2.f32 %v5901_v4 }
 0x4d9   : > { %6445 = vrcp.f32 %v5190_v58  ;;  %v5191_v55 = vadd.f32 1.0, %v6432_v23  ;;  %v6434_v0 = vpop.eup %6433 }
 0x4da   : > { %v6436_v59 = vpop.eup %6435  ;;  %v5196_v26 = vadd.f32 1.0, %v6434_v0 }
 0x4db   : > { %6447 = vrcp.f32 %v5191_v55  ;;  %v5198_v60 = vadd.f32 1.0, %v6436_v59 }
 0x4dc   : > { %v6438_v39 = vpop.eup %6437 }
 0x4dd   : > { %v5197_v52 = vadd.f32 1.0, %v6438_v39  ;;  %v6440_v62 = vpop.eup %6439 }
 0x4de   : > { %v5236_v43 = vmul.f32 %v6440_v62, %v8546_v12 }
 0x4df   : > { %6449 = vrcp.f32 %v5197_v52 }
 0x4e0   : > { %6451 = vrcp.f32 %v5196_v26 }
 0x4e1   : > { %v6442_v15 = vpop.eup %6441  ;;  %6453 = vrcp.f32 %v5198_v60 }
 0x4e2   : > { %v6444_v46 = vpop.eup %6443  ;;  %v5237_v7 = vmul.f32 %v6442_v15, %v5125_v20 }
 0x4e3   : > { %v6446_v48 = vpop.eup %6445  ;;  %v5199_v31 = vadd.f32 1.0, %v6444_v46 }
 0x4e4   : > { %v5282_v16 = vcombine.low %v5236_v43, %v5237_v7  ;;  %v5238_v19 = vmul.f32 %v6446_v48, %v8552_v14 }
 0x4e5   : > { %v6448_v13 = vpop.eup %6447  ;;  %6455 = vrcp.f32 %v5199_v31 }
 0x4e6   : > { %v5239_v8 = vmul.f32 %v6448_v13, %v5127_v53  ;;  %v5290_v29 = vrot.slane %v5282_v16, %v8085_v54 }
 0x4e8   : > { %v5283_v18 = vcombine.low %v5238_v19, %v5239_v8 }
 0x4e9   : > { %v6450_v45 = vpop.eup %6449 }
 0x4ea   : > { %v5297_v12 = vrot.slane %v5283_v18, %v8085_v54  ;;  %v6452_v6 = vpop.eup %6451  ;;  %v5245_v51 = vmul.f32 %v6450_v45, %v5133_v37 }
 0x4eb   : > { %v6454_v34 = vpop.eup %6453  ;;  %v5244_v27 = vmul.f32 %v6452_v6, %v8567_v10 }
 0x4ec   : > { %v5298_v11 = vcombine.low %v5290_v29, %v5297_v12  ;;  %v5299_v28 = vcombine.high %v5290_v29, %v5297_v12  ;;  %v5246_v47 = vmul.f32 %v6454_v34, %v8577_v21 }
 0x4ed   : > { %v5318_v20 = vcombine.low %v5244_v27, %v5245_v51 }
 0x4ee   : > { %5346 = vst [vmem:[%s8533_s12 + $0x10] sm:$0xff] %v5298_v11  ;;  %5347 = vst [vmem:[%s8533_s12 + $0x18] sm:$0xff] %v5299_v28 }
 0x4ef   : > { %v6456_v14 = vpop.eup %6455  ;;  %v5326_v17 = vrot.slane %v5318_v20, %v8085_v54 }
 0x4f0   : > { %v5247_v32 = vmul.f32 %v6456_v14, %v5135_v38 }
 0x4f2   : > { %v5319_v24 = vcombine.low %v5246_v47, %v5247_v32 }
 0x4f4   : > { %v5333_v5 = vrot.slane %v5319_v24, %v8085_v54 }
 0x4f6   : > { %v5334_v10 = vcombine.low %v5326_v17, %v5333_v5  ;;  %v5335_v30 = vcombine.high %v5326_v17, %v5333_v5 }
 0x4f8   : > { %5350 = vst [vmem:[%s8533_s12 + $0x30] sm:$0xff] %v5334_v10  ;;  %5351 = vst [vmem:[%s8533_s12 + $0x38] sm:$0xff] %v5335_v30 }
 0x4f9   : > { %6527 = shalt.err (!%p6524_p3)
}
 0x4fa   : > { %s6528_s30 = scalar_lea.hbm %s8598_s22, 1024  ;;  %s6532_s8 = scalar_lea.hbm %s8651_s4, 2048 }
 0x4fb   : > { %p6529_p4 = scmp.ne.s32.totalorder %s8598_s22, %s6528_s30  ;;  %p6533_p9 = scmp.lt.u32.totalorder %s8598_s22, %s8651_s4 }
 0x4fc   : > { %p6534_p10 = scmp.lt.u32.totalorder %s6532_s8, %s6528_s30  ;;  %p6536_p12 = scmp.lt.u32.totalorder %s6528_s30, %s8598_s22 }
 0x4fd   : > { %p6530_p7 = pnand %p6529_p4, %p6647_p5 }
 0x4fe   : > { %p6535_p11 = por %p6534_p10, %p6533_p9 }
 0x4ff   : > { %p6531_p8 = pneg %p6530_p7 }
 0x500   : > { %p6537_p13 = por %p6536_p12, %p6535_p11 }
 0x502   : > { %p6538_p0 = pnand %p6537_p13, %p6531_p8 }
 0x504   : > { %6541 = shalt.err (!%p6538_p0)
}
 0x505   : > { %s6582_s11 = smov 256   ;;  %s6583_s12 = smov 16  }
 0x506   : > { %6249 = dma.vmem_to_hbm [thread:$0]  (%p6647_p5), %s8600_s5, 1024, %s8598_s22, %s8606_s19, %s6582_s11, %s6582_s11, %s6583_s12  }
 0x507 PF: > { %p6255_p1 = scmp.ge.s32.totalorder %s6576_s18, 2  ;;  %s5381_s13 = sand.u32 1, %s6564_s15  }
 0x508   : > { %s5382_s14 = scalar_lea.sflag [#allocation3], %s5381_s13 }
 0x509   : > { %p6252_p2 = pnand %p6255_p1, %p6651_p6 }
 0x50b   : > { %6559 = dma.done.wait (!%p6252_p2), %s5382_s14, 1024  }
 0x50c   : > { %6561 = vsyncadd (!%p6252_p2), %s5382_s14, 4294966272  ;;  %p14_p3 = scmp.ge.s32.totalorder %s6634_s21, 4   ;;  %s8680_s15 = smov %s6568_s16 }
 0x50d   : > { %s8681_s16 = smov %s6572_s17  ;;  %s8682_s17 = smov %s6645_s24 }
 0x50e   : > { %s8683_s18 = smov %s6634_s21  ;;  %16 = sbr.rel (!%p14_p3) target bundleno = 3 (0x3), region = 81 }
 0x515   :  { %5387 = vsyncpa [#allocation3], 1 }
 0x516   :  { %5389 = vsyncpa [#allocation3 + $0x1], 1 }

</bundles_post_ra>
